<compile_context>
chip_gen: v7x
topology: tpu7x:2x2x1
jax: 0.10.0
libtpu: 0.0.40
codegen_flags: <defaults>
</compile_context>

<pallas_src>
import functools
import jax
import jax.numpy as jnp
from jax.experimental import pallas as pl
from jax.experimental.pallas import tpu as pltpu

LN_EPS = 1e-6          # nanofm-style LayerNorm eps
NEG_INF = -1e30        # large finite negative (avoids exp(-inf - -inf) NaN corner)


def _layernorm(x, w, b):
    """LayerNorm in f32. x: (M, D); w, b: (1, D)."""
    mu = jnp.mean(x, axis=-1, keepdims=True)
    xc = x - mu
    var = jnp.mean(xc * xc, axis=-1, keepdims=True)
    return xc * jax.lax.rsqrt(var + LN_EPS) * w + b


# ----------------------------------------------------------------------------
# Kernel 1: fused transformer trunk (a group of layers per pallas_call)
# ----------------------------------------------------------------------------
def trunk_kernel(x_ref, ln1w_ref, ln1b_ref, wq_ref, wk_ref, wv_ref, wo_ref,
                 ln2w_ref, ln2b_ref, w1_ref, w2_ref, out_ref,
                 *, num_layers, num_heads, head_dim):
    bt, L, D = x_ref.shape
    x = x_ref[...].reshape(bt * L, D)                       # (M, D) f32, M = bt*L

    # causal additive mask, built once and reused by every layer / head
    row = jax.lax.broadcasted_iota(jnp.int32, (L, L), 0)
    col = jax.lax.broadcasted_iota(jnp.int32, (L, L), 1)
    neg = jnp.where(col <= row, 0.0, NEG_INF).astype(jnp.float32)   # (L, L)
    scale = 1.0 / (float(head_dim) ** 0.5)

    for layer in range(num_layers):                          # static unroll (small)
        # --- attention sub-block (pre-norm) ---
        h = _layernorm(x, ln1w_ref[layer], ln1b_ref[layer]).astype(jnp.bfloat16)
        attn = jnp.zeros((bt * L, D), jnp.float32)
        for hh in range(num_heads):                          # per-head weights are
            wq = wq_ref[layer, hh]                           # pre-split in wrapper:
            wk = wk_ref[layer, hh]                           # no 64-offset activation
            wv = wv_ref[layer, hh]                           # slicing, no concat.
            q = jnp.dot(h, wq, preferred_element_type=jnp.float32)   # (M, hd)
            k = jnp.dot(h, wk, preferred_element_type=jnp.float32)
            v = jnp.dot(h, wv, preferred_element_type=jnp.float32)
            q3 = q.reshape(bt, L, head_dim).astype(jnp.bfloat16)
            k3 = k.reshape(bt, L, head_dim).astype(jnp.bfloat16)
            v3 = v.reshape(bt, L, head_dim).astype(jnp.bfloat16)
            s = jnp.einsum('bld,bmd->blm', q3, k3,
                           preferred_element_type=jnp.float32) * scale + neg[None]
            m = jnp.max(s, axis=-1, keepdims=True)
            e = jnp.exp(s - m)
            p = e * pl.reciprocal(jnp.sum(e, axis=-1, keepdims=True), approx=True)
            o = jnp.einsum('blm,bmd->bld', p.astype(jnp.bfloat16), v3,
                           preferred_element_type=jnp.float32)        # (bt, L, hd)
            # fold head back into the model dim via its slice of the output proj
            attn = attn + jnp.dot(
                o.reshape(bt * L, head_dim).astype(jnp.bfloat16),
                wo_ref[layer, hh], preferred_element_type=jnp.float32)
        x = x + attn

        # --- MLP sub-block (pre-norm) ---
        h2 = _layernorm(x, ln2w_ref[layer], ln2b_ref[layer]).astype(jnp.bfloat16)
        z = jnp.dot(h2, w1_ref[layer], preferred_element_type=jnp.float32)
        # TODO(synk): PyTorch nn.GELU default is the exact erf form; tanh approx used
        # for guaranteed Mosaic lowering (max abs diff ~1e-3).
        z = jax.nn.gelu(z, approximate=True).astype(jnp.bfloat16)
        x = x + jnp.dot(z, w2_ref[layer], preferred_element_type=jnp.float32)

    out_ref[...] = x.reshape(bt, L, D)


def _pick_batch_tile(B, L, target_rows=256):
    """Largest divisor of B whose tile holds ~target_rows rows (BT*L)."""
    bt = max(1, min(B, max(1, target_rows // max(L, 1))))
    while B % bt:
        bt -= 1
    return bt


def run_trunk_group(x, g, *, num_heads, head_dim):
    """Run one fused group of transformer layers. x: (B, L, D) f32."""
    B, L, D = x.shape
    G = g["ln1_w"].shape[0]
    Hm = g["w1"].shape[2]
    BT = _pick_batch_tile(B, L)                 # toy config: whole batch per step
    kernel = functools.partial(trunk_kernel, num_layers=G,
                               num_heads=num_heads, head_dim=head_dim)
    return pl.pallas_call(
        kernel,
        out_shape=jax.ShapeDtypeStruct((B, L, D), jnp.float32),
        grid=(B // BT,),
        in_specs=[
            pl.BlockSpec((BT, L, D), lambda b: (b, 0, 0)),
            pl.BlockSpec((G, 1, D), lambda b: (0, 0, 0)),
            pl.BlockSpec((G, 1, D), lambda b: (0, 0, 0)),
            pl.BlockSpec((G, num_heads, D, head_dim), lambda b: (0, 0, 0, 0)),
            pl.BlockSpec((G, num_heads, D, head_dim), lambda b: (0, 0, 0, 0)),
            pl.BlockSpec((G, num_heads, D, head_dim), lambda b: (0, 0, 0, 0)),
            pl.BlockSpec((G, num_heads, head_dim, D), lambda b: (0, 0, 0, 0)),
            pl.BlockSpec((G, 1, D), lambda b: (0, 0, 0)),
            pl.BlockSpec((G, 1, D), lambda b: (0, 0, 0)),
            pl.BlockSpec((G, D, Hm), lambda b: (0, 0, 0)),
            pl.BlockSpec((G, Hm, D), lambda b: (0, 0, 0)),
        ],
        out_specs=pl.BlockSpec((BT, L, D), lambda b: (b, 0, 0)),
        compiler_params=pltpu.CompilerParams(dimension_semantics=("parallel",)),
    )(x, g["ln1_w"], g["ln1_b"], g["wq"], g["wk"], g["wv"], g["wo"],
      g["ln2_w"], g["ln2_b"], g["w1"], g["w2"])


# ----------------------------------------------------------------------------
# Kernel 2: fused output head + cross-entropy (vocab-tiled, online log-sum-exp)
# ----------------------------------------------------------------------------
def head_ce_kernel(tgt_ref, valid_ref, x_ref, nw_ref, nb_ref, w_ref,
                   logits_ref, nll_ref, h_scr, m_scr, s_scr, t_scr):
    v = pl.program_id(1)
    nv = pl.num_programs(1)

    @pl.when(v == 0)
    def _init():
        # LayerNorm computed once per row tile, cached in bf16 scratch for all V tiles
        h = _layernorm(x_ref[...], nw_ref[...], nb_ref[...])
        h_scr[...] = h.astype(jnp.bfloat16)
        m_scr[...] = jnp.full_like(m_scr, NEG_INF)
        s_scr[...] = jnp.zeros_like(s_scr)
        t_scr[...] = jnp.zeros_like(t_scr)

    logits = jnp.dot(h_scr[...], w_ref[...],
                     preferred_element_type=jnp.float32)      # (RT, VT)
    logits_ref[...] = logits

    # online log-sum-exp over vocab tiles
    m_prev = m_scr[...]
    m_new = jnp.maximum(m_prev, jnp.max(logits, axis=-1, keepdims=True))
    s_scr[...] = s_scr[...] * jnp.exp(m_prev - m_new) + \
        jnp.sum(jnp.exp(logits - m_new), axis=-1, keepdims=True)
    m_scr[...] = m_new

    # target logit via iota == target compare (no dense one-hot)
    rt, vt = logits.shape
    col = jax.lax.broadcasted_iota(jnp.int32, (rt, vt), 1) + v * vt
    hit = col == tgt_ref[...]                                 # (RT, VT)
    t_scr[...] += jnp.sum(jnp.where(hit, logits, 0.0), axis=-1, keepdims=True)

    @pl.when(v == nv - 1)
    def _finalize():
        nll = m_scr[...] + jnp.log(s_scr[...]) - t_scr[...]   # (RT, 1)
        # Tiny epilogue store (one column per row tile); CE no longer streams a
        # (B, L, V) one-hot nor re-reads logits from HBM.
        nll_ref[...] = nll * valid_ref[...]


def run_head_ce(x_flat, targets_flat, valid_flat, norm_w, norm_b, w_logits,
                *, v_tile=128, target_rows=256):
    """x_flat: (N, D) f32; targets/valid: (N, 1). Returns (logits (N,V) f32,
    valid-weighted per-token nll (N, 1) f32)."""
    N, D = x_flat.shape
    V = w_logits.shape[1]
    assert V % v_tile == 0, "vocab must be a multiple of the vocab tile"
    RT = min(N, target_rows)
    while RT > 8 and (N % RT or RT % 8):
        RT -= 8
    if N % RT:
        RT = N

    return pl.pallas_call(
        head_ce_kernel,
        out_shape=(jax.ShapeDtypeStruct((N, V), jnp.float32),
                   jax.ShapeDtypeStruct((N, 1), jnp.float32)),
        grid=(N // RT, V // v_tile),
        in_specs=[
            pl.BlockSpec((RT, 1), lambda r, v: (r, 0)),        # targets (int32)
            pl.BlockSpec((RT, 1), lambda r, v: (r, 0)),        # valid mask (f32)
            pl.BlockSpec((RT, D), lambda r, v: (r, 0)),        # activations
            pl.BlockSpec((1, D), lambda r, v: (0, 0)),         # out_norm weight
            pl.BlockSpec((1, D), lambda r, v: (0, 0)),         # out_norm bias
            pl.BlockSpec((D, v_tile), lambda r, v: (0, v)),    # to_logits (bf16)
        ],
        out_specs=(
            pl.BlockSpec((RT, v_tile), lambda r, v: (r, v)),   # logits
            pl.BlockSpec((RT, 1), lambda r, v: (r, 0)),        # weighted nll
        ),
        scratch_shapes=[
            pltpu.VMEM((RT, D), jnp.bfloat16),                 # cached LN(x)
            pltpu.VMEM((RT, 1), jnp.float32),                  # running max
            pltpu.VMEM((RT, 1), jnp.float32),                  # running sum-exp
            pltpu.VMEM((RT, 1), jnp.float32),                  # target logit
        ],
        compiler_params=pltpu.CompilerParams(
            dimension_semantics=("parallel", "arbitrary")),
    )(targets_flat, valid_flat, x_flat, norm_w, norm_b, w_logits)


# ----------------------------------------------------------------------------
# Parameters + weight packing (layer fusion / per-head split / bf16 cast)
# ----------------------------------------------------------------------------
def init_params(key, *, dim, depth, head_dim, mlp_ratio, vocab_size,
                max_seq_len, init_std, padding_idx=-100):
    hidden = int(dim * mlp_ratio)
    keys = jax.random.split(key, 3 + 4 * depth)
    emb = init_std * jax.random.normal(keys[0], (vocab_size, dim), jnp.float32)
    if -vocab_size <= padding_idx < vocab_size:
        # nn.Embedding(padding_idx=...) zeroes that row
        emb = emb.at[padding_idx % vocab_size].set(0.0)
    params = {
        "emb": emb,
        "pos": init_std * jax.random.normal(keys[1], (1, max_seq_len, dim), jnp.float32),
        # NOTE: PyTorch zero-inits to_logits.weight; a small normal (bf16) is used so
        # the synthetic forward produces non-trivial logits.
        "to_logits": (init_std * jax.random.normal(
            keys[2], (dim, vocab_size), jnp.float32)).astype(jnp.bfloat16),
        "out_norm_w": jnp.ones((1, dim), jnp.float32),
        "out_norm_b": jnp.zeros((1, dim), jnp.float32),
        "layers": [],
    }
    for d in range(depth):
        k0, k1, k2, k3 = keys[3 + 4 * d:3 + 4 * (d + 1)]
        params["layers"].append({
            "ln1_w": jnp.ones((1, dim), jnp.float32),
            "ln1_b": jnp.zeros((1, dim), jnp.float32),
            "qkv_w": init_std * jax.random.normal(k0, (dim, 3 * dim), jnp.float32),
            "proj_w": init_std * jax.random.normal(k1, (dim, dim), jnp.float32),
            "ln2_w": jnp.ones((1, dim), jnp.float32),
            "ln2_b": jnp.zeros((1, dim), jnp.float32),
            "fc1_w": init_std * jax.random.normal(k2, (dim, hidden), jnp.float32),
            "fc2_w": init_std * jax.random.normal(k3, (hidden, dim), jnp.float32),
        })
    return params


def pack_trunk_layers(layers, *, num_heads, head_dim, layers_per_call=2):
    """Stack layer weights into fused-kernel layout (bf16, per-head split)."""
    groups = []
    for s in range(0, len(layers), layers_per_call):
        chunk = layers[s:s + layers_per_call]
        stack = lambda k: jnp.stack([c[k] for c in chunk], axis=0)
        qkv = stack("qkv_w")                                  # (G, D, 3D)
        G, D, _ = qkv.shape

        def split_heads(w):                                   # (G, D, D) -> (G, H, D, hd)
            return w.reshape(G, D, num_heads, head_dim).transpose(0, 2, 1, 3)

        proj = stack("proj_w")                                # (G, D, D)
        groups.append({
            "ln1_w": stack("ln1_w"), "ln1_b": stack("ln1_b"),
            "wq": split_heads(qkv[:, :, :D]).astype(jnp.bfloat16),
            "wk": split_heads(qkv[:, :, D:2 * D]).astype(jnp.bfloat16),
            "wv": split_heads(qkv[:, :, 2 * D:]).astype(jnp.bfloat16),
            "wo": proj.reshape(G, num_heads, head_dim, D).astype(jnp.bfloat16),
            "ln2_w": stack("ln2_w"), "ln2_b": stack("ln2_b"),
            "w1": stack("fc1_w").astype(jnp.bfloat16),
            "w2": stack("fc2_w").astype(jnp.bfloat16),
        })
    return groups


# ----------------------------------------------------------------------------
# Forward (GPT.forward semantics): returns (loss, {'ppl': ...}, logits)
# ----------------------------------------------------------------------------
def gpt_forward(seq, params, *, num_heads, head_dim, vocab_size,
                padding_idx=-100, layers_per_call=2):
    input_seq = seq[:, :-1]
    target_seq = seq[:, 1:]
    B, L = input_seq.shape
    D = params["pos"].shape[-1]

    # embedding gather + positional embedding (glue)
    x = jnp.take(params["emb"], input_seq, axis=0) + params["pos"][:, :L, :]

    # fused transformer trunk
    for g in pack_trunk_layers(params["layers"], num_heads=num_heads,
                               head_dim=head_dim, layers_per_call=layers_per_call):
        x = run_trunk_group(x, g, num_heads=num_heads, head_dim=head_dim)

    # fused out_norm + to_logits + cross-entropy (ignore_index=padding_idx)
    valid = (target_seq != padding_idx)
    safe_t = jnp.where(valid, target_seq, 0).astype(jnp.int32)
    validf = valid.astype(jnp.float32)
    logits_flat, nll_w = run_head_ce(
        x.reshape(B * L, D),
        safe_t.reshape(B * L, 1),
        validf.reshape(B * L, 1),
        params["out_norm_w"], params["out_norm_b"], params["to_logits"])
    logits = logits_flat.reshape(B, L, vocab_size)
    loss = jnp.sum(nll_w) / jnp.maximum(jnp.sum(validf), 1.0)
    return loss, {"ppl": jnp.exp(loss)}, logits


if __name__ == "__main__":
    # Small, TPU-friendly configuration consistent with the module's shape logic.
    dim = 128
    depth = 2
    head_dim = 64
    num_heads = dim // head_dim
    mlp_ratio = 4.0
    vocab_size = 256
    max_seq_len = 16
    padding_idx = -100
    init_std = 0.02
    B = 2
    seq_len = 9          # autoregressive input/target length L = 8

    key = jax.random.PRNGKey(0)
    pkey, dkey = jax.random.split(key)
    params = init_params(pkey, dim=dim, depth=depth, head_dim=head_dim,
                         mlp_ratio=mlp_ratio, vocab_size=vocab_size,
                         max_seq_len=max_seq_len, init_std=init_std,
                         padding_idx=padding_idx)
    seq = jax.random.randint(dkey, (B, seq_len), 0, vocab_size, dtype=jnp.int32)

    fwd = jax.jit(functools.partial(gpt_forward, num_heads=num_heads,
                                    head_dim=head_dim, vocab_size=vocab_size,
                                    padding_idx=padding_idx))
    loss, metrics, logits = fwd(seq, params)
    jax.block_until_ready((loss, metrics["ppl"], logits))

    assert logits.shape == (B, seq_len - 1, vocab_size)
    assert bool(jnp.isfinite(loss))
    print("KERNEL_OK")
</pallas_src>

<mosaic_0001>
module attributes {stable_mosaic.version = 11 : i64} {
  func.func @head_ce_kernel(%arg0: i32, %arg1: i32, %arg2: memref<16x1xi32, #tpu.memory_space<vmem>>, %arg3: memref<16x1xf32, #tpu.memory_space<vmem>>, %arg4: memref<16x128xf32, #tpu.memory_space<vmem>>, %arg5: memref<1x128xf32, #tpu.memory_space<vmem>>, %arg6: memref<1x128xf32, #tpu.memory_space<vmem>>, %arg7: memref<128x128xbf16, #tpu.memory_space<vmem>>, %arg8: memref<16x128xf32, #tpu.memory_space<vmem>>, %arg9: memref<16x1xf32, #tpu.memory_space<vmem>>, %arg10: memref<16x128xbf16, #tpu.memory_space<vmem>>, %arg11: memref<16x1xf32, #tpu.memory_space<vmem>>, %arg12: memref<16x1xf32, #tpu.memory_space<vmem>>, %arg13: memref<16x1xf32, #tpu.memory_space<vmem>>) attributes {dimension_semantics = [#tpu.dimension_semantics<parallel>, #tpu.dimension_semantics<arbitrary>], iteration_bounds = array<i64: 1, 2>, scalar_prefetch = 0 : i64, scratch_operands = 4 : i64, tpu.core_type = #tpu.core_type<tc>, window_params = [{transform_indices = @transform_0, window_bounds = array<i64: 16, 1>}, {transform_indices = @transform_1, window_bounds = array<i64: 16, 1>}, {transform_indices = @transform_2, window_bounds = array<i64: 16, 128>}, {pipeline_mode = #tpu.pipeline_mode<synchronous>, transform_indices = @transform_3, window_bounds = array<i64: 1, 128>}, {pipeline_mode = #tpu.pipeline_mode<synchronous>, transform_indices = @transform_4, window_bounds = array<i64: 1, 128>}, {transform_indices = @transform_5, window_bounds = array<i64: 128, 128>}, {transform_indices = @transform_6, window_bounds = array<i64: 16, 128>}, {transform_indices = @transform_7, window_bounds = array<i64: 16, 1>}]} {
    %c0_i32 = arith.constant 0 : i32
    %0 = arith.cmpi eq, %arg1, %c0_i32 : i32
    %1 = arith.extui %0 : i1 to i32
    %c0_i32_0 = arith.constant 0 : i32
    %2 = arith.cmpi ne, %1, %c0_i32_0 : i32
    scf.if %2 {
      %c0_25 = arith.constant 0 : index
      %c0_26 = arith.constant 0 : index
      %40 = vector.load %arg4[%c0_25, %c0_26] : memref<16x128xf32, #tpu.memory_space<vmem>>, vector<16x128xf32>
      %c0_27 = arith.constant 0 : index
      %c0_28 = arith.constant 0 : index
      %41 = vector.load %arg5[%c0_27, %c0_28] : memref<1x128xf32, #tpu.memory_space<vmem>>, vector<1x128xf32>
      %c0_29 = arith.constant 0 : index
      %c0_30 = arith.constant 0 : index
      %42 = vector.load %arg6[%c0_29, %c0_30] : memref<1x128xf32, #tpu.memory_space<vmem>>, vector<1x128xf32>
      %cst_31 = arith.constant dense<0.000000e+00> : vector<16xf32>
      %43 = vector.multi_reduction <add>, %40, %cst_31 [1] : vector<16x128xf32> to vector<16xf32>
      %44 = vector.shape_cast %43 : vector<16xf32> to vector<16x1xf32>
      %cst_32 = arith.constant 1.280000e+02 : f32
      %45 = vector.broadcast %cst_32 : f32 to vector<16x1xf32>
      %46 = arith.divf %44, %45 : vector<16x1xf32>
      %47 = vector.broadcast %46 : vector<16x1xf32> to vector<16x128xf32>
      %48 = arith.subf %40, %47 : vector<16x128xf32>
      %49 = arith.mulf %48, %48 : vector<16x128xf32>
      %cst_33 = arith.constant dense<0.000000e+00> : vector<16xf32>
      %50 = vector.multi_reduction <add>, %49, %cst_33 [1] : vector<16x128xf32> to vector<16xf32>
      %51 = vector.shape_cast %50 : vector<16xf32> to vector<16x1xf32>
      %cst_34 = arith.constant 1.280000e+02 : f32
      %52 = vector.broadcast %cst_34 : f32 to vector<16x1xf32>
      %53 = arith.divf %51, %52 : vector<16x1xf32>
      %cst_35 = arith.constant 9.99999997E-7 : f32
      %54 = vector.broadcast %cst_35 : f32 to vector<16x1xf32>
      %55 = arith.addf %53, %54 : vector<16x1xf32>
      %56 = math.rsqrt %55 : vector<16x1xf32>
      %57 = vector.broadcast %56 : vector<16x1xf32> to vector<16x128xf32>
      %58 = arith.mulf %48, %57 : vector<16x128xf32>
      %59 = vector.broadcast %41 : vector<1x128xf32> to vector<16x128xf32>
      %60 = arith.mulf %58, %59 : vector<16x128xf32>
      %61 = vector.broadcast %42 : vector<1x128xf32> to vector<16x128xf32>
      %62 = arith.addf %60, %61 : vector<16x128xf32>
      %63 = arith.truncf %62 : vector<16x128xf32> to vector<16x128xbf16>
      %c0_36 = arith.constant 0 : index
      %c0_37 = arith.constant 0 : index
      %64 = vector.load %arg10[%c0_36, %c0_37] : memref<16x128xbf16, #tpu.memory_space<vmem>>, vector<16x128xbf16>
      tpu.vector_store %arg10[%c0_36, %c0_37], %63 {strides = array<i32>} : memref<16x128xbf16, #tpu.memory_space<vmem>>, vector<16x128xbf16>,
      %cst_38 = arith.constant -1.000000e+30 : f32
      %65 = vector.broadcast %cst_38 : f32 to vector<16x1xf32>
      %c0_39 = arith.constant 0 : index
      %c0_40 = arith.constant 0 : index
      %66 = vector.load %arg11[%c0_39, %c0_40] : memref<16x1xf32, #tpu.memory_space<vmem>>, vector<16x1xf32>
      tpu.vector_store %arg11[%c0_39, %c0_40], %65 {strides = array<i32>} : memref<16x1xf32, #tpu.memory_space<vmem>>, vector<16x1xf32>,
      %cst_41 = arith.constant 0.000000e+00 : f32
      %67 = vector.broadcast %cst_41 : f32 to vector<16x1xf32>
      %c0_42 = arith.constant 0 : index
      %c0_43 = arith.constant 0 : index
      %68 = vector.load %arg12[%c0_42, %c0_43] : memref<16x1xf32, #tpu.memory_space<vmem>>, vector<16x1xf32>
      tpu.vector_store %arg12[%c0_42, %c0_43], %67 {strides = array<i32>} : memref<16x1xf32, #tpu.memory_space<vmem>>, vector<16x1xf32>,
      %cst_44 = arith.constant 0.000000e+00 : f32
      %69 = vector.broadcast %cst_44 : f32 to vector<16x1xf32>
      %c0_45 = arith.constant 0 : index
      %c0_46 = arith.constant 0 : index
      %70 = vector.load %arg13[%c0_45, %c0_46] : memref<16x1xf32, #tpu.memory_space<vmem>>, vector<16x1xf32>
      tpu.vector_store %arg13[%c0_45, %c0_46], %69 {strides = array<i32>} : memref<16x1xf32, #tpu.memory_space<vmem>>, vector<16x1xf32>,
    } else {
    }
    %c0 = arith.constant 0 : index
    %c0_1 = arith.constant 0 : index
    %3 = vector.load %arg10[%c0, %c0_1] : memref<16x128xbf16, #tpu.memory_space<vmem>>, vector<16x128xbf16>
    %c0_2 = arith.constant 0 : index
    %c0_3 = arith.constant 0 : index
    %4 = vector.load %arg7[%c0_2, %c0_3] : memref<128x128xbf16, #tpu.memory_space<vmem>>, vector<128x128xbf16>
    %cst = arith.constant dense<0.000000e+00> : vector<16x128xf32>
    %5 = tpu.matmul %3, %4, %cst {dimension_numbers = #tpu.dot_dimension_numbers<[1], [0], [0], [1], [0, 0, 1, 1], [], []>} : vector<16x128xbf16>, vector<128x128xbf16>, vector<16x128xf32> -> vector<16x128xf32>
    %c0_4 = arith.constant 0 : index
    %c0_5 = arith.constant 0 : index
    %6 = vector.load %arg8[%c0_4, %c0_5] : memref<16x128xf32, #tpu.memory_space<vmem>>, vector<16x128xf32>
    tpu.vector_store %arg8[%c0_4, %c0_5], %5 {strides = array<i32>} : memref<16x128xf32, #tpu.memory_space<vmem>>, vector<16x128xf32>,
    %c0_6 = arith.constant 0 : index
    %c0_7 = arith.constant 0 : index
    %7 = vector.load %arg11[%c0_6, %c0_7] : memref<16x1xf32, #tpu.memory_space<vmem>>, vector<16x1xf32>
    %cst_8 = arith.constant dense<0xFF800000> : vector<16xf32>
    %8 = vector.multi_reduction <maximumf>, %5, %cst_8 [1] : vector<16x128xf32> to vector<16xf32>
    %9 = vector.shape_cast %8 : vector<16xf32> to vector<16x1xf32>
    %10 = arith.maximumf %7, %9 : vector<16x1xf32>
    %c0_9 = arith.constant 0 : index
    %c0_10 = arith.constant 0 : index
    %11 = vector.load %arg12[%c0_9, %c0_10] : memref<16x1xf32, #tpu.memory_space<vmem>>, vector<16x1xf32>
    %12 = arith.subf %7, %10 : vector<16x1xf32>
    %13 = math.exp %12 : vector<16x1xf32>
    %14 = arith.mulf %11, %13 : vector<16x1xf32>
    %15 = vector.broadcast %10 : vector<16x1xf32> to vector<16x128xf32>
    %16 = arith.subf %5, %15 : vector<16x128xf32>
    %17 = math.exp %16 : vector<16x128xf32>
    %cst_11 = arith.constant dense<0.000000e+00> : vector<16xf32>
    %18 = vector.multi_reduction <add>, %17, %cst_11 [1] : vector<16x128xf32> to vector<16xf32>
    %19 = vector.shape_cast %18 : vector<16xf32> to vector<16x1xf32>
    %20 = arith.addf %14, %19 : vector<16x1xf32>
    %c0_12 = arith.constant 0 : index
    %c0_13 = arith.constant 0 : index
    %21 = vector.load %arg12[%c0_12, %c0_13] : memref<16x1xf32, #tpu.memory_space<vmem>>, vector<16x1xf32>
    tpu.vector_store %arg12[%c0_12, %c0_13], %20 {strides = array<i32>} : memref<16x1xf32, #tpu.memory_space<vmem>>, vector<16x1xf32>,
    %c0_14 = arith.constant 0 : index
    %c0_15 = arith.constant 0 : index
    %22 = vector.load %arg11[%c0_14, %c0_15] : memref<16x1xf32, #tpu.memory_space<vmem>>, vector<16x1xf32>
    tpu.vector_store %arg11[%c0_14, %c0_15], %10 {strides = array<i32>} : memref<16x1xf32, #tpu.memory_space<vmem>>, vector<16x1xf32>,
    %23 = tpu.iota {dimensions = array<i32: 1>} : vector<16x128xi32>
    %c128_i32 = arith.constant 128 : i32
    %24 = arith.muli %arg1, %c128_i32 : i32
    %25 = vector.broadcast %24 : i32 to vector<16x128xi32>
    %26 = arith.addi %23, %25 : vector<16x128xi32>
    %c0_16 = arith.constant 0 : index
    %c0_17 = arith.constant 0 : index
    %27 = vector.load %arg2[%c0_16, %c0_17] : memref<16x1xi32, #tpu.memory_space<vmem>>, vector<16x1xi32>
    %28 = vector.broadcast %27 : vector<16x1xi32> to vector<16x128xi32>
    %29 = arith.cmpi eq, %26, %28 : vector<16x128xi32>
    %c0_18 = arith.constant 0 : index
    %c0_19 = arith.constant 0 : index
    %30 = vector.load %arg13[%c0_18, %c0_19] : memref<16x1xf32, #tpu.memory_space<vmem>>, vector<16x1xf32>
    %cst_20 = arith.constant 0.000000e+00 : f32
    %31 = vector.broadcast %cst_20 : f32 to vector<16x128xf32>
    %32 = arith.select %29, %5, %31 : vector<16x128xi1>, vector<16x128xf32>
    %cst_21 = arith.constant dense<0.000000e+00> : vector<16xf32>
    %33 = vector.multi_reduction <add>, %32, %cst_21 [1] : vector<16x128xf32> to vector<16xf32>
    %34 = vector.shape_cast %33 : vector<16xf32> to vector<16x1xf32>
    %35 = arith.addf %30, %34 : vector<16x1xf32>
    %c0_22 = arith.constant 0 : index
    %c0_23 = arith.constant 0 : index
    %36 = vector.load %arg13[%c0_22, %c0_23] : memref<16x1xf32, #tpu.memory_space<vmem>>, vector<16x1xf32>
    tpu.vector_store %arg13[%c0_22, %c0_23], %35 {strides = array<i32>} : memref<16x1xf32, #tpu.memory_space<vmem>>, vector<16x1xf32>,
    %c1_i32 = arith.constant 1 : i32
    %37 = arith.cmpi eq, %arg1, %c1_i32 : i32
    %38 = arith.extui %37 : i1 to i32
    %c0_i32_24 = arith.constant 0 : i32
    %39 = arith.cmpi ne, %38, %c0_i32_24 : i32
    scf.if %39 {
      %c0_25 = arith.constant 0 : index
      %c0_26 = arith.constant 0 : index
      %40 = vector.load %arg11[%c0_25, %c0_26] : memref<16x1xf32, #tpu.memory_space<vmem>>, vector<16x1xf32>
      %c0_27 = arith.constant 0 : index
      %c0_28 = arith.constant 0 : index
      %41 = vector.load %arg12[%c0_27, %c0_28] : memref<16x1xf32, #tpu.memory_space<vmem>>, vector<16x1xf32>
      %42 = math.log %41 : vector<16x1xf32>
      %43 = arith.addf %40, %42 : vector<16x1xf32>
      %c0_29 = arith.constant 0 : index
      %c0_30 = arith.constant 0 : index
      %44 = vector.load %arg13[%c0_29, %c0_30] : memref<16x1xf32, #tpu.memory_space<vmem>>, vector<16x1xf32>
      %45 = arith.subf %43, %44 : vector<16x1xf32>
      %c0_31 = arith.constant 0 : index
      %c0_32 = arith.constant 0 : index
      %46 = vector.load %arg3[%c0_31, %c0_32] : memref<16x1xf32, #tpu.memory_space<vmem>>, vector<16x1xf32>
      %47 = arith.mulf %45, %46 : vector<16x1xf32>
      %c0_33 = arith.constant 0 : index
      %c0_34 = arith.constant 0 : index
      %48 = vector.load %arg9[%c0_33, %c0_34] : memref<16x1xf32, #tpu.memory_space<vmem>>, vector<16x1xf32>
      tpu.vector_store %arg9[%c0_33, %c0_34], %47 {strides = array<i32>} : memref<16x1xf32, #tpu.memory_space<vmem>>, vector<16x1xf32>,
    } else {
    }
    return
  }
  func.func @transform_0(%arg0: i32, %arg1: i32) -> (i32, i32) {
    %c0_i32 = arith.constant 0 : i32
    %c0_i32_0 = arith.constant 0 : i32
    return %arg0, %c0_i32 : i32, i32
  }
  func.func @transform_1(%arg0: i32, %arg1: i32) -> (i32, i32) {
    %c0_i32 = arith.constant 0 : i32
    %c0_i32_0 = arith.constant 0 : i32
    return %arg0, %c0_i32 : i32, i32
  }
  func.func @transform_2(%arg0: i32, %arg1: i32) -> (i32, i32) {
    %c0_i32 = arith.constant 0 : i32
    %c0_i32_0 = arith.constant 0 : i32
    return %arg0, %c0_i32 : i32, i32
  }
  func.func @transform_3(%arg0: i32, %arg1: i32) -> (i32, i32) {
    %c0_i32 = arith.constant 0 : i32
    %c0_i32_0 = arith.constant 0 : i32
    %c0_i32_1 = arith.constant 0 : i32
    return %c0_i32, %c0_i32_0 : i32, i32
  }
  func.func @transform_4(%arg0: i32, %arg1: i32) -> (i32, i32) {
    %c0_i32 = arith.constant 0 : i32
    %c0_i32_0 = arith.constant 0 : i32
    %c0_i32_1 = arith.constant 0 : i32
    return %c0_i32, %c0_i32_0 : i32, i32
  }
  func.func @transform_5(%arg0: i32, %arg1: i32) -> (i32, i32) {
    %c0_i32 = arith.constant 0 : i32
    %c0_i32_0 = arith.constant 0 : i32
    return %c0_i32, %arg1 : i32, i32
  }
  func.func @transform_6(%arg0: i32, %arg1: i32) -> (i32, i32) {
    %c0_i32 = arith.constant 0 : i32
    return %arg0, %arg1 : i32, i32
  }
  func.func @transform_7(%arg0: i32, %arg1: i32) -> (i32, i32) {
    %c0_i32 = arith.constant 0 : i32
    %c0_i32_0 = arith.constant 0 : i32
    return %arg0, %c0_i32 : i32, i32
  }
}

module attributes {stable_mosaic.version = 11 : i64} {
  func.func @trunk_kernel(%arg0: i32, %arg1: memref<2x8x128xf32, #tpu.memory_space<vmem>>, %arg2: memref<2x1x128xf32, #tpu.memory_space<vmem>>, %arg3: memref<2x1x128xf32, #tpu.memory_space<vmem>>, %arg4: memref<2x2x128x64xbf16, #tpu.memory_space<vmem>>, %arg5: memref<2x2x128x64xbf16, #tpu.memory_space<vmem>>, %arg6: memref<2x2x128x64xbf16, #tpu.memory_space<vmem>>, %arg7: memref<2x2x64x128xbf16, #tpu.memory_space<vmem>>, %arg8: memref<2x1x128xf32, #tpu.memory_space<vmem>>, %arg9: memref<2x1x128xf32, #tpu.memory_space<vmem>>, %arg10: memref<2x128x512xbf16, #tpu.memory_space<vmem>>, %arg11: memref<2x512x128xbf16, #tpu.memory_space<vmem>>, %arg12: memref<2x8x128xf32, #tpu.memory_space<vmem>>) attributes {dimension_semantics = [#tpu.dimension_semantics<parallel>], iteration_bounds = array<i64: 1>, scalar_prefetch = 0 : i64, scratch_operands = 0 : i64, tpu.core_type = #tpu.core_type<tc>, window_params = [{transform_indices = @transform_0, window_bounds = array<i64: 2, 8, 128>}, {pipeline_mode = #tpu.pipeline_mode<synchronous>, transform_indices = @transform_1, window_bounds = array<i64: 2, 1, 128>}, {pipeline_mode = #tpu.pipeline_mode<synchronous>, transform_indices = @transform_2, window_bounds = array<i64: 2, 1, 128>}, {pipeline_mode = #tpu.pipeline_mode<synchronous>, transform_indices = @transform_3, window_bounds = array<i64: 2, 2, 128, 64>}, {pipeline_mode = #tpu.pipeline_mode<synchronous>, transform_indices = @transform_4, window_bounds = array<i64: 2, 2, 128, 64>}, {pipeline_mode = #tpu.pipeline_mode<synchronous>, transform_indices = @transform_5, window_bounds = array<i64: 2, 2, 128, 64>}, {pipeline_mode = #tpu.pipeline_mode<synchronous>, transform_indices = @transform_6, window_bounds = array<i64: 2, 2, 64, 128>}, {pipeline_mode = #tpu.pipeline_mode<synchronous>, transform_indices = @transform_7, window_bounds = array<i64: 2, 1, 128>}, {pipeline_mode = #tpu.pipeline_mode<synchronous>, transform_indices = @transform_8, window_bounds = array<i64: 2, 1, 128>}, {pipeline_mode = #tpu.pipeline_mode<synchronous>, transform_indices = @transform_9, window_bounds = array<i64: 2, 128, 512>}, {pipeline_mode = #tpu.pipeline_mode<synchronous>, transform_indices = @transform_10, window_bounds = array<i64: 2, 512, 128>}, {transform_indices = @transform_11, window_bounds = array<i64: 2, 8, 128>}]} {
    %c0 = arith.constant 0 : index
    %c0_0 = arith.constant 0 : index
    %c0_1 = arith.constant 0 : index
    %0 = vector.load %arg1[%c0, %c0_0, %c0_1] : memref<2x8x128xf32, #tpu.memory_space<vmem>>, vector<2x8x128xf32>
    %1 = vector.shape_cast %0 : vector<2x8x128xf32> to vector<16x128xf32>
    %2 = tpu.iota {dimensions = array<i32: 0>} : vector<8x8xi32>
    %3 = tpu.iota {dimensions = array<i32: 1>} : vector<8x8xi32>
    %4 = arith.cmpi sle, %3, %2 : vector<8x8xi32>
    %cst = arith.constant 0.000000e+00 : f32
    %cst_2 = arith.constant -1.000000e+30 : f32
    %5 = vector.broadcast %cst : f32 to vector<8x8xf32>
    %6 = vector.broadcast %cst_2 : f32 to vector<8x8xf32>
    %7 = arith.select %4, %5, %6 : vector<8x8xi1>, vector<8x8xf32>
    %c0_3 = arith.constant 0 : index
    %c0_4 = arith.constant 0 : index
    %c0_5 = arith.constant 0 : index
    %8 = vector.load %arg2[%c0_3, %c0_4, %c0_5] : memref<2x1x128xf32, #tpu.memory_space<vmem>>, vector<1x1x128xf32>
    %9 = vector.shape_cast %8 : vector<1x1x128xf32> to vector<1x128xf32>
    %c0_6 = arith.constant 0 : index
    %c0_7 = arith.constant 0 : index
    %c0_8 = arith.constant 0 : index
    %10 = vector.load %arg3[%c0_6, %c0_7, %c0_8] : memref<2x1x128xf32, #tpu.memory_space<vmem>>, vector<1x1x128xf32>
    %11 = vector.shape_cast %10 : vector<1x1x128xf32> to vector<1x128xf32>
    %cst_9 = arith.constant dense<0.000000e+00> : vector<16xf32>
    %12 = vector.multi_reduction <add>, %1, %cst_9 [1] : vector<16x128xf32> to vector<16xf32>
    %13 = vector.shape_cast %12 : vector<16xf32> to vector<16x1xf32>
    %cst_10 = arith.constant 1.280000e+02 : f32
    %14 = vector.broadcast %cst_10 : f32 to vector<16x1xf32>
    %15 = arith.divf %13, %14 : vector<16x1xf32>
    %16 = vector.broadcast %15 : vector<16x1xf32> to vector<16x128xf32>
    %17 = arith.subf %1, %16 : vector<16x128xf32>
    %18 = arith.mulf %17, %17 : vector<16x128xf32>
    %cst_11 = arith.constant dense<0.000000e+00> : vector<16xf32>
    %19 = vector.multi_reduction <add>, %18, %cst_11 [1] : vector<16x128xf32> to vector<16xf32>
    %20 = vector.shape_cast %19 : vector<16xf32> to vector<16x1xf32>
    %cst_12 = arith.constant 1.280000e+02 : f32
    %21 = vector.broadcast %cst_12 : f32 to vector<16x1xf32>
    %22 = arith.divf %20, %21 : vector<16x1xf32>
    %cst_13 = arith.constant 9.99999997E-7 : f32
    %23 = vector.broadcast %cst_13 : f32 to vector<16x1xf32>
    %24 = arith.addf %22, %23 : vector<16x1xf32>
    %25 = math.rsqrt %24 : vector<16x1xf32>
    %26 = vector.broadcast %25 : vector<16x1xf32> to vector<16x128xf32>
    %27 = arith.mulf %17, %26 : vector<16x128xf32>
    %28 = vector.broadcast %9 : vector<1x128xf32> to vector<16x128xf32>
    %29 = arith.mulf %27, %28 : vector<16x128xf32>
    %30 = vector.broadcast %11 : vector<1x128xf32> to vector<16x128xf32>
    %31 = arith.addf %29, %30 : vector<16x128xf32>
    %32 = arith.truncf %31 : vector<16x128xf32> to vector<16x128xbf16>
    %cst_14 = arith.constant 0.000000e+00 : f32
    %33 = vector.broadcast %cst_14 : f32 to vector<16x128xf32>
    %c0_15 = arith.constant 0 : index
    %c0_16 = arith.constant 0 : index
    %c0_17 = arith.constant 0 : index
    %c0_18 = arith.constant 0 : index
    %34 = vector.load %arg4[%c0_15, %c0_16, %c0_17, %c0_18] : memref<2x2x128x64xbf16, #tpu.memory_space<vmem>>, vector<1x1x128x64xbf16>
    %35 = vector.shape_cast %34 : vector<1x1x128x64xbf16> to vector<128x64xbf16>
    %c0_19 = arith.constant 0 : index
    %c0_20 = arith.constant 0 : index
    %c0_21 = arith.constant 0 : index
    %c0_22 = arith.constant 0 : index
    %36 = vector.load %arg5[%c0_19, %c0_20, %c0_21, %c0_22] : memref<2x2x128x64xbf16, #tpu.memory_space<vmem>>, vector<1x1x128x64xbf16>
    %37 = vector.shape_cast %36 : vector<1x1x128x64xbf16> to vector<128x64xbf16>
    %c0_23 = arith.constant 0 : index
    %c0_24 = arith.constant 0 : index
    %c0_25 = arith.constant 0 : index
    %c0_26 = arith.constant 0 : index
    %38 = vector.load %arg6[%c0_23, %c0_24, %c0_25, %c0_26] : memref<2x2x128x64xbf16, #tpu.memory_space<vmem>>, vector<1x1x128x64xbf16>
    %39 = vector.shape_cast %38 : vector<1x1x128x64xbf16> to vector<128x64xbf16>
    %cst_27 = arith.constant dense<0.000000e+00> : vector<16x64xf32>
    %40 = tpu.matmul %32, %35, %cst_27 {dimension_numbers = #tpu.dot_dimension_numbers<[1], [0], [0], [1], [0, 0, 1, 1], [], []>} : vector<16x128xbf16>, vector<128x64xbf16>, vector<16x64xf32> -> vector<16x64xf32>
    %cst_28 = arith.constant dense<0.000000e+00> : vector<16x64xf32>
    %41 = tpu.matmul %32, %37, %cst_28 {dimension_numbers = #tpu.dot_dimension_numbers<[1], [0], [0], [1], [0, 0, 1, 1], [], []>} : vector<16x128xbf16>, vector<128x64xbf16>, vector<16x64xf32> -> vector<16x64xf32>
    %cst_29 = arith.constant dense<0.000000e+00> : vector<16x64xf32>
    %42 = tpu.matmul %32, %39, %cst_29 {dimension_numbers = #tpu.dot_dimension_numbers<[1], [0], [0], [1], [0, 0, 1, 1], [], []>} : vector<16x128xbf16>, vector<128x64xbf16>, vector<16x64xf32> -> vector<16x64xf32>
    %43 = vector.shape_cast %40 : vector<16x64xf32> to vector<2x8x64xf32>
    %44 = arith.truncf %43 : vector<2x8x64xf32> to vector<2x8x64xbf16>
    %45 = vector.shape_cast %41 : vector<16x64xf32> to vector<2x8x64xf32>
    %46 = arith.truncf %45 : vector<2x8x64xf32> to vector<2x8x64xbf16>
    %47 = vector.shape_cast %42 : vector<16x64xf32> to vector<2x8x64xf32>
    %48 = arith.truncf %47 : vector<2x8x64xf32> to vector<2x8x64xbf16>
    "tpu.trace_start"() <{level = 10 : i32, message = "bld,bmd->blm"}> : () -> ()
    %cst_30 = arith.constant dense<0.000000e+00> : vector<2x8x8xf32>
    %49 = tpu.matmul %44, %46, %cst_30 {dimension_numbers = #tpu.dot_dimension_numbers<[2], [2], [1], [1], [0, 0, 0, 1, 1, 1], [0], [0]>} : vector<2x8x64xbf16>, vector<2x8x64xbf16>, vector<2x8x8xf32> -> vector<2x8x8xf32>
    "tpu.trace_stop"() : () -> ()
    %cst_31 = arith.constant 1.250000e-01 : f32
    %50 = vector.broadcast %cst_31 : f32 to vector<2x8x8xf32>
    %51 = arith.mulf %49, %50 : vector<2x8x8xf32>
    %52 = vector.shape_cast %7 : vector<8x8xf32> to vector<1x8x8xf32>
    %53 = vector.broadcast %52 : vector<1x8x8xf32> to vector<2x8x8xf32>
    %54 = arith.addf %51, %53 : vector<2x8x8xf32>
    %cst_32 = arith.constant dense<0xFF800000> : vector<2x8xf32>
    %55 = vector.multi_reduction <maximumf>, %54, %cst_32 [2] : vector<2x8x8xf32> to vector<2x8xf32>
    %56 = vector.shape_cast %55 : vector<2x8xf32> to vector<2x8x1xf32>
    %57 = vector.broadcast %56 : vector<2x8x1xf32> to vector<2x8x8xf32>
    %58 = arith.subf %54, %57 : vector<2x8x8xf32>
    %59 = math.exp %58 : vector<2x8x8xf32>
    %cst_33 = arith.constant dense<0.000000e+00> : vector<2x8xf32>
    %60 = vector.multi_reduction <add>, %59, %cst_33 [2] : vector<2x8x8xf32> to vector<2x8xf32>
    %61 = vector.shape_cast %60 : vector<2x8xf32> to vector<2x8x1xf32>
    %62 = tpu.reciprocal %61 {approx = true} : vector<2x8x1xf32> -> vector<2x8x1xf32>
    %63 = vector.broadcast %62 : vector<2x8x1xf32> to vector<2x8x8xf32>
    %64 = arith.mulf %59, %63 : vector<2x8x8xf32>
    %65 = arith.truncf %64 : vector<2x8x8xf32> to vector<2x8x8xbf16>
    "tpu.trace_start"() <{level = 10 : i32, message = "blm,bmd->bld"}> : () -> ()
    %cst_34 = arith.constant dense<0.000000e+00> : vector<2x8x64xf32>
    %66 = tpu.matmul %65, %48, %cst_34 {dimension_numbers = #tpu.dot_dimension_numbers<[2], [1], [1], [2], [0, 0, 0, 1, 1, 2], [0], [0]>} : vector<2x8x8xbf16>, vector<2x8x64xbf16>, vector<2x8x64xf32> -> vector<2x8x64xf32>
    "tpu.trace_stop"() : () -> ()
    %67 = vector.shape_cast %66 : vector<2x8x64xf32> to vector<16x64xf32>
    %68 = arith.truncf %67 : vector<16x64xf32> to vector<16x64xbf16>
    %c0_35 = arith.constant 0 : index
    %c0_36 = arith.constant 0 : index
    %c0_37 = arith.constant 0 : index
    %c0_38 = arith.constant 0 : index
    %69 = vector.load %arg7[%c0_35, %c0_36, %c0_37, %c0_38] : memref<2x2x64x128xbf16, #tpu.memory_space<vmem>>, vector<1x1x64x128xbf16>
    %70 = vector.shape_cast %69 : vector<1x1x64x128xbf16> to vector<64x128xbf16>
    %cst_39 = arith.constant dense<0.000000e+00> : vector<16x128xf32>
    %71 = tpu.matmul %68, %70, %cst_39 {dimension_numbers = #tpu.dot_dimension_numbers<[1], [0], [0], [1], [0, 0, 1, 1], [], []>} : vector<16x64xbf16>, vector<64x128xbf16>, vector<16x128xf32> -> vector<16x128xf32>
    %72 = arith.addf %33, %71 : vector<16x128xf32>
    %c0_40 = arith.constant 0 : index
    %c1 = arith.constant 1 : index
    %c0_41 = arith.constant 0 : index
    %c0_42 = arith.constant 0 : index
    %73 = vector.load %arg4[%c0_40, %c1, %c0_41, %c0_42] : memref<2x2x128x64xbf16, #tpu.memory_space<vmem>>, vector<1x1x128x64xbf16>
    %74 = vector.shape_cast %73 : vector<1x1x128x64xbf16> to vector<128x64xbf16>
    %c0_43 = arith.constant 0 : index
    %c1_44 = arith.constant 1 : index
    %c0_45 = arith.constant 0 : index
    %c0_46 = arith.constant 0 : index
    %75 = vector.load %arg5[%c0_43, %c1_44, %c0_45, %c0_46] : memref<2x2x128x64xbf16, #tpu.memory_space<vmem>>, vector<1x1x128x64xbf16>
    %76 = vector.shape_cast %75 : vector<1x1x128x64xbf16> to vector<128x64xbf16>
    %c0_47 = arith.constant 0 : index
    %c1_48 = arith.constant 1 : index
    %c0_49 = arith.constant 0 : index
    %c0_50 = arith.constant 0 : index
    %77 = vector.load %arg6[%c0_47, %c1_48, %c0_49, %c0_50] : memref<2x2x128x64xbf16, #tpu.memory_space<vmem>>, vector<1x1x128x64xbf16>
    %78 = vector.shape_cast %77 : vector<1x1x128x64xbf16> to vector<128x64xbf16>
    %cst_51 = arith.constant dense<0.000000e+00> : vector<16x64xf32>
    %79 = tpu.matmul %32, %74, %cst_51 {dimension_numbers = #tpu.dot_dimension_numbers<[1], [0], [0], [1], [0, 0, 1, 1], [], []>} : vector<16x128xbf16>, vector<128x64xbf16>, vector<16x64xf32> -> vector<16x64xf32>
    %cst_52 = arith.constant dense<0.000000e+00> : vector<16x64xf32>
    %80 = tpu.matmul %32, %76, %cst_52 {dimension_numbers = #tpu.dot_dimension_numbers<[1], [0], [0], [1], [0, 0, 1, 1], [], []>} : vector<16x128xbf16>, vector<128x64xbf16>, vector<16x64xf32> -> vector<16x64xf32>
    %cst_53 = arith.constant dense<0.000000e+00> : vector<16x64xf32>
    %81 = tpu.matmul %32, %78, %cst_53 {dimension_numbers = #tpu.dot_dimension_numbers<[1], [0], [0], [1], [0, 0, 1, 1], [], []>} : vector<16x128xbf16>, vector<128x64xbf16>, vector<16x64xf32> -> vector<16x64xf32>
    %82 = vector.shape_cast %79 : vector<16x64xf32> to vector<2x8x64xf32>
    %83 = arith.truncf %82 : vector<2x8x64xf32> to vector<2x8x64xbf16>
    %84 = vector.shape_cast %80 : vector<16x64xf32> to vector<2x8x64xf32>
    %85 = arith.truncf %84 : vector<2x8x64xf32> to vector<2x8x64xbf16>
    %86 = vector.shape_cast %81 : vector<16x64xf32> to vector<2x8x64xf32>
    %87 = arith.truncf %86 : vector<2x8x64xf32> to vector<2x8x64xbf16>
    "tpu.trace_start"() <{level = 10 : i32, message = "bld,bmd->blm"}> : () -> ()
    %cst_54 = arith.constant dense<0.000000e+00> : vector<2x8x8xf32>
    %88 = tpu.matmul %83, %85, %cst_54 {dimension_numbers = #tpu.dot_dimension_numbers<[2], [2], [1], [1], [0, 0, 0, 1, 1, 1], [0], [0]>} : vector<2x8x64xbf16>, vector<2x8x64xbf16>, vector<2x8x8xf32> -> vector<2x8x8xf32>
    "tpu.trace_stop"() : () -> ()
    %cst_55 = arith.constant 1.250000e-01 : f32
    %89 = vector.broadcast %cst_55 : f32 to vector<2x8x8xf32>
    %90 = arith.mulf %88, %89 : vector<2x8x8xf32>
    %91 = vector.shape_cast %7 : vector<8x8xf32> to vector<1x8x8xf32>
    %92 = vector.broadcast %91 : vector<1x8x8xf32> to vector<2x8x8xf32>
    %93 = arith.addf %90, %92 : vector<2x8x8xf32>
    %cst_56 = arith.constant dense<0xFF800000> : vector<2x8xf32>
    %94 = vector.multi_reduction <maximumf>, %93, %cst_56 [2] : vector<2x8x8xf32> to vector<2x8xf32>
    %95 = vector.shape_cast %94 : vector<2x8xf32> to vector<2x8x1xf32>
    %96 = vector.broadcast %95 : vector<2x8x1xf32> to vector<2x8x8xf32>
    %97 = arith.subf %93, %96 : vector<2x8x8xf32>
    %98 = math.exp %97 : vector<2x8x8xf32>
    %cst_57 = arith.constant dense<0.000000e+00> : vector<2x8xf32>
    %99 = vector.multi_reduction <add>, %98, %cst_57 [2] : vector<2x8x8xf32> to vector<2x8xf32>
    %100 = vector.shape_cast %99 : vector<2x8xf32> to vector<2x8x1xf32>
    %101 = tpu.reciprocal %100 {approx = true} : vector<2x8x1xf32> -> vector<2x8x1xf32>
    %102 = vector.broadcast %101 : vector<2x8x1xf32> to vector<2x8x8xf32>
    %103 = arith.mulf %98, %102 : vector<2x8x8xf32>
    %104 = arith.truncf %103 : vector<2x8x8xf32> to vector<2x8x8xbf16>
    "tpu.trace_start"() <{level = 10 : i32, message = "blm,bmd->bld"}> : () -> ()
    %cst_58 = arith.constant dense<0.000000e+00> : vector<2x8x64xf32>
    %105 = tpu.matmul %104, %87, %cst_58 {dimension_numbers = #tpu.dot_dimension_numbers<[2], [1], [1], [2], [0, 0, 0, 1, 1, 2], [0], [0]>} : vector<2x8x8xbf16>, vector<2x8x64xbf16>, vector<2x8x64xf32> -> vector<2x8x64xf32>
    "tpu.trace_stop"() : () -> ()
    %106 = vector.shape_cast %105 : vector<2x8x64xf32> to vector<16x64xf32>
    %107 = arith.truncf %106 : vector<16x64xf32> to vector<16x64xbf16>
    %c0_59 = arith.constant 0 : index
    %c1_60 = arith.constant 1 : index
    %c0_61 = arith.constant 0 : index
    %c0_62 = arith.constant 0 : index
    %108 = vector.load %arg7[%c0_59, %c1_60, %c0_61, %c0_62] : memref<2x2x64x128xbf16, #tpu.memory_space<vmem>>, vector<1x1x64x128xbf16>
    %109 = vector.shape_cast %108 : vector<1x1x64x128xbf16> to vector<64x128xbf16>
    %cst_63 = arith.constant dense<0.000000e+00> : vector<16x128xf32>
    %110 = tpu.matmul %107, %109, %cst_63 {dimension_numbers = #tpu.dot_dimension_numbers<[1], [0], [0], [1], [0, 0, 1, 1], [], []>} : vector<16x64xbf16>, vector<64x128xbf16>, vector<16x128xf32> -> vector<16x128xf32>
    %111 = arith.addf %72, %110 : vector<16x128xf32>
    %112 = arith.addf %1, %111 : vector<16x128xf32>
    %c0_64 = arith.constant 0 : index
    %c0_65 = arith.constant 0 : index
    %c0_66 = arith.constant 0 : index
    %113 = vector.load %arg8[%c0_64, %c0_65, %c0_66] : memref<2x1x128xf32, #tpu.memory_space<vmem>>, vector<1x1x128xf32>
    %114 = vector.shape_cast %113 : vector<1x1x128xf32> to vector<1x128xf32>
    %c0_67 = arith.constant 0 : index
    %c0_68 = arith.constant 0 : index
    %c0_69 = arith.constant 0 : index
    %115 = vector.load %arg9[%c0_67, %c0_68, %c0_69] : memref<2x1x128xf32, #tpu.memory_space<vmem>>, vector<1x1x128xf32>
    %116 = vector.shape_cast %115 : vector<1x1x128xf32> to vector<1x128xf32>
    %cst_70 = arith.constant dense<0.000000e+00> : vector<16xf32>
    %117 = vector.multi_reduction <add>, %112, %cst_70 [1] : vector<16x128xf32> to vector<16xf32>
    %118 = vector.shape_cast %117 : vector<16xf32> to vector<16x1xf32>
    %cst_71 = arith.constant 1.280000e+02 : f32
    %119 = vector.broadcast %cst_71 : f32 to vector<16x1xf32>
    %120 = arith.divf %118, %119 : vector<16x1xf32>
    %121 = vector.broadcast %120 : vector<16x1xf32> to vector<16x128xf32>
    %122 = arith.subf %112, %121 : vector<16x128xf32>
    %123 = arith.mulf %122, %122 : vector<16x128xf32>
    %cst_72 = arith.constant dense<0.000000e+00> : vector<16xf32>
    %124 = vector.multi_reduction <add>, %123, %cst_72 [1] : vector<16x128xf32> to vector<16xf32>
    %125 = vector.shape_cast %124 : vector<16xf32> to vector<16x1xf32>
    %cst_73 = arith.constant 1.280000e+02 : f32
    %126 = vector.broadcast %cst_73 : f32 to vector<16x1xf32>
    %127 = arith.divf %125, %126 : vector<16x1xf32>
    %cst_74 = arith.constant 9.99999997E-7 : f32
    %128 = vector.broadcast %cst_74 : f32 to vector<16x1xf32>
    %129 = arith.addf %127, %128 : vector<16x1xf32>
    %130 = math.rsqrt %129 : vector<16x1xf32>
    %131 = vector.broadcast %130 : vector<16x1xf32> to vector<16x128xf32>
    %132 = arith.mulf %122, %131 : vector<16x128xf32>
    %133 = vector.broadcast %114 : vector<1x128xf32> to vector<16x128xf32>
    %134 = arith.mulf %132, %133 : vector<16x128xf32>
    %135 = vector.broadcast %116 : vector<1x128xf32> to vector<16x128xf32>
    %136 = arith.addf %134, %135 : vector<16x128xf32>
    %137 = arith.truncf %136 : vector<16x128xf32> to vector<16x128xbf16>
    %c0_75 = arith.constant 0 : index
    %c0_76 = arith.constant 0 : index
    %c0_77 = arith.constant 0 : index
    %138 = vector.load %arg10[%c0_75, %c0_76, %c0_77] : memref<2x128x512xbf16, #tpu.memory_space<vmem>>, vector<1x128x512xbf16>
    %139 = vector.shape_cast %138 : vector<1x128x512xbf16> to vector<128x512xbf16>
    %cst_78 = arith.constant dense<0.000000e+00> : vector<16x512xf32>
    %140 = tpu.matmul %137, %139, %cst_78 {dimension_numbers = #tpu.dot_dimension_numbers<[1], [0], [0], [1], [0, 0, 1, 1], [], []>} : vector<16x128xbf16>, vector<128x512xbf16>, vector<16x512xf32> -> vector<16x512xf32>
    %141 = arith.mulf %140, %140 : vector<16x512xf32>
    %142 = arith.mulf %140, %141 : vector<16x512xf32>
    %cst_79 = arith.constant 4.471500e-02 : f32
    %143 = vector.broadcast %cst_79 : f32 to vector<16x512xf32>
    %144 = arith.mulf %143, %142 : vector<16x512xf32>
    %145 = arith.addf %140, %144 : vector<16x512xf32>
    %cst_80 = arith.constant 0.797884583 : f32
    %146 = vector.broadcast %cst_80 : f32 to vector<16x512xf32>
    %147 = arith.mulf %146, %145 : vector<16x512xf32>
    %148 = math.tanh %147 : vector<16x512xf32>
    %cst_81 = arith.constant 1.000000e+00 : f32
    %149 = vector.broadcast %cst_81 : f32 to vector<16x512xf32>
    %150 = arith.addf %149, %148 : vector<16x512xf32>
    %cst_82 = arith.constant 5.000000e-01 : f32
    %151 = vector.broadcast %cst_82 : f32 to vector<16x512xf32>
    %152 = arith.mulf %151, %150 : vector<16x512xf32>
    %153 = arith.mulf %140, %152 : vector<16x512xf32>
    %154 = arith.truncf %153 : vector<16x512xf32> to vector<16x512xbf16>
    %c0_83 = arith.constant 0 : index
    %c0_84 = arith.constant 0 : index
    %c0_85 = arith.constant 0 : index
    %155 = vector.load %arg11[%c0_83, %c0_84, %c0_85] : memref<2x512x128xbf16, #tpu.memory_space<vmem>>, vector<1x512x128xbf16>
    %156 = vector.shape_cast %155 : vector<1x512x128xbf16> to vector<512x128xbf16>
    %cst_86 = arith.constant dense<0.000000e+00> : vector<16x128xf32>
    %157 = tpu.matmul %154, %156, %cst_86 {dimension_numbers = #tpu.dot_dimension_numbers<[1], [0], [0], [1], [0, 0, 1, 1], [], []>} : vector<16x512xbf16>, vector<512x128xbf16>, vector<16x128xf32> -> vector<16x128xf32>
    %158 = arith.addf %112, %157 : vector<16x128xf32>
    %c1_87 = arith.constant 1 : index
    %c0_88 = arith.constant 0 : index
    %c0_89 = arith.constant 0 : index
    %159 = vector.load %arg2[%c1_87, %c0_88, %c0_89] : memref<2x1x128xf32, #tpu.memory_space<vmem>>, vector<1x1x128xf32>
    %160 = vector.shape_cast %159 : vector<1x1x128xf32> to vector<1x128xf32>
    %c1_90 = arith.constant 1 : index
    %c0_91 = arith.constant 0 : index
    %c0_92 = arith.constant 0 : index
    %161 = vector.load %arg3[%c1_90, %c0_91, %c0_92] : memref<2x1x128xf32, #tpu.memory_space<vmem>>, vector<1x1x128xf32>
    %162 = vector.shape_cast %161 : vector<1x1x128xf32> to vector<1x128xf32>
    %cst_93 = arith.constant dense<0.000000e+00> : vector<16xf32>
    %163 = vector.multi_reduction <add>, %158, %cst_93 [1] : vector<16x128xf32> to vector<16xf32>
    %164 = vector.shape_cast %163 : vector<16xf32> to vector<16x1xf32>
    %cst_94 = arith.constant 1.280000e+02 : f32
    %165 = vector.broadcast %cst_94 : f32 to vector<16x1xf32>
    %166 = arith.divf %164, %165 : vector<16x1xf32>
    %167 = vector.broadcast %166 : vector<16x1xf32> to vector<16x128xf32>
    %168 = arith.subf %158, %167 : vector<16x128xf32>
    %169 = arith.mulf %168, %168 : vector<16x128xf32>
    %cst_95 = arith.constant dense<0.000000e+00> : vector<16xf32>
    %170 = vector.multi_reduction <add>, %169, %cst_95 [1] : vector<16x128xf32> to vector<16xf32>
    %171 = vector.shape_cast %170 : vector<16xf32> to vector<16x1xf32>
    %cst_96 = arith.constant 1.280000e+02 : f32
    %172 = vector.broadcast %cst_96 : f32 to vector<16x1xf32>
    %173 = arith.divf %171, %172 : vector<16x1xf32>
    %cst_97 = arith.constant 9.99999997E-7 : f32
    %174 = vector.broadcast %cst_97 : f32 to vector<16x1xf32>
    %175 = arith.addf %173, %174 : vector<16x1xf32>
    %176 = math.rsqrt %175 : vector<16x1xf32>
    %177 = vector.broadcast %176 : vector<16x1xf32> to vector<16x128xf32>
    %178 = arith.mulf %168, %177 : vector<16x128xf32>
    %179 = vector.broadcast %160 : vector<1x128xf32> to vector<16x128xf32>
    %180 = arith.mulf %178, %179 : vector<16x128xf32>
    %181 = vector.broadcast %162 : vector<1x128xf32> to vector<16x128xf32>
    %182 = arith.addf %180, %181 : vector<16x128xf32>
    %183 = arith.truncf %182 : vector<16x128xf32> to vector<16x128xbf16>
    %cst_98 = arith.constant 0.000000e+00 : f32
    %184 = vector.broadcast %cst_98 : f32 to vector<16x128xf32>
    %c1_99 = arith.constant 1 : index
    %c0_100 = arith.constant 0 : index
    %c0_101 = arith.constant 0 : index
    %c0_102 = arith.constant 0 : index
    %185 = vector.load %arg4[%c1_99, %c0_100, %c0_101, %c0_102] : memref<2x2x128x64xbf16, #tpu.memory_space<vmem>>, vector<1x1x128x64xbf16>
    %186 = vector.shape_cast %185 : vector<1x1x128x64xbf16> to vector<128x64xbf16>
    %c1_103 = arith.constant 1 : index
    %c0_104 = arith.constant 0 : index
    %c0_105 = arith.constant 0 : index
    %c0_106 = arith.constant 0 : index
    %187 = vector.load %arg5[%c1_103, %c0_104, %c0_105, %c0_106] : memref<2x2x128x64xbf16, #tpu.memory_space<vmem>>, vector<1x1x128x64xbf16>
    %188 = vector.shape_cast %187 : vector<1x1x128x64xbf16> to vector<128x64xbf16>
    %c1_107 = arith.constant 1 : index
    %c0_108 = arith.constant 0 : index
    %c0_109 = arith.constant 0 : index
    %c0_110 = arith.constant 0 : index
    %189 = vector.load %arg6[%c1_107, %c0_108, %c0_109, %c0_110] : memref<2x2x128x64xbf16, #tpu.memory_space<vmem>>, vector<1x1x128x64xbf16>
    %190 = vector.shape_cast %189 : vector<1x1x128x64xbf16> to vector<128x64xbf16>
    %cst_111 = arith.constant dense<0.000000e+00> : vector<16x64xf32>
    %191 = tpu.matmul %183, %186, %cst_111 {dimension_numbers = #tpu.dot_dimension_numbers<[1], [0], [0], [1], [0, 0, 1, 1], [], []>} : vector<16x128xbf16>, vector<128x64xbf16>, vector<16x64xf32> -> vector<16x64xf32>
    %cst_112 = arith.constant dense<0.000000e+00> : vector<16x64xf32>
    %192 = tpu.matmul %183, %188, %cst_112 {dimension_numbers = #tpu.dot_dimension_numbers<[1], [0], [0], [1], [0, 0, 1, 1], [], []>} : vector<16x128xbf16>, vector<128x64xbf16>, vector<16x64xf32> -> vector<16x64xf32>
    %cst_113 = arith.constant dense<0.000000e+00> : vector<16x64xf32>
    %193 = tpu.matmul %183, %190, %cst_113 {dimension_numbers = #tpu.dot_dimension_numbers<[1], [0], [0], [1], [0, 0, 1, 1], [], []>} : vector<16x128xbf16>, vector<128x64xbf16>, vector<16x64xf32> -> vector<16x64xf32>
    %194 = vector.shape_cast %191 : vector<16x64xf32> to vector<2x8x64xf32>
    %195 = arith.truncf %194 : vector<2x8x64xf32> to vector<2x8x64xbf16>
    %196 = vector.shape_cast %192 : vector<16x64xf32> to vector<2x8x64xf32>
    %197 = arith.truncf %196 : vector<2x8x64xf32> to vector<2x8x64xbf16>
    %198 = vector.shape_cast %193 : vector<16x64xf32> to vector<2x8x64xf32>
    %199 = arith.truncf %198 : vector<2x8x64xf32> to vector<2x8x64xbf16>
    "tpu.trace_start"() <{level = 10 : i32, message = "bld,bmd->blm"}> : () -> ()
    %cst_114 = arith.constant dense<0.000000e+00> : vector<2x8x8xf32>
    %200 = tpu.matmul %195, %197, %cst_114 {dimension_numbers = #tpu.dot_dimension_numbers<[2], [2], [1], [1], [0, 0, 0, 1, 1, 1], [0], [0]>} : vector<2x8x64xbf16>, vector<2x8x64xbf16>, vector<2x8x8xf32> -> vector<2x8x8xf32>
    "tpu.trace_stop"() : () -> ()
    %cst_115 = arith.constant 1.250000e-01 : f32
    %201 = vector.broadcast %cst_115 : f32 to vector<2x8x8xf32>
    %202 = arith.mulf %200, %201 : vector<2x8x8xf32>
    %203 = vector.shape_cast %7 : vector<8x8xf32> to vector<1x8x8xf32>
    %204 = vector.broadcast %203 : vector<1x8x8xf32> to vector<2x8x8xf32>
    %205 = arith.addf %202, %204 : vector<2x8x8xf32>
    %cst_116 = arith.constant dense<0xFF800000> : vector<2x8xf32>
    %206 = vector.multi_reduction <maximumf>, %205, %cst_116 [2] : vector<2x8x8xf32> to vector<2x8xf32>
    %207 = vector.shape_cast %206 : vector<2x8xf32> to vector<2x8x1xf32>
    %208 = vector.broadcast %207 : vector<2x8x1xf32> to vector<2x8x8xf32>
    %209 = arith.subf %205, %208 : vector<2x8x8xf32>
    %210 = math.exp %209 : vector<2x8x8xf32>
    %cst_117 = arith.constant dense<0.000000e+00> : vector<2x8xf32>
    %211 = vector.multi_reduction <add>, %210, %cst_117 [2] : vector<2x8x8xf32> to vector<2x8xf32>
    %212 = vector.shape_cast %211 : vector<2x8xf32> to vector<2x8x1xf32>
    %213 = tpu.reciprocal %212 {approx = true} : vector<2x8x1xf32> -> vector<2x8x1xf32>
    %214 = vector.broadcast %213 : vector<2x8x1xf32> to vector<2x8x8xf32>
    %215 = arith.mulf %210, %214 : vector<2x8x8xf32>
    %216 = arith.truncf %215 : vector<2x8x8xf32> to vector<2x8x8xbf16>
    "tpu.trace_start"() <{level = 10 : i32, message = "blm,bmd->bld"}> : () -> ()
    %cst_118 = arith.constant dense<0.000000e+00> : vector<2x8x64xf32>
    %217 = tpu.matmul %216, %199, %cst_118 {dimension_numbers = #tpu.dot_dimension_numbers<[2], [1], [1], [2], [0, 0, 0, 1, 1, 2], [0], [0]>} : vector<2x8x8xbf16>, vector<2x8x64xbf16>, vector<2x8x64xf32> -> vector<2x8x64xf32>
    "tpu.trace_stop"() : () -> ()
    %218 = vector.shape_cast %217 : vector<2x8x64xf32> to vector<16x64xf32>
    %219 = arith.truncf %218 : vector<16x64xf32> to vector<16x64xbf16>
    %c1_119 = arith.constant 1 : index
    %c0_120 = arith.constant 0 : index
    %c0_121 = arith.constant 0 : index
    %c0_122 = arith.constant 0 : index
    %220 = vector.load %arg7[%c1_119, %c0_120, %c0_121, %c0_122] : memref<2x2x64x128xbf16, #tpu.memory_space<vmem>>, vector<1x1x64x128xbf16>
    %221 = vector.shape_cast %220 : vector<1x1x64x128xbf16> to vector<64x128xbf16>
    %cst_123 = arith.constant dense<0.000000e+00> : vector<16x128xf32>
    %222 = tpu.matmul %219, %221, %cst_123 {dimension_numbers = #tpu.dot_dimension_numbers<[1], [0], [0], [1], [0, 0, 1, 1], [], []>} : vector<16x64xbf16>, vector<64x128xbf16>, vector<16x128xf32> -> vector<16x128xf32>
    %223 = arith.addf %184, %222 : vector<16x128xf32>
    %c1_124 = arith.constant 1 : index
    %c1_125 = arith.constant 1 : index
    %c0_126 = arith.constant 0 : index
    %c0_127 = arith.constant 0 : index
    %224 = vector.load %arg4[%c1_124, %c1_125, %c0_126, %c0_127] : memref<2x2x128x64xbf16, #tpu.memory_space<vmem>>, vector<1x1x128x64xbf16>
    %225 = vector.shape_cast %224 : vector<1x1x128x64xbf16> to vector<128x64xbf16>
    %c1_128 = arith.constant 1 : index
    %c1_129 = arith.constant 1 : index
    %c0_130 = arith.constant 0 : index
    %c0_131 = arith.constant 0 : index
    %226 = vector.load %arg5[%c1_128, %c1_129, %c0_130, %c0_131] : memref<2x2x128x64xbf16, #tpu.memory_space<vmem>>, vector<1x1x128x64xbf16>
    %227 = vector.shape_cast %226 : vector<1x1x128x64xbf16> to vector<128x64xbf16>
    %c1_132 = arith.constant 1 : index
    %c1_133 = arith.constant 1 : index
    %c0_134 = arith.constant 0 : index
    %c0_135 = arith.constant 0 : index
    %228 = vector.load %arg6[%c1_132, %c1_133, %c0_134, %c0_135] : memref<2x2x128x64xbf16, #tpu.memory_space<vmem>>, vector<1x1x128x64xbf16>
    %229 = vector.shape_cast %228 : vector<1x1x128x64xbf16> to vector<128x64xbf16>
    %cst_136 = arith.constant dense<0.000000e+00> : vector<16x64xf32>
    %230 = tpu.matmul %183, %225, %cst_136 {dimension_numbers = #tpu.dot_dimension_numbers<[1], [0], [0], [1], [0, 0, 1, 1], [], []>} : vector<16x128xbf16>, vector<128x64xbf16>, vector<16x64xf32> -> vector<16x64xf32>
    %cst_137 = arith.constant dense<0.000000e+00> : vector<16x64xf32>
    %231 = tpu.matmul %183, %227, %cst_137 {dimension_numbers = #tpu.dot_dimension_numbers<[1], [0], [0], [1], [0, 0, 1, 1], [], []>} : vector<16x128xbf16>, vector<128x64xbf16>, vector<16x64xf32> -> vector<16x64xf32>
    %cst_138 = arith.constant dense<0.000000e+00> : vector<16x64xf32>
    %232 = tpu.matmul %183, %229, %cst_138 {dimension_numbers = #tpu.dot_dimension_numbers<[1], [0], [0], [1], [0, 0, 1, 1], [], []>} : vector<16x128xbf16>, vector<128x64xbf16>, vector<16x64xf32> -> vector<16x64xf32>
    %233 = vector.shape_cast %230 : vector<16x64xf32> to vector<2x8x64xf32>
    %234 = arith.truncf %233 : vector<2x8x64xf32> to vector<2x8x64xbf16>
    %235 = vector.shape_cast %231 : vector<16x64xf32> to vector<2x8x64xf32>
    %236 = arith.truncf %235 : vector<2x8x64xf32> to vector<2x8x64xbf16>
    %237 = vector.shape_cast %232 : vector<16x64xf32> to vector<2x8x64xf32>
    %238 = arith.truncf %237 : vector<2x8x64xf32> to vector<2x8x64xbf16>
    "tpu.trace_start"() <{level = 10 : i32, message = "bld,bmd->blm"}> : () -> ()
    %cst_139 = arith.constant dense<0.000000e+00> : vector<2x8x8xf32>
    %239 = tpu.matmul %234, %236, %cst_139 {dimension_numbers = #tpu.dot_dimension_numbers<[2], [2], [1], [1], [0, 0, 0, 1, 1, 1], [0], [0]>} : vector<2x8x64xbf16>, vector<2x8x64xbf16>, vector<2x8x8xf32> -> vector<2x8x8xf32>
    "tpu.trace_stop"() : () -> ()
    %cst_140 = arith.constant 1.250000e-01 : f32
    %240 = vector.broadcast %cst_140 : f32 to vector<2x8x8xf32>
    %241 = arith.mulf %239, %240 : vector<2x8x8xf32>
    %242 = vector.shape_cast %7 : vector<8x8xf32> to vector<1x8x8xf32>
    %243 = vector.broadcast %242 : vector<1x8x8xf32> to vector<2x8x8xf32>
    %244 = arith.addf %241, %243 : vector<2x8x8xf32>
    %cst_141 = arith.constant dense<0xFF800000> : vector<2x8xf32>
    %245 = vector.multi_reduction <maximumf>, %244, %cst_141 [2] : vector<2x8x8xf32> to vector<2x8xf32>
    %246 = vector.shape_cast %245 : vector<2x8xf32> to vector<2x8x1xf32>
    %247 = vector.broadcast %246 : vector<2x8x1xf32> to vector<2x8x8xf32>
    %248 = arith.subf %244, %247 : vector<2x8x8xf32>
    %249 = math.exp %248 : vector<2x8x8xf32>
    %cst_142 = arith.constant dense<0.000000e+00> : vector<2x8xf32>
    %250 = vector.multi_reduction <add>, %249, %cst_142 [2] : vector<2x8x8xf32> to vector<2x8xf32>
    %251 = vector.shape_cast %250 : vector<2x8xf32> to vector<2x8x1xf32>
    %252 = tpu.reciprocal %251 {approx = true} : vector<2x8x1xf32> -> vector<2x8x1xf32>
    %253 = vector.broadcast %252 : vector<2x8x1xf32> to vector<2x8x8xf32>
    %254 = arith.mulf %249, %253 : vector<2x8x8xf32>
    %255 = arith.truncf %254 : vector<2x8x8xf32> to vector<2x8x8xbf16>
    "tpu.trace_start"() <{level = 10 : i32, message = "blm,bmd->bld"}> : () -> ()
    %cst_143 = arith.constant dense<0.000000e+00> : vector<2x8x64xf32>
    %256 = tpu.matmul %255, %238, %cst_143 {dimension_numbers = #tpu.dot_dimension_numbers<[2], [1], [1], [2], [0, 0, 0, 1, 1, 2], [0], [0]>} : vector<2x8x8xbf16>, vector<2x8x64xbf16>, vector<2x8x64xf32> -> vector<2x8x64xf32>
    "tpu.trace_stop"() : () -> ()
    %257 = vector.shape_cast %256 : vector<2x8x64xf32> to vector<16x64xf32>
    %258 = arith.truncf %257 : vector<16x64xf32> to vector<16x64xbf16>
    %c1_144 = arith.constant 1 : index
    %c1_145 = arith.constant 1 : index
    %c0_146 = arith.constant 0 : index
    %c0_147 = arith.constant 0 : index
    %259 = vector.load %arg7[%c1_144, %c1_145, %c0_146, %c0_147] : memref<2x2x64x128xbf16, #tpu.memory_space<vmem>>, vector<1x1x64x128xbf16>
    %260 = vector.shape_cast %259 : vector<1x1x64x128xbf16> to vector<64x128xbf16>
    %cst_148 = arith.constant dense<0.000000e+00> : vector<16x128xf32>
    %261 = tpu.matmul %258, %260, %cst_148 {dimension_numbers = #tpu.dot_dimension_numbers<[1], [0], [0], [1], [0, 0, 1, 1], [], []>} : vector<16x64xbf16>, vector<64x128xbf16>, vector<16x128xf32> -> vector<16x128xf32>
    %262 = arith.addf %223, %261 : vector<16x128xf32>
    %263 = arith.addf %158, %262 : vector<16x128xf32>
    %c1_149 = arith.constant 1 : index
    %c0_150 = arith.constant 0 : index
    %c0_151 = arith.constant 0 : index
    %264 = vector.load %arg8[%c1_149, %c0_150, %c0_151] : memref<2x1x128xf32, #tpu.memory_space<vmem>>, vector<1x1x128xf32>
    %265 = vector.shape_cast %264 : vector<1x1x128xf32> to vector<1x128xf32>
    %c1_152 = arith.constant 1 : index
    %c0_153 = arith.constant 0 : index
    %c0_154 = arith.constant 0 : index
    %266 = vector.load %arg9[%c1_152, %c0_153, %c0_154] : memref<2x1x128xf32, #tpu.memory_space<vmem>>, vector<1x1x128xf32>
    %267 = vector.shape_cast %266 : vector<1x1x128xf32> to vector<1x128xf32>
    %cst_155 = arith.constant dense<0.000000e+00> : vector<16xf32>
    %268 = vector.multi_reduction <add>, %263, %cst_155 [1] : vector<16x128xf32> to vector<16xf32>
    %269 = vector.shape_cast %268 : vector<16xf32> to vector<16x1xf32>
    %cst_156 = arith.constant 1.280000e+02 : f32
    %270 = vector.broadcast %cst_156 : f32 to vector<16x1xf32>
    %271 = arith.divf %269, %270 : vector<16x1xf32>
    %272 = vector.broadcast %271 : vector<16x1xf32> to vector<16x128xf32>
    %273 = arith.subf %263, %272 : vector<16x128xf32>
    %274 = arith.mulf %273, %273 : vector<16x128xf32>
    %cst_157 = arith.constant dense<0.000000e+00> : vector<16xf32>
    %275 = vector.multi_reduction <add>, %274, %cst_157 [1] : vector<16x128xf32> to vector<16xf32>
    %276 = vector.shape_cast %275 : vector<16xf32> to vector<16x1xf32>
    %cst_158 = arith.constant 1.280000e+02 : f32
    %277 = vector.broadcast %cst_158 : f32 to vector<16x1xf32>
    %278 = arith.divf %276, %277 : vector<16x1xf32>
    %cst_159 = arith.constant 9.99999997E-7 : f32
    %279 = vector.broadcast %cst_159 : f32 to vector<16x1xf32>
    %280 = arith.addf %278, %279 : vector<16x1xf32>
    %281 = math.rsqrt %280 : vector<16x1xf32>
    %282 = vector.broadcast %281 : vector<16x1xf32> to vector<16x128xf32>
    %283 = arith.mulf %273, %282 : vector<16x128xf32>
    %284 = vector.broadcast %265 : vector<1x128xf32> to vector<16x128xf32>
    %285 = arith.mulf %283, %284 : vector<16x128xf32>
    %286 = vector.broadcast %267 : vector<1x128xf32> to vector<16x128xf32>
    %287 = arith.addf %285, %286 : vector<16x128xf32>
    %288 = arith.truncf %287 : vector<16x128xf32> to vector<16x128xbf16>
    %c1_160 = arith.constant 1 : index
    %c0_161 = arith.constant 0 : index
    %c0_162 = arith.constant 0 : index
    %289 = vector.load %arg10[%c1_160, %c0_161, %c0_162] : memref<2x128x512xbf16, #tpu.memory_space<vmem>>, vector<1x128x512xbf16>
    %290 = vector.shape_cast %289 : vector<1x128x512xbf16> to vector<128x512xbf16>
    %cst_163 = arith.constant dense<0.000000e+00> : vector<16x512xf32>
    %291 = tpu.matmul %288, %290, %cst_163 {dimension_numbers = #tpu.dot_dimension_numbers<[1], [0], [0], [1], [0, 0, 1, 1], [], []>} : vector<16x128xbf16>, vector<128x512xbf16>, vector<16x512xf32> -> vector<16x512xf32>
    %292 = arith.mulf %291, %291 : vector<16x512xf32>
    %293 = arith.mulf %291, %292 : vector<16x512xf32>
    %cst_164 = arith.constant 4.471500e-02 : f32
    %294 = vector.broadcast %cst_164 : f32 to vector<16x512xf32>
    %295 = arith.mulf %294, %293 : vector<16x512xf32>
    %296 = arith.addf %291, %295 : vector<16x512xf32>
    %cst_165 = arith.constant 0.797884583 : f32
    %297 = vector.broadcast %cst_165 : f32 to vector<16x512xf32>
    %298 = arith.mulf %297, %296 : vector<16x512xf32>
    %299 = math.tanh %298 : vector<16x512xf32>
    %cst_166 = arith.constant 1.000000e+00 : f32
    %300 = vector.broadcast %cst_166 : f32 to vector<16x512xf32>
    %301 = arith.addf %300, %299 : vector<16x512xf32>
    %cst_167 = arith.constant 5.000000e-01 : f32
    %302 = vector.broadcast %cst_167 : f32 to vector<16x512xf32>
    %303 = arith.mulf %302, %301 : vector<16x512xf32>
    %304 = arith.mulf %291, %303 : vector<16x512xf32>
    %305 = arith.truncf %304 : vector<16x512xf32> to vector<16x512xbf16>
    %c1_168 = arith.constant 1 : index
    %c0_169 = arith.constant 0 : index
    %c0_170 = arith.constant 0 : index
    %306 = vector.load %arg11[%c1_168, %c0_169, %c0_170] : memref<2x512x128xbf16, #tpu.memory_space<vmem>>, vector<1x512x128xbf16>
    %307 = vector.shape_cast %306 : vector<1x512x128xbf16> to vector<512x128xbf16>
    %cst_171 = arith.constant dense<0.000000e+00> : vector<16x128xf32>
    %308 = tpu.matmul %305, %307, %cst_171 {dimension_numbers = #tpu.dot_dimension_numbers<[1], [0], [0], [1], [0, 0, 1, 1], [], []>} : vector<16x512xbf16>, vector<512x128xbf16>, vector<16x128xf32> -> vector<16x128xf32>
    %309 = arith.addf %263, %308 : vector<16x128xf32>
    %310 = vector.shape_cast %309 : vector<16x128xf32> to vector<2x8x128xf32>
    %c0_172 = arith.constant 0 : index
    %c0_173 = arith.constant 0 : index
    %c0_174 = arith.constant 0 : index
    %311 = vector.load %arg12[%c0_172, %c0_173, %c0_174] : memref<2x8x128xf32, #tpu.memory_space<vmem>>, vector<2x8x128xf32>
    tpu.vector_store %arg12[%c0_172, %c0_173, %c0_174], %310 {strides = array<i32>} : memref<2x8x128xf32, #tpu.memory_space<vmem>>, vector<2x8x128xf32>,
    return
  }
  func.func @transform_0(%arg0: i32) -> (i32, i32, i32) {
    %c0_i32 = arith.constant 0 : i32
    %c0_i32_0 = arith.constant 0 : i32
    %c0_i32_1 = arith.constant 0 : i32
    return %arg0, %c0_i32, %c0_i32_0 : i32, i32, i32
  }
  func.func @transform_1(%arg0: i32) -> (i32, i32, i32) {
    %c0_i32 = arith.constant 0 : i32
    %c0_i32_0 = arith.constant 0 : i32
    %c0_i32_1 = arith.constant 0 : i32
    %c0_i32_2 = arith.constant 0 : i32
    return %c0_i32, %c0_i32_0, %c0_i32_1 : i32, i32, i32
  }
  func.func @transform_2(%arg0: i32) -> (i32, i32, i32) {
    %c0_i32 = arith.constant 0 : i32
    %c0_i32_0 = arith.constant 0 : i32
    %c0_i32_1 = arith.constant 0 : i32
    %c0_i32_2 = arith.constant 0 : i32
    return %c0_i32, %c0_i32_0, %c0_i32_1 : i32, i32, i32
  }
  func.func @transform_3(%arg0: i32) -> (i32, i32, i32, i32) {
    %c0_i32 = arith.constant 0 : i32
    %c0_i32_0 = arith.constant 0 : i32
    %c0_i32_1 = arith.constant 0 : i32
    %c0_i32_2 = arith.constant 0 : i32
    %c0_i32_3 = arith.constant 0 : i32
    return %c0_i32, %c0_i32_0, %c0_i32_1, %c0_i32_2 : i32, i32, i32, i32
  }
  func.func @transform_4(%arg0: i32) -> (i32, i32, i32, i32) {
    %c0_i32 = arith.constant 0 : i32
    %c0_i32_0 = arith.constant 0 : i32
    %c0_i32_1 = arith.constant 0 : i32
    %c0_i32_2 = arith.constant 0 : i32
    %c0_i32_3 = arith.constant 0 : i32
    return %c0_i32, %c0_i32_0, %c0_i32_1, %c0_i32_2 : i32, i32, i32, i32
  }
  func.func @transform_5(%arg0: i32) -> (i32, i32, i32, i32) {
    %c0_i32 = arith.constant 0 : i32
    %c0_i32_0 = arith.constant 0 : i32
    %c0_i32_1 = arith.constant 0 : i32
    %c0_i32_2 = arith.constant 0 : i32
    %c0_i32_3 = arith.constant 0 : i32
    return %c0_i32, %c0_i32_0, %c0_i32_1, %c0_i32_2 : i32, i32, i32, i32
  }
  func.func @transform_6(%arg0: i32) -> (i32, i32, i32, i32) {
    %c0_i32 = arith.constant 0 : i32
    %c0_i32_0 = arith.constant 0 : i32
    %c0_i32_1 = arith.constant 0 : i32
    %c0_i32_2 = arith.constant 0 : i32
    %c0_i32_3 = arith.constant 0 : i32
    return %c0_i32, %c0_i32_0, %c0_i32_1, %c0_i32_2 : i32, i32, i32, i32
  }
  func.func @transform_7(%arg0: i32) -> (i32, i32, i32) {
    %c0_i32 = arith.constant 0 : i32
    %c0_i32_0 = arith.constant 0 : i32
    %c0_i32_1 = arith.constant 0 : i32
    %c0_i32_2 = arith.constant 0 : i32
    return %c0_i32, %c0_i32_0, %c0_i32_1 : i32, i32, i32
  }
  func.func @transform_8(%arg0: i32) -> (i32, i32, i32) {
    %c0_i32 = arith.constant 0 : i32
    %c0_i32_0 = arith.constant 0 : i32
    %c0_i32_1 = arith.constant 0 : i32
    %c0_i32_2 = arith.constant 0 : i32
    return %c0_i32, %c0_i32_0, %c0_i32_1 : i32, i32, i32
  }
  func.func @transform_9(%arg0: i32) -> (i32, i32, i32) {
    %c0_i32 = arith.constant 0 : i32
    %c0_i32_0 = arith.constant 0 : i32
    %c0_i32_1 = arith.constant 0 : i32
    %c0_i32_2 = arith.constant 0 : i32
    return %c0_i32, %c0_i32_0, %c0_i32_1 : i32, i32, i32
  }
  func.func @transform_10(%arg0: i32) -> (i32, i32, i32) {
    %c0_i32 = arith.constant 0 : i32
    %c0_i32_0 = arith.constant 0 : i32
    %c0_i32_1 = arith.constant 0 : i32
    %c0_i32_2 = arith.constant 0 : i32
    return %c0_i32, %c0_i32_0, %c0_i32_1 : i32, i32, i32
  }
  func.func @transform_11(%arg0: i32) -> (i32, i32, i32) {
    %c0_i32 = arith.constant 0 : i32
    %c0_i32_0 = arith.constant 0 : i32
    %c0_i32_1 = arith.constant 0 : i32
    return %arg0, %c0_i32, %c0_i32_0 : i32, i32, i32
  }
}

</mosaic_0001>

<bundles_post_ra>
// kernel: gpt_forward.3
= control target key start
LH: loop header
LB: loop body
LE: loop exit
PB: predicated region body
PF: predicated region fallthrough
CT: control target
= control target key end

     0   :  { %13 = vsyncpa [#allocation8], 0  ;;  %s1383_s0 = inlined_call_operand.vmem [shape: s32[16,1], index: 0, kind: input, shape index: {}]   ;;  %s1384_s1 = inlined_call_operand.vmem [shape: f32[16,1], index: 1, kind: input, shape index: {}]   ;;  %s1385_s2 = inlined_call_operand.vmem [shape: f32[16,128], index: 2, kind: input, shape index: {}]   ;;  %s1386_s3 = inlined_call_operand.vmem [shape: f32[1,128], index: 3, kind: input, shape index: {}]   ;;  %s1387_s4 = inlined_call_operand.vmem [shape: f32[1,128], index: 4, kind: input, shape index: {}]   ;;  %s1388_s5 = inlined_call_operand.vmem [shape: bf16[128,256], index: 5, kind: input, shape index: {}]   ;;  %s1389_s6 = inlined_call_operand.hbm [shape: f32[16,256], index: 6, kind: output, shape index: {0}]   ;;  %s1390_s7 = inlined_call_operand.vmem [shape: f32[16,1], index: 7, kind: output, shape index: {1}]  }
   0x1   :  { %15 = vsyncpa [#allocation8 + $0x1], 0  ;;  %s1182_s24 = smov 0   ;;  %s1184_s25 = smov 0  }
   0x2   :  { %s1186_s26 = smov 0   ;;  %s1188_s27 = smov 0  }
   0x3   :  { %s1190_s28 = smov 0   ;;  %s1192_s29 = smov 0  }
   0x4 LB: > { %s904_s30 = sadd.s32 4294967295, %s1131_s29   ;;  %s905_s8 = sadd.s32 4294967294, %s1131_s29   ;;  %s1131_s29 = sphi %s1192_s29, %s21_s29   ;;  %s1127_s28 = sphi %s1190_s28, %s1397_s28   ;;  %s1123_s27 = sphi %s1188_s27, %s1396_s27   ;;  %s1119_s26 = sphi %s1186_s26, %s1395_s26   ;;  %s1115_s25 = sphi %s1184_s25, %s1394_s25   ;;  %s1111_s24 = sphi %s1182_s24, %s1393_s24  }
   0x5   : > { %s30_s9 = sadd.s32 1, %s1127_s28  ;;  %s160_s10 = sadd.s32 1, %s1119_s26 }
   0x6   : > { %p31_p0 = scmp.ge.s32.totalorder %s30_s9, 2  ;;  %p167_p1 = scmp.ne.s32.totalorder %s1119_s26, %s1115_s25 }
   0x7   : > { %p168_p2 = scmp.eq.s32.totalorder %s1131_s29, 0  ;;  %p199_p3 = scmp.eq.s32.totalorder %s904_s30, 1 }
   0x8   : > { %s1399_s9 = smov (%p31_p0, %s30_s9), 0  ;;  %p204_p6 = scmp.ne.s32.totalorder %s1115_s25, %s1111_s24 }
   0x9   : > { %p169_p4 = por %p168_p2, %p167_p1  ;;  %p1221_p5 = por %p199_p3, %p167_p1 }
   0xa   : > { %s157_s12 = ssub.s32 %s1127_s28, %s1399_s9  ;;  %p205_p8 = scmp.eq.s32.totalorder %s905_s8, 1 }
   0xb   : > { %p158_p7 = scmp.eq.s32.totalorder %s157_s12, 0  ;;  %p910_p10 = scmp.ge.s32.totalorder %s1131_s29, 2 }
   0xc   : > { %p1232_p9 = por %p205_p8, %p204_p6 }
   0xd   : > { %s1230_s13 = scalar_select %p158_p7, %s1119_s26, %s160_s10  }
   0xe   : > { %280 = sbr.rel (%p910_p10) target bundleno = 35 (0x23), region = 36 }
  0x15   : > { %283 = sbr.rel (!%p169_p4) target bundleno = 35 (0x23), region = 40  ;;  %s285_s15 = sand.u32 (%p169_p4), 1, %s1119_s26  }
  0x16   : > { %s912_s16 = sshll.u32 (%p169_p4), %s1127_s28, 2  ;;  %s911_s17 = sshll.u32 (%p169_p4), %s285_s15, 6 }
  0x17   : > { %s1244_s20 = scalar_lea.vmem (%p169_p4), %s1388_s5, %s912_s16  ;;  %s287_s21 = scalar_lea.vmem (%p169_p4), [#allocation6], %s911_s17 }
  0x18   : > { %v305_v0 = vld [vmem:[%s1244_s20] sm:$0xf] (%p169_p4)  ;;  %v307_v1 = vld [vmem:[%s1244_s20 + $0x8] sm:$0xf] (%p169_p4)  ;;  %v309_v2 = vld [vmem:[%s1244_s20 + $0x10] sm:$0xf] (%p169_p4) }
  0x19   : > { %306 = vst [vmem:[%s287_s21] sm:$0xf] (%p169_p4), %v305_v0  ;;  %308 = vst [vmem:[%s287_s21 + $0x4] sm:$0xf] (%p169_p4), %v307_v1  ;;  %v311_v3 = vld [vmem:[%s1244_s20 + $0x18] sm:$0xf] (%p169_p4) }
  0x1a   : > { %v313_v4 = vld [vmem:[%s1244_s20 + $0x20] sm:$0xf] (%p169_p4)  ;;  %310 = vst [vmem:[%s287_s21 + $0x8] sm:$0xf] (%p169_p4), %v309_v2  ;;  %312 = vst [vmem:[%s287_s21 + $0xc] sm:$0xf] (%p169_p4), %v311_v3 }
  0x1b   : > { %314 = vst [vmem:[%s287_s21 + $0x10] sm:$0xf] (%p169_p4), %v313_v4  ;;  %v315_v5 = vld [vmem:[%s1244_s20 + $0x28] sm:$0xf] (%p169_p4)  ;;  %v317_v6 = vld [vmem:[%s1244_s20 + $0x30] sm:$0xf] (%p169_p4) }
  0x1c   : > { %v319_v7 = vld [vmem:[%s1244_s20 + $0x38] sm:$0xf]  ;;  %316 = vst [vmem:[%s287_s21 + $0x14] sm:$0xf] %v315_v5  ;;  %318 = vst [vmem:[%s287_s21 + $0x18] sm:$0xf] %v317_v6 }
  0x1d   : > { %320 = vst [vmem:[%s287_s21 + $0x1c] sm:$0xf] %v319_v7  ;;  %v321_v8 = vld [vmem:[%s1244_s20 + $0x40] sm:$0xf]  ;;  %v323_v9 = vld [vmem:[%s1244_s20 + $0x48] sm:$0xf] }
  0x1e   : > { %v325_v10 = vld [vmem:[%s1244_s20 + $0x50] sm:$0xf]  ;;  %322 = vst [vmem:[%s287_s21 + $0x20] sm:$0xf] %v321_v8  ;;  %324 = vst [vmem:[%s287_s21 + $0x24] sm:$0xf] %v323_v9 }
  0x1f   : > { %326 = vst [vmem:[%s287_s21 + $0x28] sm:$0xf] %v325_v10  ;;  %v327_v11 = vld [vmem:[%s1244_s20 + $0x58] sm:$0xf]  ;;  %v329_v12 = vld [vmem:[%s1244_s20 + $0x60] sm:$0xf] }
  0x20   : > { %v331_v13 = vld [vmem:[%s1244_s20 + $0x68] sm:$0xf]  ;;  %328 = vst [vmem:[%s287_s21 + $0x2c] sm:$0xf] %v327_v11  ;;  %330 = vst [vmem:[%s287_s21 + $0x30] sm:$0xf] %v329_v12 }
  0x21   : > { %332 = vst [vmem:[%s287_s21 + $0x34] sm:$0xf] %v331_v13  ;;  %v333_v14 = vld [vmem:[%s1244_s20 + $0x70] sm:$0xf]  ;;  %v335_v15 = vld [vmem:[%s1244_s20 + $0x78] sm:$0xf] }
  0x22   : > { %334 = vst [vmem:[%s287_s21 + $0x38] sm:$0xf] %v333_v14  ;;  %336 = vst [vmem:[%s287_s21 + $0x3c] sm:$0xf] %v335_v15 }
  0x23 PF: > { %p913_p11 = scmp.ge.s32.totalorder %s1131_s29, 1  ;;  %p390_p12 = scmp.lt.s32.totalorder %s1131_s29, 3 }
  0x25   : > { %p391_p13 = pnand %p913_p11, %p390_p12 }
  0x26   : > { %s1265_s22 = sand.u32 (!%p391_p13), 1, %s1115_s25   ;;  %p916_p0 = scmp.ne.s32.totalorder (!%p391_p13), %s1123_s27, 0 }
  0x27   : > { %394 = sbr.rel (%p391_p13) target bundleno = 1099 (0x44b), region = 81  ;;  %s914_s23 = sshll.u32 (!%p391_p13), %s1265_s22, 6 }
  0x28   : > { %s915_s30 = sshll.u32 (!%p391_p13), %s1265_s22, 4  ;;  %s1269_s8 = scalar_lea.vmem (!%p391_p13), [#allocation6], %s914_s23 }
  0x29   : > { %s1271_s10 = scalar_lea.vmem (!%p391_p13), [#allocation7], %s915_s30 }
  0x2e   : > { %477 = sbr.rel (%p916_p0) target bundleno = 365 (0x16d), region = 89  ;;  %v478_v16 = vld [vmem:[%s1385_s2] sm:$0xff] (!%p916_p0)  ;;  %v479_v17 = vld [vmem:[%s1385_s2 + $0x8] sm:$0xff] (!%p916_p0)  ;;  %vm523_vm0 = vcmask (!%p916_p0), 7168   ;;  %v1133_v26 = vmov (!%p916_p0), -1e+30  }
  0x2f   : > { %482 = vadd.xlane.f32.xlu0 (!%p916_p0), %v478_v16  ;;  %524 = vst.msk [vmem:[#allocation3] sm:$0xff] (!%p916_p0), %vm523_vm0, %v1133_v26  ;;  %525 = vst.msk [vmem:[#allocation3 + $0x8] sm:$0xff] (!%p916_p0), %vm523_vm0, %v1133_v26  ;;  %v1134_v27 = vmov (!%p916_p0), 0.0   ;;  %v917_v36 = vld [vmem:[%s1386_s3] ss:$0 sm:$0xff] (!%p916_p0) }
  0x30   : > { %526 = vst.msk [vmem:[#allocation4] sm:$0xff] (!%p916_p0), %vm523_vm0, %v1134_v27  ;;  %527 = vst.msk [vmem:[#allocation4 + $0x8] sm:$0xff] (!%p916_p0), %vm523_vm0, %v1134_v27  ;;  %v918_v40 = vld [vmem:[%s1387_s4] ss:$0 sm:$0xff] (!%p916_p0) }
  0x31   : > { %528 = vst.msk [vmem:[#allocation5] sm:$0xff] (!%p916_p0), %vm523_vm0, %v1134_v27  ;;  %529 = vst.msk [vmem:[#allocation5 + $0x8] sm:$0xff] (!%p916_p0), %vm523_vm0, %v1134_v27 }
  0x33   : > { %484 = vadd.xlane.f32.xlu0 (!%p916_p0), %v479_v17 }
  0xbc   : > { %v483_v18 = vpop.xlane.xlu0 %482 }
  0xbd   : > { %v487_v19 = vmul.f32 0.0078125, %v483_v18 }
  0xbf   : > { %v489_v20 = vsub.f32 %v478_v16, %v487_v19 }
  0xc0   : > { %v485_v21 = vpop.xlane.xlu0 %484 }
  0xc1   : > { %v488_v22 = vmul.f32 0.0078125, %v485_v21  ;;  %v491_v23 = vmul.f32 %v489_v20, %v489_v20 }
  0xc3   : > { %v490_v24 = vsub.f32 %v479_v17, %v488_v22  ;;  %493 = vadd.xlane.f32.xlu1 %v491_v23 }
  0xc5   : > { %v492_v25 = vmul.f32 %v490_v24, %v490_v24 }
  0xc7   : > { %495 = vadd.xlane.f32.xlu1 %v492_v25 }
 0x150   : > { %v494_v28 = vpop.xlane.xlu1 %493 }
 0x151   : > { %v497_v29 = vmul.f32 0.0078125, %v494_v28 }
 0x153   : > { %v499_v30 = vadd.f32 1e-06, %v497_v29 }
 0x154   : > { %v496_v31 = vpop.xlane.xlu1 %495 }
 0x155   : > { %1027 = vrsqrt.f32 %v499_v30  ;;  %v498_v32 = vmul.f32 0.0078125, %v496_v31 }
 0x157   : > { %v500_v33 = vadd.f32 1e-06, %v498_v32 }
 0x159   : > { %1029 = vrsqrt.f32 %v500_v33 }
 0x15f   : > { %v1028_v34 = vpop.eup %1027 }
 0x160   : > { %v503_v35 = vmul.f32 %v1028_v34, %v489_v20 }
 0x162   : > { %v511_v38 = vmul.f32 %v917_v36, %v503_v35 }
 0x163   : > { %v1030_v37 = vpop.eup %1029 }
 0x164   : > { %v504_v39 = vmul.f32 %v1030_v37, %v490_v24  ;;  %v519_v42 = vadd.f32 %v918_v40, %v511_v38 }
 0x166   : > { %v512_v41 = vmul.f32 %v917_v36, %v504_v39 }
 0x168   : > { %v520_v43 = vadd.f32 %v918_v40, %v512_v41 }
 0x16a   : > { %v521_v44 = vpack.c.bf16 %v520_v43, %v519_v42 }
 0x16c   : > { %522 = vst [vmem:[#allocation2] sm:$0xff] %v521_v44 }
 0x16d PF: > { %v1033_v45 = vld [vmem:[%s1269_s8] sm:$0xff]   ;;  %v1135_v46 = vmov 0.0   ;;  %v1034_v47 = vld [vmem:[%s1269_s8 + $0x8] sm:$0xff]   ;;  %vm1136_vm1 = vmmov 0   ;;  %v1035_v48 = vld [vmem:[%s1269_s8 + $0x10] sm:$0xff]   ;;  %v1137_v55 = vmov 0   ;;  %v683_v0 = vlaneseq }
 0x16e   : > { %944 = vmatprep.subr.bf16.mxu0 %v1135_v46  ;;  %960 = vmatprep.mubr.msk.bf16.mxu0 %vm1136_vm1, %v1135_v46  ;;  %v1036_v49 = vld [vmem:[%s1269_s8 + $0x18] sm:$0xff]   ;;  %v1037_v50 = vld [vmem:[%s1269_s8 + $0x20] sm:$0xff]   ;;  %v1038_v51 = vld [vmem:[%s1269_s8 + $0x28] sm:$0xff]   ;;  %vm678_vm2 = vcmask 7168   ;;  %p928_p1 = scmp.ne.s32.totalorder %s1123_s27, 1 }
 0x16f   : > { %945 = vmatpush3.bf16.msra.mxu0 %v1033_v45  ;;  %v1039_v52 = vld [vmem:[%s1269_s8 + $0x30] sm:$0xff]   ;;  %v1040_v53 = vld [vmem:[%s1269_s8 + $0x38] sm:$0xff]   ;;  %1032 = vset.pattern.permute.xlu0 %v1137_v55  ;;  %v688_v60 = vld [vmem:[%s1383_s0] sm:$0xff]  ;;  %s927_s8 = sshll.u32 %s1123_s27, 7  ;;  %v684_v5 = vand.u32 127, %v683_v0 }
 0x170   : > { %946 = vmatprep.subr.bf16.mxu0 %v1135_v46  ;;  %1031 = vset.pattern.permute.xlu1 %v1137_v55  ;;  %v638_v61 = vld [vmem:[#allocation3] sm:$0xff]  ;;  %v639_v1 = vld [vmem:[#allocation3 + $0x8] sm:$0xff]  ;;  %v686_v6 = vstv %s927_s8  ;;  %v646_v28 = vld [vmem:[#allocation4] sm:$0xff] }
 0x171   : > { %v689_v8 = vld [vmem:[%s1383_s0 + $0x8] sm:$0xff]  ;;  %v687_v9 = vadd.s32 %v686_v6, %v684_v5  ;;  %v647_v32 = vld [vmem:[#allocation4 + $0x8] sm:$0xff]  ;;  %v699_v37 = vld [vmem:[#allocation5 + $0x8] sm:$0xff] }
 0x172   : > { %v698_v22 = vld [vmem:[#allocation5] sm:$0xff] }
 0x173   : > { %947 = vmatpush3.bf16.msra.mxu0 %v1034_v47  ;;  %v530_v54 = vld [vmem:[#allocation2] sm:$0xff] }
 0x174   : > { %948 = vmatprep.subr.bf16.mxu0 %v1135_v46 }
 0x177   : > { %949 = vmatpush3.bf16.msra.mxu0 %v1035_v48 }
 0x178   : > { %950 = vmatprep.subr.bf16.mxu0 %v1135_v46 }
 0x17b   : > { %951 = vmatpush3.bf16.msra.mxu0 %v1036_v49 }
 0x17c   : > { %952 = vmatprep.subr.bf16.mxu0 %v1135_v46 }
 0x17f   : > { %953 = vmatpush3.bf16.msra.mxu0 %v1037_v50 }
 0x180   : > { %954 = vmatprep.subr.bf16.mxu0 %v1135_v46 }
 0x183   : > { %955 = vmatpush3.bf16.msra.mxu0 %v1038_v51  ;;  %v728_v51 = vld [vmem:[%s1384_s1] sm:$0xff] (!%p928_p1) }
 0x184   : > { %956 = vmatprep.subr.bf16.mxu0 %v1135_v46 }
 0x187   : > { %957 = vmatpush3.bf16.msra.mxu0 %v1039_v52 }
 0x188   : > { %958 = vmatprep.subr.bf16.mxu0 %v1135_v46 }
 0x18b   : > { %959 = vmatpush3.bf16.msra.mxu0 %v1040_v53 }
 0x18e   : > { %961 = vmatmul.mubr.bf16.vlgmr.msra.gmra.mrb[0].mxu0 %v530_v54  ;;  %v729_v54 = vld [vmem:[%s1384_s1 + $0x8] sm:$0xff] (!%p928_p1) }
 0x261   : > { %v629_v56 = vpop.f32.mrb[0].mxu0 }
 0x262   : > { %636 = vst [vmem:[%s1271_s10] sm:$0xff] %v629_v56  ;;  %640 = vmax.xlane.f32.xlu0 %v629_v56  ;;  %v962_v57 = vpop.f32.mrb[1].mxu0 }
 0x263   : > { %v632_v58 = vpop.f32.mrb[2].mxu0 }
 0x264   : > { %637 = vst [vmem:[%s1271_s10 + $0x8] sm:$0xff] %v632_v58  ;;  %v963_v59 = vpop.f32.mrb[3].mxu0 }
 0x266   : > { %642 = vmax.xlane.f32.xlu0 %v632_v58 }
 0x27c   : > { %691 = vperm.xlu0 %1032, %v688_v60  }
 0x2ef   : > { %v641_v62 = vpop.xlane.xlu0 %640 }
 0x2f0   : > { %v644_v63 = vmax.f32 %v638_v61, %v641_v62 }
 0x2f2   : > { %v648_v2 = vsub.f32 %v638_v61, %v644_v63  ;;  %681 = vst.msk [vmem:[#allocation3] sm:$0xff] %vm678_vm2, %v644_v63  ;;  %658 = vperm.xlu1 %1031, %v644_v63  }
 0x2f3   : > { %v643_v3 = vpop.xlane.xlu0 %642 }
 0x2f4   : > { %v645_v4 = vmax.f32 %v639_v1, %v643_v3  ;;  %v650_v25 = vmul.f32 1.442695, %v648_v2 }
 0x2f6   : > { %v649_v7 = vsub.f32 %v639_v1, %v645_v4  ;;  %682 = vst.msk [vmem:[#allocation3 + $0x8] sm:$0xff] %vm678_vm2, %v645_v4  ;;  %663 = vperm.xlu1 %1031, %v645_v4  }
 0x2f8   : > { %v652_v26 = vmul.f32 1.442695, %v649_v7 }
 0x2f9   : > { %v714_v43 = vld [vmem:[#allocation3] sm:$0xff] (!%p928_p1) }
 0x2fa   : > { %694 = vperm.xlu1 %1031, %v689_v8  }
 0x2fb   : > { %v692_v10 = vpop.permute.xlu0 %691 }
 0x2fc   : > { %vm696_vm3 = vcmp.eq.s32.totalorder %v687_v9, %v692_v10 }
 0x2fd   : > { %v700_v11 = vsel %vm696_vm3, %v629_v56, 0.0  ;;  %v715_v46 = vld [vmem:[#allocation3 + $0x8] sm:$0xff] (!%p928_p1) }
 0x2fe   : > { %702 = vadd.xlane.f32.xlu0 %v700_v11 }
 0x371   : > { %v659_v12 = vpop.permute.xlu1 %658 }
 0x372   : > { %v666_v13 = vsub.f32 %v629_v56, %v659_v12 }
 0x374   : > { %v668_v14 = vmul.f32 1.442695, %v666_v13 }
 0x375   : > { %v664_v15 = vpop.permute.xlu1 %663 }
 0x376   : > { %1041 = vpow2.f32 %v668_v14  ;;  %v667_v16 = vsub.f32 %v632_v58, %v664_v15 }
 0x378   : > { %v670_v17 = vmul.f32 1.442695, %v667_v16 }
 0x379   : > { %v695_v19 = vpop.permute.xlu1 %694 }
 0x37a   : > { %1043 = vpow2.f32 %v670_v17  ;;  %vm697_vm4 = vcmp.eq.s32.totalorder %v687_v9, %v695_v19 }
 0x37b   : > { %v701_v21 = vsel %vm697_vm4, %v632_v58, 0.0  ;;  %1045 = vpow2.f32 %v650_v25 }
 0x37c   : > { %1047 = vpow2.f32 %v652_v26 }
 0x380   : > { %v1042_v18 = vpop.eup %1041 }
 0x381   : > { %672 = vadd.xlane.f32.xlu1 %v1042_v18 }
 0x384   : > { %v1044_v20 = vpop.eup %1043 }
 0x385   : > { %674 = vadd.xlane.f32.xlu1 %v1044_v20  ;;  %v1046_v27 = vpop.eup %1045 }
 0x386   : > { %v654_v29 = vmul.f32 %v1046_v27, %v646_v28  ;;  %v1048_v30 = vpop.eup %1047 }
 0x387   : > { %v655_v34 = vmul.f32 %v1048_v30, %v647_v32 }
 0x389   : > { %704 = vadd.xlane.f32.xlu1 %v701_v21 }
 0x38b   : > { %v703_v23 = vpop.xlane.xlu0 %702 }
 0x38c   : > { %v706_v24 = vadd.f32 %v703_v23, %v698_v22 }
 0x38e   : > { %708 = vst.msk [vmem:[#allocation5] sm:$0xff] %vm678_vm2, %v706_v24 }
 0x395   : > { %v724_v47 = vld [vmem:[#allocation5] sm:$0xff] (!%p928_p1) }
 0x40e   : > { %v673_v31 = vpop.xlane.xlu1 %672 }
 0x40f   : > { %v676_v33 = vadd.f32 %v673_v31, %v654_v29 }
 0x411   : > { %679 = vst.msk [vmem:[#allocation4] sm:$0xff] %vm678_vm2, %v676_v33 }
 0x412   : > { %v675_v35 = vpop.xlane.xlu1 %674 }
 0x413   : > { %v677_v36 = vadd.f32 %v675_v35, %v655_v34  ;;  %713 = sbr.rel (%p928_p1) target bundleno = 1073 (0x431), region = 93 }
 0x415   : > { %680 = vst.msk [vmem:[#allocation4 + $0x8] sm:$0xff] %vm678_vm2, %v677_v36 }
 0x416   : > { %v705_v38 = vpop.xlane.xlu1 %704 }
 0x417   : > { %v707_v39 = vadd.f32 %v705_v38, %v699_v37 }
 0x418   : > { %v716_v40 = vld [vmem:[#allocation4] sm:$0xff] (!%p928_p1) }
 0x419   : > { %709 = vst.msk [vmem:[#allocation5 + $0x8] sm:$0xff] %vm678_vm2, %v707_v39  ;;  %1049 = vlog2.f32 (!%p928_p1), %v716_v40 }
 0x41c   : > { %v717_v41 = vld [vmem:[#allocation4 + $0x8] sm:$0xff] }
 0x41d   : > { %1051 = vlog2.f32 %v717_v41 }
 0x420   : > { %v725_v50 = vld [vmem:[#allocation5 + $0x8] sm:$0xff] }
 0x423   : > { %v1050_v42 = vpop.eup %1049 }
 0x424   : > { %v719_v45 = vmul.f32 0.6931472, %v1050_v42 }
 0x426   : > { %v722_v49 = vadd.f32 %v719_v45, %v714_v43 }
 0x427   : > { %v1052_v44 = vpop.eup %1051 }
 0x428   : > { %v721_v48 = vmul.f32 0.6931472, %v1052_v44  ;;  %v726_v53 = vsub.f32 %v722_v49, %v724_v47 }
 0x42a   : > { %v723_v52 = vadd.f32 %v721_v48, %v715_v46  ;;  %v730_v56 = vmul.f32 %v728_v51, %v726_v53 }
 0x42c   : > { %v727_v55 = vsub.f32 %v723_v52, %v725_v50  ;;  %732 = vst.msk [vmem:[%s1390_s7] sm:$0xff] %vm678_vm2, %v730_v56 }
 0x42e   : > { %v731_v57 = vmul.f32 %v729_v54, %v727_v55 }
 0x430   : > { %733 = vst.msk [vmem:[%s1390_s7 + $0x8] sm:$0xff] %vm678_vm2, %v731_v57 }
 0x431 PF: > { %s1331_s16 = scalar_lea.hbm %s1389_s6, %s927_s8  ;;  %s755_s17 = sshll.u32 %s1271_s10, 4  ;;  %s1334_s17 = int_to_ptr.vmem [resolvable:$true] %s755_s17 }
 0x432   : > { %s735_s18 = scalar_lea.sflag [#allocation8], %s1265_s22  ;;  %s1053_s19 = scalar_lea.vmem %s1334_s17, 256 }
 0x433   : > { %p1054_p2 = scmp.ne.s32.totalorder %s1334_s17, %s1053_s19  ;;  %s1138_s27 = smov [#allocation7]  }
 0x434   : > { %s1057_s20 = sshll.u32 %s1138_s27, 4  ;;  %s1058_s20 = int_to_ptr.vmem [resolvable:$false] %s1057_s20 }
 0x435   : > { %p1055_p3 = pnand %p1054_p2, %p1221_p5  ;;  %s1059_s21 = scalar_lea.vmem %s1058_s20, 512 }
 0x436   : > { %p1060_p6 = scmp.lt.s32.totalorder %s1334_s17, %s1058_s20  ;;  %p1061_p7 = scmp.lt.s32.totalorder %s1059_s21, %s1053_s19 }
 0x437   : > { %p1056_p4 = pneg %p1055_p3 }
 0x438   : > { %p1062_p8 = por %p1061_p7, %p1060_p6 }
 0x43a   : > { %p1063_p11 = pnand %p1062_p8, %p1056_p4 }
 0x43c   : > { %1066 = shalt.err (!%p1063_p11)
}
 0x43d   : > { %s1067_s10 = scalar_lea.hbm %s1331_s16, 256  ;;  %s1071_s30 = scalar_lea.hbm %s1389_s6, 512 }
 0x43e   : > { %p1068_p12 = scmp.ne.s32.totalorder %s1331_s16, %s1067_s10  ;;  %p1072_p1 = scmp.lt.u32.totalorder %s1331_s16, %s1389_s6 }
 0x43f   : > { %p1073_p2 = scmp.lt.u32.totalorder %s1071_s30, %s1067_s10  ;;  %p1075_p4 = scmp.lt.u32.totalorder %s1067_s10, %s1331_s16 }
 0x440   : > { %p1069_p13 = pnand %p1068_p12, %p1221_p5 }
 0x441   : > { %p1074_p3 = por %p1073_p2, %p1072_p1 }
 0x442   : > { %p1070_p0 = pneg %p1069_p13 }
 0x443   : > { %p1076_p6 = por %p1075_p4, %p1074_p3 }
 0x445   : > { %p1077_p7 = pnand %p1076_p6, %p1070_p0 }
 0x447   : > { %1080 = shalt.err (!%p1077_p7)
}
 0x448   : > { %s1139_s19 = smov 128   ;;  %s1140_s27 = smov 256  }
 0x449   : > { %s1141_s20 = smov 8  }
 0x44a   : > { %964 = dma.vmem_to_hbm [thread:$0]  (%p1221_p5), %s1334_s17, 256, %s1331_s16, %s735_s18, %s1139_s19, %s1140_s27, %s1141_s20  }
 0x44b PF: > { %s782_s21 = sand.u32 1, %s1111_s24   ;;  %p967_p8 = pnand %p910_p10, %p1232_p9 }
 0x44c   : > { %s783_s10 = scalar_lea.sflag [#allocation8], %s782_s21 }
 0x44d   : > { %1106 = dma.done.wait (!%p967_p8), %s783_s10, 256  }
 0x44e   : > { %1108 = vsyncadd (!%p967_p8), %s783_s10, 4294967040  ;;  %s21_s29 = sadd.s32 1, %s1131_s29   ;;  %s1393_s24 = smov %s1115_s25 }
 0x44f   : > { %p18_p11 = scmp.ge.s32.totalorder %s21_s29, 4   ;;  %s1394_s25 = smov %s1119_s26 }
 0x450   : > { %s1395_s26 = smov %s1230_s13  ;;  %s1396_s27 = smov %s1127_s28 }
 0x451   : > { %s1397_s28 = smov %s1399_s9  ;;  %20 = sbr.rel (!%p18_p11) target bundleno = 4 (0x4), region = 154 }
 0x458   :  { %788 = vsyncpa [#allocation8], 1 }
 0x459   :  { %790 = vsyncpa [#allocation8 + $0x1], 1 }

// kernel: gpt_forward.2
= control target key start
LH: loop header
LB: loop body
LE: loop exit
PB: predicated region body
PF: predicated region fallthrough
CT: control target
= control target key end

     0   :  { %v5597_v2 = vmov 0.0   ;;  %vm5598_vm0 = vmmov 0   ;;  %vm410_vm1 = vcmask 523264   ;;  %vm535_vm2 = vcmask 1043456   ;;  %s6909_s0 = inlined_call_operand.vmem [shape: f32[2,8,128], index: 0, kind: input, shape index: {}]   ;;  %s6910_s3 = inlined_call_operand.vmem [shape: bf16[2,2,128,64], index: 3, kind: input, shape index: {}]   ;;  %s6911_s4 = inlined_call_operand.vmem [shape: bf16[2,2,128,64], index: 4, kind: input, shape index: {}]   ;;  %s6912_s5 = inlined_call_operand.vmem [shape: bf16[2,2,128,64], index: 5, kind: input, shape index: {}]   ;;  %s6913_s1 = inlined_call_operand.vmem [shape: f32[2,1,128], index: 1, kind: input, shape index: {}]   ;;  %s6914_s2 = inlined_call_operand.vmem [shape: f32[2,1,128], index: 2, kind: input, shape index: {}]   ;;  %s6915_s6 = inlined_call_operand.vmem [shape: bf16[2,2,64,128], index: 6, kind: input, shape index: {}]   ;;  %s6916_s9 = inlined_call_operand.vmem [shape: bf16[2,128,512], index: 9, kind: input, shape index: {}]   ;;  %s6917_s7 = inlined_call_operand.vmem [shape: f32[2,1,128], index: 7, kind: input, shape index: {}]   ;;  %s6918_s8 = inlined_call_operand.vmem [shape: f32[2,1,128], index: 8, kind: input, shape index: {}]   ;;  %s6919_s10 = inlined_call_operand.vmem [shape: bf16[2,512,128], index: 10, kind: input, shape index: {}]   ;;  %s6920_s11 = inlined_call_operand.vmem [shape: f32[2,8,128], index: 11, kind: output, shape index: {}]  }
   0x1   :  { %v39_v0 = vld [vmem:[%s6909_s0] sm:$0xff]  ;;  %v40_v1 = vld [vmem:[%s6909_s0 + $0x8] sm:$0xff]  ;;  %4855 = vmatprep.subr.bf16.mxu0 %v5597_v2  ;;  %4875 = vmatprep.subr.bf16.mxu1 %v5597_v2  ;;  %v5247_v15 = vld [vmem:[%s6910_s3 + $0x10] sm:$0xff]   ;;  %vm507_vm4 = vcmask 64512  }
   0x2   :  { %49 = vadd.xlane.f32.xlu0 %v39_v0  ;;  %v5243_v3 = vld [vmem:[%s6910_s3] sm:$0xff]   ;;  %v5245_v5 = vld [vmem:[%s6910_s3 + $0x8] sm:$0xff]   ;;  %v5248_v16 = vld [vmem:[%s6911_s4 + $0x10] sm:$0xff]   ;;  %4871 = vmatprep.mubr.msk.bf16.mxu0 %vm5598_vm0, %v5597_v2 }
   0x3   :  { %v5244_v4 = vld [vmem:[%s6911_s4] sm:$0xff]   ;;  %4856 = vmatpush3.bf16.msra.mxu0 %v5243_v3  ;;  %v5246_v14 = vld [vmem:[%s6911_s4 + $0x8] sm:$0xff]   ;;  %v5249_v17 = vld [vmem:[%s6910_s3 + $0x18] sm:$0xff]   ;;  %4891 = vmatprep.mubr.msk.bf16.mxu1 %vm5598_vm0, %v5597_v2 }
   0x4   :  { %4876 = vmatpush3.bf16.msra.mxu1 %v5244_v4  ;;  %4857 = vmatprep.subr.bf16.mxu0 %v5597_v2  ;;  %v5250_v18 = vld [vmem:[%s6911_s4 + $0x18] sm:$0xff]   ;;  %v5251_v19 = vld [vmem:[%s6910_s3 + $0x20] sm:$0xff]   ;;  %v5253_v21 = vld [vmem:[%s6910_s3 + $0x28] sm:$0xff]  }
   0x5   :  { %4877 = vmatprep.subr.bf16.mxu1 %v5597_v2  ;;  %v5252_v20 = vld [vmem:[%s6911_s4 + $0x20] sm:$0xff]   ;;  %v5254_v22 = vld [vmem:[%s6911_s4 + $0x28] sm:$0xff]   ;;  %v5255_v23 = vld [vmem:[%s6910_s3 + $0x30] sm:$0xff]  }
   0x6   :  { %51 = vadd.xlane.f32.xlu0 %v40_v1  ;;  %v5256_v24 = vld [vmem:[%s6911_s4 + $0x30] sm:$0xff]   ;;  %v5257_v25 = vld [vmem:[%s6910_s3 + $0x38] sm:$0xff]   ;;  %v4071_v35 = vld [vmem:[%s6913_s1] ss:$0 sm:$0xff] }
   0x7   :  { %4858 = vmatpush3.bf16.msra.mxu0 %v5245_v5  ;;  %v5258_v26 = vld [vmem:[%s6911_s4 + $0x38] sm:$0xff]   ;;  %v4072_v39 = vld [vmem:[%s6914_s2] ss:$0 sm:$0xff]  ;;  %v5260_v45 = vld [vmem:[%s6912_s5 + $0x8] sm:$0xff]  }
   0x8   :  { %4859 = vmatprep.subr.bf16.mxu0 %v5597_v2  ;;  %4878 = vmatpush3.bf16.msra.mxu1 %v5246_v14  ;;  %v5259_v43 = vld [vmem:[%s6912_s5] sm:$0xff]   ;;  %v5261_v46 = vld [vmem:[%s6912_s5 + $0x10] sm:$0xff]   ;;  %v5262_v47 = vld [vmem:[%s6912_s5 + $0x18] sm:$0xff]  }
   0x9   :  { %4879 = vmatprep.subr.bf16.mxu1 %v5597_v2  ;;  %v5263_v48 = vld [vmem:[%s6912_s5 + $0x20] sm:$0xff]   ;;  %v5264_v49 = vld [vmem:[%s6912_s5 + $0x28] sm:$0xff]   ;;  %v5265_v50 = vld [vmem:[%s6912_s5 + $0x30] sm:$0xff]  }
   0xa   :  { %v5266_v51 = vld [vmem:[%s6912_s5 + $0x38] sm:$0xff]   ;;  %v5267_v52 = vld [vmem:[%s6910_s3 + $0x40] sm:$0xff]   ;;  %v5268_v53 = vld [vmem:[%s6910_s3 + $0x48] sm:$0xff]  }
   0xb   :  { %4860 = vmatpush3.bf16.msra.mxu0 %v5247_v15  ;;  %v5269_v54 = vld [vmem:[%s6910_s3 + $0x50] sm:$0xff]   ;;  %v5270_v55 = vld [vmem:[%s6910_s3 + $0x58] sm:$0xff]   ;;  %v5271_v56 = vld [vmem:[%s6910_s3 + $0x60] sm:$0xff]  }
   0xc   :  { %4880 = vmatpush3.bf16.msra.mxu1 %v5248_v16  ;;  %4861 = vmatprep.subr.bf16.mxu0 %v5597_v2  ;;  %v5272_v57 = vld [vmem:[%s6910_s3 + $0x68] sm:$0xff]   ;;  %v5273_v58 = vld [vmem:[%s6910_s3 + $0x70] sm:$0xff]   ;;  %v5274_v59 = vld [vmem:[%s6910_s3 + $0x78] sm:$0xff]  }
   0xd   :  { %4881 = vmatprep.subr.bf16.mxu1 %v5597_v2  ;;  %v5275_v60 = vld [vmem:[%s6912_s5 + $0x40] sm:$0xff]   ;;  %v5276_v61 = vld [vmem:[%s6912_s5 + $0x48] sm:$0xff]   ;;  %v5277_v62 = vld [vmem:[%s6912_s5 + $0x50] sm:$0xff]  }
   0xe   :  { %v5278_v63 = vld [vmem:[%s6912_s5 + $0x58] sm:$0xff]   ;;  %v5281_v3 = vld [vmem:[%s6912_s5 + $0x70] sm:$0xff]  }
   0xf   :  { %4862 = vmatpush3.bf16.msra.mxu0 %v5249_v17  ;;  %v5282_v4 = vld [vmem:[%s6912_s5 + $0x78] sm:$0xff]  }
  0x10   :  { %4882 = vmatpush3.bf16.msra.mxu1 %v5250_v18  ;;  %4863 = vmatprep.subr.bf16.mxu0 %v5597_v2 }
  0x11   :  { %4883 = vmatprep.subr.bf16.mxu1 %v5597_v2 }
  0x13   :  { %4864 = vmatpush3.bf16.msra.mxu0 %v5251_v19 }
  0x14   :  { %4884 = vmatpush3.bf16.msra.mxu1 %v5252_v20  ;;  %4865 = vmatprep.subr.bf16.mxu0 %v5597_v2 }
  0x15   :  { %4885 = vmatprep.subr.bf16.mxu1 %v5597_v2 }
  0x17   :  { %4866 = vmatpush3.bf16.msra.mxu0 %v5253_v21 }
  0x18   :  { %4886 = vmatpush3.bf16.msra.mxu1 %v5254_v22  ;;  %4867 = vmatprep.subr.bf16.mxu0 %v5597_v2 }
  0x19   :  { %4887 = vmatprep.subr.bf16.mxu1 %v5597_v2 }
  0x1b   :  { %4868 = vmatpush3.bf16.msra.mxu0 %v5255_v23 }
  0x1c   :  { %4888 = vmatpush3.bf16.msra.mxu1 %v5256_v24  ;;  %4869 = vmatprep.subr.bf16.mxu0 %v5597_v2 }
  0x1d   :  { %4889 = vmatprep.subr.bf16.mxu1 %v5597_v2 }
  0x1f   :  { %4870 = vmatpush3.bf16.msra.mxu0 %v5257_v25 }
  0x20   :  { %4890 = vmatpush3.bf16.msra.mxu1 %v5258_v26  ;;  %4895 = vmatprep.subr.bf16.mxu0 %v5597_v2 }
  0x21   :  { %4915 = vmatprep.subr.bf16.mxu1 %v5597_v2 }
  0x8f   :  { %v50_v6 = vpop.xlane.xlu0 %49 }
  0x90   :  { %v54_v7 = vmul.f32 0.0078125, %v50_v6 }
  0x92   :  { %v56_v8 = vsub.f32 %v39_v0, %v54_v7  ;;  %v5279_v0 = vld [vmem:[%s6912_s5 + $0x60] sm:$0xff]  }
  0x93   :  { %v52_v9 = vpop.xlane.xlu0 %51 }
  0x94   :  { %v55_v10 = vmul.f32 0.0078125, %v52_v9  ;;  %v58_v11 = vmul.f32 %v56_v8, %v56_v8 }
  0x96   :  { %v57_v12 = vsub.f32 %v40_v1, %v55_v10  ;;  %60 = vadd.xlane.f32.xlu1 %v58_v11  ;;  %v5280_v1 = vld [vmem:[%s6912_s5 + $0x68] sm:$0xff]  }
  0x98   :  { %v59_v13 = vmul.f32 %v57_v12, %v57_v12 }
  0x9a   :  { %62 = vadd.xlane.f32.xlu1 %v59_v13 }
 0x123   :  { %v61_v27 = vpop.xlane.xlu1 %60 }
 0x124   :  { %v64_v28 = vmul.f32 0.0078125, %v61_v27 }
 0x126   :  { %v66_v29 = vadd.f32 1e-06, %v64_v28 }
 0x127   :  { %v63_v30 = vpop.xlane.xlu1 %62 }
 0x128   :  { %5515 = vrsqrt.f32 %v66_v29  ;;  %v65_v31 = vmul.f32 0.0078125, %v63_v30 }
 0x12a   :  { %v67_v32 = vadd.f32 1e-06, %v65_v31 }
 0x12c   :  { %5517 = vrsqrt.f32 %v67_v32 }
 0x132   :  { %v5516_v33 = vpop.eup %5515 }
 0x133   :  { %v70_v34 = vmul.f32 %v5516_v33, %v56_v8  ;;  %v41_v33 = vlaneseq }
 0x135   :  { %v78_v37 = vmul.f32 %v4071_v35, %v70_v34  ;;  %v42_v34 = vshrl.u32 %v41_v33, 7 }
 0x136   :  { %v5518_v36 = vpop.eup %5517 }
 0x137   :  { %v71_v38 = vmul.f32 %v5518_v36, %v57_v12  ;;  %v86_v41 = vadd.f32 %v4072_v39, %v78_v37  ;;  %v5599_v37 = vmov -1e+30  }
 0x139   :  { %v79_v40 = vmul.f32 %v4071_v35, %v71_v38  ;;  %v44_v35 = vand.u32 127, %v41_v33 }
 0x13b   :  { %v87_v42 = vadd.f32 %v4072_v39, %v79_v40  ;;  %vm45_vm3 = vcmp.le.s32.totalorder %v44_v35, %v42_v34 }
 0x13c   :  { %v5876_v38 = vsel %vm45_vm3, 0.0, %v5599_v37 }
 0x13d   :  { %v5746_v44 = vpack.c.bf16 %v87_v42, %v86_v41 }
 0x13f   :  { %4872 = vmatmul.mubr.bf16.vlgmr.msra.gmra.mrb[0].mxu0 %v5746_v44  ;;  %4892 = vmatmul.mubr.bf16.vlgmr.msra.gmra.mrb[0].mxu1 %v5746_v44 }
 0x140   :  { %4896 = vmatpush3.bf16.msra.mxu0 %v5259_v43  ;;  %4911 = vmatprep.mubr.msk.bf16.mxu0 %vm5598_vm0, %v5597_v2 }
 0x141   :  { %4897 = vmatprep.subr.bf16.mxu0 %v5597_v2  ;;  %4917 = vmatprep.mubr.msk.bf16.mxu1 %vm5598_vm0, %v5597_v2 }
 0x144   :  { %4898 = vmatpush3.bf16.msra.mxu0 %v5260_v45 }
 0x145   :  { %4899 = vmatprep.subr.bf16.mxu0 %v5597_v2 }
 0x148   :  { %4900 = vmatpush3.bf16.msra.mxu0 %v5261_v46 }
 0x149   :  { %4901 = vmatprep.subr.bf16.mxu0 %v5597_v2 }
 0x14c   :  { %4902 = vmatpush3.bf16.msra.mxu0 %v5262_v47 }
 0x14d   :  { %4903 = vmatprep.subr.bf16.mxu0 %v5597_v2 }
 0x150   :  { %4904 = vmatpush3.bf16.msra.mxu0 %v5263_v48 }
 0x151   :  { %4905 = vmatprep.subr.bf16.mxu0 %v5597_v2 }
 0x154   :  { %4906 = vmatpush3.bf16.msra.mxu0 %v5264_v49 }
 0x155   :  { %4907 = vmatprep.subr.bf16.mxu0 %v5597_v2 }
 0x158   :  { %4908 = vmatpush3.bf16.msra.mxu0 %v5265_v50 }
 0x159   :  { %4909 = vmatprep.subr.bf16.mxu0 %v5597_v2 }
 0x15c   :  { %4910 = vmatpush3.bf16.msra.mxu0 %v5266_v51 }
 0x15d   :  { %4939 = vmatprep.subr.bf16.mxu0 %v5597_v2 }
 0x15f   :  { %4912 = vmatmul.mubr.bf16.vlgmr.msra.gmra.mrb[4].mxu0 %v5746_v44 }
 0x160   :  { %4940 = vmatpush3.bf16.msra.mxu0 %v5267_v52  ;;  %4955 = vmatprep.mubr.msk.bf16.mxu0 %vm5598_vm0, %v5597_v2 }
 0x161   :  { %4941 = vmatprep.subr.bf16.mxu0 %v5597_v2 }
 0x164   :  { %4942 = vmatpush3.bf16.msra.mxu0 %v5268_v53 }
 0x165   :  { %4943 = vmatprep.subr.bf16.mxu0 %v5597_v2 }
 0x168   :  { %4944 = vmatpush3.bf16.msra.mxu0 %v5269_v54 }
 0x169   :  { %4945 = vmatprep.subr.bf16.mxu0 %v5597_v2 }
 0x16c   :  { %4946 = vmatpush3.bf16.msra.mxu0 %v5270_v55 }
 0x16d   :  { %4947 = vmatprep.subr.bf16.mxu0 %v5597_v2 }
 0x170   :  { %4948 = vmatpush3.bf16.msra.mxu0 %v5271_v56 }
 0x171   :  { %4949 = vmatprep.subr.bf16.mxu0 %v5597_v2 }
 0x174   :  { %4950 = vmatpush3.bf16.msra.mxu0 %v5272_v57 }
 0x175   :  { %4951 = vmatprep.subr.bf16.mxu0 %v5597_v2 }
 0x178   :  { %4952 = vmatpush3.bf16.msra.mxu0 %v5273_v58 }
 0x179   :  { %4953 = vmatprep.subr.bf16.mxu0 %v5597_v2 }
 0x17c   :  { %4954 = vmatpush3.bf16.msra.mxu0 %v5274_v59 }
 0x17d   :  { %4979 = vmatprep.subr.bf16.mxu0 %v5597_v2 }
 0x17f   :  { %4956 = vmatmul.mubr.bf16.vlgmr.msra.gmra.mrb[8].mxu0 %v5746_v44 }
 0x180   :  { %4980 = vmatpush3.bf16.msra.mxu0 %v5275_v60  ;;  %4995 = vmatprep.mubr.msk.bf16.mxu0 %vm5598_vm0, %v5597_v2 }
 0x181   :  { %4981 = vmatprep.subr.bf16.mxu0 %v5597_v2 }
 0x184   :  { %4982 = vmatpush3.bf16.msra.mxu0 %v5276_v61 }
 0x185   :  { %4983 = vmatprep.subr.bf16.mxu0 %v5597_v2 }
 0x188   :  { %4984 = vmatpush3.bf16.msra.mxu0 %v5277_v62 }
 0x189   :  { %4985 = vmatprep.subr.bf16.mxu0 %v5597_v2 }
 0x18c   :  { %4986 = vmatpush3.bf16.msra.mxu0 %v5278_v63 }
 0x18d   :  { %4987 = vmatprep.subr.bf16.mxu0 %v5597_v2 }
 0x190   :  { %4988 = vmatpush3.bf16.msra.mxu0 %v5279_v0 }
 0x191   :  { %4989 = vmatprep.subr.bf16.mxu0 %v5597_v2 }
 0x194   :  { %4990 = vmatpush3.bf16.msra.mxu0 %v5280_v1 }
 0x195   :  { %4991 = vmatprep.subr.bf16.mxu0 %v5597_v2 }
 0x198   :  { %4992 = vmatpush3.bf16.msra.mxu0 %v5281_v3 }
 0x199   :  { %4993 = vmatprep.subr.bf16.mxu0 %v5597_v2 }
 0x19c   :  { %4994 = vmatpush3.bf16.msra.mxu0 %v5282_v4 }
 0x19d   :  { %5023 = vmatprep.subr.bf16.mxu0 %v5597_v2 }
 0x19f   :  { %4996 = vmatmul.mubr.bf16.vlgmr.msra.gmra.mrb[12].mxu0 %v5746_v44 }
 0x1a0   :  { %5031 = vmatprep.mubr.msk.bf16.mxu0 %vm5598_vm0, %v5597_v2 }
 0x212   :  { %v219_v5 = vpop.f32.mrb[0].mxu0  ;;  %v308_v6 = vpop.f32.mrb[0].mxu1 }
 0x213   :  { %v406_v7 = vpack.c.bf16 %v308_v6, %v308_v6  ;;  %v4873_v8 = vpop.f32.mrb[1].mxu0  ;;  %v4893_v9 = vpop.f32.mrb[1].mxu1  ;;  %v404_v16 = vpack.c.bf16 %v219_v5, %v219_v5 }
 0x214   :  { %v222_v10 = vpop.f32.mrb[2].mxu0  ;;  %v311_v11 = vpop.f32.mrb[2].mxu1  ;;  %v5283_v9 = vld [vmem:[%s6911_s4 + $0x40] sm:$0xff]  }
 0x215   :  { %v415_v12 = vsel %vm410_vm1, %v406_v7, 0  ;;  %v4874_v13 = vpop.f32.mrb[3].mxu0  ;;  %v4894_v14 = vpop.f32.mrb[3].mxu1  ;;  %v407_v15 = vpack.c.bf16 %v311_v11, %v311_v11  ;;  %v405_v18 = vpack.c.bf16 %v222_v10, %v222_v10  ;;  %v5284_v11 = vld [vmem:[%s6911_s4 + $0x48] sm:$0xff]  }
 0x216   :  { %4916 = vmatpush3.bf16.xpose.msra.mxu1 %v415_v12  ;;  %v5285_v12 = vld [vmem:[%s6911_s4 + $0x50] sm:$0xff]   ;;  %v5286_v13 = vld [vmem:[%s6911_s4 + $0x58] sm:$0xff]   ;;  %v5287_v14 = vld [vmem:[%s6911_s4 + $0x60] sm:$0xff]  }
 0x217   :  { %4921 = vmatprep.subr.bf16.mxu1 %v5597_v2  ;;  %v461_v17 = vsel %vm410_vm1, %v407_v15, 0  ;;  %v5288_v15 = vld [vmem:[%s6911_s4 + $0x68] sm:$0xff]  }
 0x21d   :  { %4918 = vmatmul.mubr.msk.bf16.vlgmr.msra.gmra.mrb[4].mxu1 %vm410_vm1, %v404_v16  ;;  %v5289_v16 = vld [vmem:[%s6911_s4 + $0x70] sm:$0xff]  }
 0x21e   :  { %4922 = vmatpush3.bf16.xpose.msra.mxu1 %v461_v17  ;;  %4923 = vmatprep.mubr.msk.bf16.mxu1 %vm5598_vm0, %v5597_v2  ;;  %v5290_v17 = vld [vmem:[%s6911_s4 + $0x78] sm:$0xff]  }
 0x21f   :  { %4927 = vmatprep.subr.bf16.mxu1 %v5597_v2 }
 0x225   :  { %4924 = vmatmul.mubr.msk.bf16.vlgmr.msra.gmra.mrb[8].mxu1 %vm410_vm1, %v405_v18 }
 0x226   :  { %4929 = vmatprep.mubr.msk.bf16.mxu1 %vm5598_vm0, %v5597_v2 }
 0x232   :  { %v397_v19 = vpop.f32.mrb[4].mxu0 }
 0x233   :  { %v408_v20 = vpack.c.bf16 %v397_v19, %v397_v19  ;;  %v4913_v21 = vpop.f32.mrb[5].mxu0 }
 0x234   :  { %v400_v22 = vpop.f32.mrb[6].mxu0 }
 0x235   :  { %v537_v23 = vsel %vm535_vm2, %v408_v20, 0  ;;  %v4914_v24 = vpop.f32.mrb[7].mxu0  ;;  %v409_v3 = vpack.c.bf16 %v400_v22, %v400_v22 }
 0x236   :  { %4928 = vmatpush3.bf16.msra.mxu1 %v537_v23 }
 0x237   :  { %4933 = vmatprep.subr.bf16.mxu1 %v5597_v2  ;;  %v583_v6 = vsel %vm535_vm2, %v409_v3, 0 }
 0x252   :  { %v5868_v25 = vpop.f32.mrb[8].mxu0 }
 0x253   :  { %v4957_v26 = vpop.f32.mrb[9].mxu0  ;;  %v952_v37 = vpack.c.bf16 %v5868_v25, %v5868_v25 }
 0x254   :  { %v5870_v27 = vpop.f32.mrb[10].mxu0 }
 0x255   :  { %v4958_v28 = vpop.f32.mrb[11].mxu0 }
 0x272   :  { %v5872_v29 = vpop.f32.mrb[12].mxu0 }
 0x273   :  { %v4997_v30 = vpop.f32.mrb[13].mxu0 }
 0x274   :  { %v5874_v31 = vpop.f32.mrb[14].mxu0 }
 0x275   :  { %v4998_v32 = vpop.f32.mrb[15].mxu0 }
 0x2f0   :  { %v451_v36 = vpop.f32.mrb[4].mxu1 }
 0x2f1   :  { %v503_v39 = vmul.f32 0.125, %v451_v36  ;;  %v4919_v40 = vpop.f32.mrb[5].mxu1 }
 0x2f2   :  { %v454_v41 = vpop.f32.mrb[6].mxu1  ;;  %v956_v40 = vpack.c.bf16 %v5872_v29, %v5872_v29 }
 0x2f3   :  { %v4920_v42 = vpop.f32.mrb[7].mxu1  ;;  %v505_v43 = vadd.f32 %v503_v39, %v5876_v38  ;;  %v953_v41 = vpack.c.bf16 %v5870_v27, %v5870_v27 }
 0x2f4   :  { %v1082_v42 = vsel %vm535_vm2, %v956_v40, 0  ;;  %v5595_v40 = vld [vmem:[%s6909_s0] sm:$0xff] }
 0x2f5   :  { %v508_v45 = vsel %vm507_vm4, %v505_v43, -inf }
 0x2f6   :  { %509 = vmax.xlane.f32.xlu0 %v508_v45 }
 0x2f8   :  { %v497_v46 = vpop.f32.mrb[8].mxu1 }
 0x2f9   :  { %v504_v47 = vmul.f32 0.125, %v497_v46  ;;  %v4925_v48 = vpop.f32.mrb[9].mxu1 }
 0x2fa   :  { %v500_v49 = vpop.f32.mrb[10].mxu1 }
 0x2fb   :  { %v4926_v50 = vpop.f32.mrb[11].mxu1  ;;  %v506_v51 = vadd.f32 %v504_v47, %v5876_v38 }
 0x2fd   :  { %v511_v52 = vsel %vm507_vm4, %v506_v51, -inf }
 0x2fe   :  { %512 = vmax.xlane.f32.xlu1 %v511_v52 }
 0x383   :  { %v510_v53 = vpop.xlane.xlu0 %509 }
 0x384   :  { %v514_v54 = vsub.f32 %v505_v43, %v510_v53 }
 0x386   :  { %v516_v55 = vmul.f32 1.442695, %v514_v54 }
 0x388   :  { %5519 = vpow2.f32 %v516_v55 }
 0x38b   :  { %v513_v56 = vpop.xlane.xlu1 %512 }
 0x38c   :  { %v515_v57 = vsub.f32 %v506_v51, %v513_v56 }
 0x38e   :  { %v518_v58 = vmul.f32 1.442695, %v515_v57 }
 0x390   :  { %5521 = vpow2.f32 %v518_v58 }
 0x392   :  { %v5520_v59 = vpop.eup %5519 }
 0x393   :  { %v520_v60 = vsel %vm507_vm4, %v5520_v59, 0.0 }
 0x394   :  { %521 = vadd.xlane.f32.xlu0 %v520_v60 }
 0x39a   :  { %v5522_v61 = vpop.eup %5521 }
 0x39b   :  { %v523_v62 = vsel %vm507_vm4, %v5522_v61, 0.0 }
 0x39c   :  { %524 = vadd.xlane.f32.xlu1 %v523_v62 }
 0x421   :  { %v522_v63 = vpop.xlane.xlu0 %521 }
 0x422   :  { %5523 = vrcp.f32 %v522_v63 }
 0x429   :  { %v525_v0 = vpop.xlane.xlu1 %524 }
 0x42a   :  { %5525 = vrcp.f32 %v525_v0 }
 0x42c   :  { %v5524_v1 = vpop.eup %5523 }
 0x42d   :  { %v528_v4 = vmul.f32 %v5524_v1, %v5520_v59  ;;  %v5295_v1 = vld [vmem:[%s6915_s6 + $0x20] sm:$0xff]  }
 0x42e   :  { %5024 = vmatpush3.bf16.msra.mxu0 %v5295_v1  ;;  %v5322_v1 = vld [vmem:[%s6916_s9 + $0x6c] ss:$16 sps:$4 sm:$0xff]  }
 0x42f   :  { %v530_v5 = vpack.c.bf16 %v528_v4, %v528_v4  ;;  %5025 = vmatprep.subr.bf16.mxu0 %v5597_v2 }
 0x431   :  { %4930 = vmatmul.mubr.msk.bf16.vlgmr.msra.gmra.mrb[12].mxu1 %vm507_vm4, %v530_v5 }
 0x432   :  { %4934 = vmatpush3.bf16.msra.mxu1 %v583_v6  ;;  %4935 = vmatprep.mubr.msk.bf16.mxu1 %vm5598_vm0, %v5597_v2  ;;  %v957_v6 = vpack.c.bf16 %v5874_v31, %v5874_v31  ;;  %v5292_v31 = vld [vmem:[%s6915_s6 + $0x8] sm:$0xff]  }
 0x433   :  { %4959 = vmatprep.subr.bf16.mxu1 %v5597_v2 }
 0x434   :  { %v5526_v7 = vpop.eup %5525 }
 0x435   :  { %v529_v8 = vmul.f32 %v5526_v7, %v5522_v61 }
 0x437   :  { %v531_v10 = vpack.c.bf16 %v529_v8, %v529_v8 }
 0x439   :  { %4936 = vmatmul.mubr.msk.bf16.vlgmr.msra.gmra.mrb[16].mxu1 %vm507_vm4, %v531_v10 }
 0x43a   :  { %4960 = vmatpush3.bf16.msra.mxu1 %v5283_v9  ;;  %4975 = vmatprep.mubr.msk.bf16.mxu1 %vm5598_vm0, %v5597_v2  ;;  %v1128_v9 = vsel %vm535_vm2, %v957_v6, 0  ;;  %v5328_v6 = vld [vmem:[%s6916_s9 + $0x8c] ss:$16 sps:$4 sm:$0xff]  }
 0x43b   :  { %4961 = vmatprep.subr.bf16.mxu1 %v5597_v2 }
 0x43e   :  { %4962 = vmatpush3.bf16.msra.mxu1 %v5284_v11 }
 0x43f   :  { %4963 = vmatprep.subr.bf16.mxu1 %v5597_v2 }
 0x442   :  { %4964 = vmatpush3.bf16.msra.mxu1 %v5285_v12  ;;  %v5291_v12 = vld [vmem:[%s6915_s6] sm:$0xff]  }
 0x443   :  { %4965 = vmatprep.subr.bf16.mxu1 %v5597_v2 }
 0x446   :  { %4966 = vmatpush3.bf16.msra.mxu1 %v5286_v13 }
 0x447   :  { %4967 = vmatprep.subr.bf16.mxu1 %v5597_v2 }
 0x44a   :  { %4968 = vmatpush3.bf16.msra.mxu1 %v5287_v14  ;;  %v5293_v14 = vld [vmem:[%s6915_s6 + $0x10] sm:$0xff]  }
 0x44b   :  { %4969 = vmatprep.subr.bf16.mxu1 %v5597_v2 }
 0x44e   :  { %4970 = vmatpush3.bf16.msra.mxu1 %v5288_v15  ;;  %v5294_v15 = vld [vmem:[%s6915_s6 + $0x18] sm:$0xff]  }
 0x44f   :  { %4971 = vmatprep.subr.bf16.mxu1 %v5597_v2 }
 0x452   :  { %4972 = vmatpush3.bf16.msra.mxu1 %v5289_v16  ;;  %v5296_v16 = vld [vmem:[%s6915_s6 + $0x28] sm:$0xff]  }
 0x453   :  { %4973 = vmatprep.subr.bf16.mxu1 %v5597_v2  ;;  %5026 = vmatpush3.bf16.msra.mxu0 %v5296_v16  ;;  %v5343_v16 = vld [vmem:[%s6916_s9 + $0xe4] ss:$16 sps:$4 sm:$0xff]  }
 0x454   :  { %5027 = vmatprep.subr.bf16.mxu0 %v5597_v2 }
 0x456   :  { %4974 = vmatpush3.bf16.msra.mxu1 %v5290_v17  ;;  %v5297_v17 = vld [vmem:[%s6915_s6 + $0x30] sm:$0xff]  }
 0x457   :  { %4999 = vmatprep.subr.bf16.mxu1 %v5597_v2  ;;  %5028 = vmatpush3.bf16.msra.mxu0 %v5297_v17  ;;  %v5346_v17 = vld [vmem:[%s6916_s9 + $0xec] ss:$16 sps:$4 sm:$0xff]  }
 0x458   :  { %5029 = vmatprep.subr.bf16.mxu0 %v5597_v2 }
 0x459   :  { %4976 = vmatmul.mubr.bf16.vlgmr.msra.gmra.mrb[20].mxu1 %v5746_v44 }
 0x45a   :  { %5001 = vmatprep.mubr.msk.bf16.mxu1 %vm5598_vm0, %v5597_v2 }
 0x504   :  { %v5927_v18 = vpop.f32.mrb[12].mxu1 }
 0x505   :  { %v4931_v19 = vpop.f32.mrb[13].mxu1 }
 0x506   :  { %v576_v20 = vpop.f32.mrb[14].mxu1 }
 0x507   :  { %v4932_v21 = vpop.f32.mrb[15].mxu1 }
 0x50c   :  { %v5929_v22 = vpop.f32.mrb[16].mxu1 }
 0x50d   :  { %v625_v23 = vpack.c.bf16 %v5929_v22, %v5927_v18  ;;  %v4937_v24 = vpop.f32.mrb[17].mxu1  ;;  %v5298_v18 = vld [vmem:[%s6915_s6 + $0x38] sm:$0xff]  }
 0x50e   :  { %v622_v26 = vpop.f32.mrb[18].mxu1  ;;  %5030 = vmatpush3.bf16.msra.mxu0 %v5298_v18  ;;  %v5341_v18 = vld [vmem:[%s6916_s9 + $0xe0] ss:$16 sps:$4 sm:$0xff]  }
 0x50f   :  { %v4938_v28 = vpop.f32.mrb[19].mxu1 }
 0x52c   :  { %v856_v30 = vpop.f32.mrb[20].mxu1 }
 0x52d   :  { %v954_v32 = vpack.c.bf16 %v856_v30, %v856_v30  ;;  %v4977_v33 = vpop.f32.mrb[21].mxu1 }
 0x52e   :  { %v859_v44 = vpop.f32.mrb[22].mxu1 }
 0x52f   :  { %v962_v34 = vsel %vm410_vm1, %v954_v32, 0  ;;  %v4978_v35 = vpop.f32.mrb[23].mxu1  ;;  %v955_v36 = vpack.c.bf16 %v859_v44, %v859_v44 }
 0x530   :  { %5000 = vmatpush3.bf16.xpose.msra.mxu1 %v962_v34 }
 0x531   :  { %5005 = vmatprep.subr.bf16.mxu1 %v5597_v2  ;;  %v1008_v39 = vsel %vm410_vm1, %v955_v36, 0 }
 0x537   :  { %5002 = vmatmul.mubr.msk.bf16.vlgmr.msra.gmra.mrb[24].mxu1 %vm410_vm1, %v952_v37 }
 0x538   :  { %5006 = vmatpush3.bf16.xpose.msra.mxu1 %v1008_v39  ;;  %5007 = vmatprep.mubr.msk.bf16.mxu1 %vm5598_vm0, %v5597_v2 }
 0x539   :  { %5011 = vmatprep.subr.bf16.mxu1 %v5597_v2 }
 0x53f   :  { %5008 = vmatmul.mubr.msk.bf16.vlgmr.msra.gmra.mrb[28].mxu1 %vm410_vm1, %v953_v41 }
 0x540   :  { %5012 = vmatpush3.bf16.msra.mxu1 %v1082_v42  ;;  %5013 = vmatprep.mubr.msk.bf16.mxu1 %vm5598_vm0, %v5597_v2 }
 0x541   :  { %5017 = vmatprep.subr.bf16.mxu1 %v5597_v2 }
 0x60a   :  { %v998_v25 = vpop.f32.mrb[24].mxu1 }
 0x60b   :  { %v1050_v43 = vmul.f32 0.125, %v998_v25  ;;  %v5003_v45 = vpop.f32.mrb[25].mxu1 }
 0x60c   :  { %v1001_v46 = vpop.f32.mrb[26].mxu1 }
 0x60d   :  { %v5004_v47 = vpop.f32.mrb[27].mxu1  ;;  %v1052_v29 = vadd.f32 %v1050_v43, %v5876_v38  ;;  %v5596_v43 = vld [vmem:[%s6909_s0 + $0x8] sm:$0xff]  ;;  %v5299_v46 = vld [vmem:[%s6916_s9] ss:$16 sps:$4 sm:$0xff]  }
 0x60e   :  { %v5301_v47 = vld [vmem:[%s6916_s9 + $0x4] ss:$16 sps:$4 sm:$0xff]  }
 0x60f   :  { %v1054_v48 = vsel %vm507_vm4, %v1052_v29, -inf  ;;  %1551 = vmatprep.subr.bf16.mxu0 %v5301_v47  ;;  %v5350_v47 = vld [vmem:[%s6919_s10 + $0x80] sm:$0xff]  }
 0x610   :  { %1055 = vmax.xlane.f32.xlu0 %v1054_v48  ;;  %v5304_v48 = vld [vmem:[%s6916_s9 + $0xc] ss:$16 sps:$4 sm:$0xff]  }
 0x612   :  { %v1044_v27 = vpop.f32.mrb[28].mxu1 }
 0x613   :  { %v1051_v49 = vmul.f32 0.125, %v1044_v27  ;;  %v5009_v50 = vpop.f32.mrb[29].mxu1  ;;  %v5305_v27 = vld [vmem:[%s6916_s9 + $0x20] ss:$16 sps:$4 sm:$0xff]  }
 0x614   :  { %v1047_v51 = vpop.f32.mrb[30].mxu1  ;;  %v5308_v50 = vld [vmem:[%s6916_s9 + $0x28] ss:$16 sps:$4 sm:$0xff]  }
 0x615   :  { %v5010_v52 = vpop.f32.mrb[31].mxu1  ;;  %v1053_v53 = vadd.f32 %v1051_v49, %v5876_v38  ;;  %v5307_v49 = vld [vmem:[%s6916_s9 + $0x24] ss:$16 sps:$4 sm:$0xff]   ;;  %v5310_v51 = vld [vmem:[%s6916_s9 + $0x2c] ss:$16 sps:$4 sm:$0xff]  }
 0x617   :  { %v1057_v54 = vsel %vm507_vm4, %v1053_v53, -inf }
 0x618   :  { %1058 = vmax.xlane.f32.xlu1 %v1057_v54 }
 0x69d   :  { %v1056_v55 = vpop.xlane.xlu0 %1055 }
 0x69e   :  { %v1060_v56 = vsub.f32 %v1052_v29, %v1056_v55  ;;  %v5302_v29 = vld [vmem:[%s6916_s9 + $0x8] ss:$16 sps:$4 sm:$0xff]  }
 0x6a0   :  { %v1062_v57 = vmul.f32 1.442695, %v1060_v56 }
 0x6a2   :  { %5527 = vpow2.f32 %v1062_v57 }
 0x6a5   :  { %v1059_v58 = vpop.xlane.xlu1 %1058 }
 0x6a6   :  { %v1061_v59 = vsub.f32 %v1053_v53, %v1059_v58 }
 0x6a8   :  { %v1064_v60 = vmul.f32 1.442695, %v1061_v59 }
 0x6aa   :  { %5529 = vpow2.f32 %v1064_v60  ;;  %v5313_v60 = vld [vmem:[%s6916_s9 + $0x44] ss:$16 sps:$4 sm:$0xff]  }
 0x6ac   :  { %v5528_v61 = vpop.eup %5527 }
 0x6ad   :  { %v1066_v62 = vsel %vm507_vm4, %v5528_v61, 0.0 }
 0x6ae   :  { %1067 = vadd.xlane.f32.xlu0 %v1066_v62  ;;  %v5311_v62 = vld [vmem:[%s6916_s9 + $0x40] ss:$16 sps:$4 sm:$0xff]  }
 0x6b4   :  { %v5530_v63 = vpop.eup %5529 }
 0x6b5   :  { %v1069_v0 = vsel %vm507_vm4, %v5530_v63, 0.0 }
 0x6b6   :  { %1070 = vadd.xlane.f32.xlu1 %v1069_v0  ;;  %v5319_v0 = vld [vmem:[%s6916_s9 + $0x64] ss:$16 sps:$4 sm:$0xff]  }
 0x73b   :  { %v1068_v3 = vpop.xlane.xlu0 %1067 }
 0x73c   :  { %5531 = vrcp.f32 %v1068_v3  ;;  %v5317_v3 = vld [vmem:[%s6916_s9 + $0x60] ss:$16 sps:$4 sm:$0xff]  }
 0x743   :  { %v1071_v4 = vpop.xlane.xlu1 %1070 }
 0x744   :  { %5533 = vrcp.f32 %v1071_v4  ;;  %v5320_v4 = vld [vmem:[%s6916_s9 + $0x68] ss:$16 sps:$4 sm:$0xff]  }
 0x746   :  { %v5532_v5 = vpop.eup %5531 }
 0x747   :  { %v1074_v7 = vmul.f32 %v5532_v5, %v5528_v61  ;;  %v5316_v61 = vld [vmem:[%s6916_s9 + $0x4c] ss:$16 sps:$4 sm:$0xff]   ;;  %v5325_v5 = vld [vmem:[%s6916_s9 + $0x84] ss:$16 sps:$4 sm:$0xff]  }
 0x749   :  { %v1076_v8 = vpack.c.bf16 %v1074_v7, %v1074_v7  ;;  %v5323_v7 = vld [vmem:[%s6916_s9 + $0x80] ss:$16 sps:$4 sm:$0xff]  }
 0x74b   :  { %5014 = vmatmul.mubr.msk.bf16.vlgmr.msra.gmra.mrb[32].mxu1 %vm507_vm4, %v1076_v8  ;;  %v5326_v8 = vld [vmem:[%s6916_s9 + $0x88] ss:$16 sps:$4 sm:$0xff]  }
 0x74c   :  { %5018 = vmatpush3.bf16.msra.mxu1 %v1128_v9  ;;  %5019 = vmatprep.mubr.msk.bf16.mxu1 %vm5598_vm0, %v5597_v2  ;;  %v5331_v9 = vld [vmem:[%s6916_s9 + $0xa4] ss:$16 sps:$4 sm:$0xff]  }
 0x74d   :  { %5035 = vmatprep.subr.bf16.mxu1 %v5597_v2 }
 0x74e   :  { %v5534_v10 = vpop.eup %5533 }
 0x74f   :  { %v1075_v11 = vmul.f32 %v5534_v10, %v5530_v63  ;;  %v5314_v63 = vld [vmem:[%s6916_s9 + $0x48] ss:$16 sps:$4 sm:$0xff]   ;;  %v5334_v10 = vld [vmem:[%s6916_s9 + $0xac] ss:$16 sps:$4 sm:$0xff]  }
 0x751   :  { %v1077_v13 = vpack.c.bf16 %v1075_v11, %v1075_v11  ;;  %v5329_v11 = vld [vmem:[%s6916_s9 + $0xa0] ss:$16 sps:$4 sm:$0xff]  }
 0x753   :  { %5020 = vmatmul.mubr.msk.bf16.vlgmr.msra.gmra.mrb[36].mxu1 %vm507_vm4, %v1077_v13  ;;  %v5337_v13 = vld [vmem:[%s6916_s9 + $0xc4] ss:$16 sps:$4 sm:$0xff]  }
 0x754   :  { %5036 = vmatpush3.bf16.msra.mxu1 %v5291_v12  ;;  %5043 = vmatprep.mubr.msk.bf16.mxu1 %vm5598_vm0, %v5597_v2  ;;  %v5332_v12 = vld [vmem:[%s6916_s9 + $0xa8] ss:$16 sps:$4 sm:$0xff]  }
 0x755   :  { %5037 = vmatprep.subr.bf16.mxu1 %v5597_v2 }
 0x758   :  { %5038 = vmatpush3.bf16.msra.mxu1 %v5292_v31  ;;  %v5340_v31 = vld [vmem:[%s6916_s9 + $0xcc] ss:$16 sps:$4 sm:$0xff]  }
 0x759   :  { %5039 = vmatprep.subr.bf16.mxu1 %v5597_v2 }
 0x75c   :  { %5040 = vmatpush3.bf16.msra.mxu1 %v5293_v14  ;;  %v5335_v14 = vld [vmem:[%s6916_s9 + $0xc0] ss:$16 sps:$4 sm:$0xff]  }
 0x75d   :  { %5041 = vmatprep.subr.bf16.mxu1 %v5597_v2 }
 0x760   :  { %5042 = vmatpush3.bf16.msra.mxu1 %v5294_v15  ;;  %v5338_v15 = vld [vmem:[%s6916_s9 + $0xc8] ss:$16 sps:$4 sm:$0xff]  }
 0x761   :  { %1594 = vmatprep.subr.bf16.mxu1 %v5304_v48  ;;  %v5352_v48 = vld [vmem:[%s6919_s10 + $0xc8] sm:$0xff]  }
 0x763   :  { %5044 = vmatmul.mubr.msk.bf16.vlgmr.msra.gmra.mrb[40].mxu1 %vm410_vm1, %v625_v23 }
 0x764   :  { %1595 = vmatpush1.bf16.msra.mxu1 %v5302_v29  ;;  %v5351_v29 = vld [vmem:[%s6919_s10 + $0x48] sm:$0xff]  }
 0x765   :  { %1596 = vmatprep.subr.bf16.mxu1 %v5310_v51  ;;  %v5356_v51 = vld [vmem:[%s6919_s10 + $0xd0] sm:$0xff]  }
 0x768   :  { %1597 = vmatpush1.bf16.msra.mxu1 %v5308_v50  ;;  %v5355_v50 = vld [vmem:[%s6919_s10 + $0x50] sm:$0xff]  }
 0x769   :  { %1598 = vmatprep.subr.bf16.mxu1 %v5316_v61  ;;  %v5366_v61 = vld [vmem:[%s6919_s10 + $0xa0] sm:$0xff]  }
 0x76c   :  { %1599 = vmatpush1.bf16.msra.mxu1 %v5314_v63  ;;  %v5368_v63 = vld [vmem:[%s6919_s10 + $0xe8] sm:$0xff]  }
 0x76d   :  { %1600 = vmatprep.subr.bf16.mxu1 %v5322_v1  ;;  %v5370_v1 = vld [vmem:[%s6919_s10 + $0xa8] sm:$0xff]  }
 0x770   :  { %1601 = vmatpush1.bf16.msra.mxu1 %v5320_v4  ;;  %v5372_v4 = vld [vmem:[%s6919_s10 + $0xf0] sm:$0xff]  }
 0x771   :  { %1602 = vmatprep.subr.bf16.mxu1 %v5328_v6  ;;  %v5374_v6 = vld [vmem:[%s6919_s10 + $0xb0] sm:$0xff]  }
 0x774   :  { %1603 = vmatpush1.bf16.msra.mxu1 %v5326_v8  ;;  %v5376_v8 = vld [vmem:[%s6919_s10 + $0xf8] sm:$0xff]  }
 0x775   :  { %1604 = vmatprep.subr.bf16.mxu1 %v5334_v10  ;;  %v5378_v10 = vld [vmem:[%s6919_s10 + $0xb8] sm:$0xff]  }
 0x778   :  { %1605 = vmatpush1.bf16.msra.mxu1 %v5332_v12 }
 0x779   :  { %1606 = vmatprep.subr.bf16.mxu1 %v5340_v31 }
 0x77c   :  { %1607 = vmatpush1.bf16.msra.mxu1 %v5338_v15 }
 0x77d   :  { %1608 = vmatprep.subr.bf16.mxu1 %v5346_v17 }
 0x81e   :  { %v1118_v19 = vpop.f32.mrb[32].mxu1 }
 0x81f   :  { %v5015_v20 = vpop.f32.mrb[33].mxu1 }
 0x820   :  { %v1121_v21 = vpop.f32.mrb[34].mxu1  ;;  %v5600_v20 = vmov 0  }
 0x821   :  { %v5016_v22 = vpop.f32.mrb[35].mxu1  ;;  %1626 = vmatprep.mubr.bf16.mxu1 %v5600_v20 }
 0x826   :  { %v1164_v23 = vpop.f32.mrb[36].mxu1 }
 0x827   :  { %v1170_v24 = vpack.c.bf16 %v1164_v23, %v1118_v19  ;;  %v5021_v26 = vpop.f32.mrb[37].mxu1  ;;  %v5344_v19 = vld [vmem:[%s6916_s9 + $0xe8] ss:$16 sps:$4 sm:$0xff]  }
 0x828   :  { %v1167_v28 = vpop.f32.mrb[38].mxu1  ;;  %1609 = vmatpush1.bf16.msra.mxu1 %v5344_v19 }
 0x829   :  { %v5022_v30 = vpop.f32.mrb[39].mxu1  ;;  %5032 = vmatmul.mubr.msk.bf16.vlgmr.msra.gmra.mrb[16].mxu0 %vm410_vm1, %v1170_v24 }
 0x82a   :  { %1552 = vmatpush1.bf16.msra.mxu0 %v5299_v46  ;;  %1583 = vmatprep.mubr.bf16.mxu0 %v5600_v20  ;;  %v5349_v46 = vld [vmem:[%s6919_s10] sm:$0xff]  }
 0x82b   :  { %1553 = vmatprep.subr.bf16.mxu0 %v5307_v49  ;;  %v5354_v49 = vld [vmem:[%s6919_s10 + $0x88] sm:$0xff]  }
 0x82e   :  { %1554 = vmatpush1.bf16.msra.mxu0 %v5305_v27  ;;  %v5353_v27 = vld [vmem:[%s6919_s10 + $0x8] sm:$0xff]  }
 0x82f   :  { %1555 = vmatprep.subr.bf16.mxu0 %v5313_v60  ;;  %v5365_v60 = vld [vmem:[%s6919_s10 + $0x20] sm:$0xff]  }
 0x832   :  { %1556 = vmatpush1.bf16.msra.mxu0 %v5311_v62  ;;  %v5367_v62 = vld [vmem:[%s6919_s10 + $0x68] sm:$0xff]  }
 0x833   :  { %1557 = vmatprep.subr.bf16.mxu0 %v5319_v0  ;;  %v5369_v0 = vld [vmem:[%s6919_s10 + $0x28] sm:$0xff]  }
 0x836   :  { %v1309_v32 = vpop.f32.mrb[40].mxu1  ;;  %1558 = vmatpush1.bf16.msra.mxu0 %v5317_v3  ;;  %v5371_v3 = vld [vmem:[%s6919_s10 + $0x70] sm:$0xff]  }
 0x837   :  { %v5045_v33 = vpop.f32.mrb[41].mxu1  ;;  %1559 = vmatprep.subr.bf16.mxu0 %v5325_v5  ;;  %v5373_v5 = vld [vmem:[%s6919_s10 + $0x30] sm:$0xff]  }
 0x838   :  { %v1312_v44 = vpop.f32.mrb[42].mxu1 }
 0x839   :  { %v5046_v34 = vpop.f32.mrb[43].mxu1 }
 0x83a   :  { %1560 = vmatpush1.bf16.msra.mxu0 %v5323_v7  ;;  %v5375_v7 = vld [vmem:[%s6919_s10 + $0x78] sm:$0xff]  }
 0x83b   :  { %1561 = vmatprep.subr.bf16.mxu0 %v5331_v9  ;;  %v5377_v9 = vld [vmem:[%s6919_s10 + $0x38] sm:$0xff]  }
 0x83e   :  { %1562 = vmatpush1.bf16.msra.mxu0 %v5329_v11 }
 0x83f   :  { %1563 = vmatprep.subr.bf16.mxu0 %v5337_v13 }
 0x842   :  { %1564 = vmatpush1.bf16.msra.mxu0 %v5335_v14 }
 0x843   :  { %1565 = vmatprep.subr.bf16.mxu0 %v5343_v16 }
 0x846   :  { %1566 = vmatpush1.bf16.msra.mxu0 %v5341_v18 }
 0x8fc   :  { %v1241_v35 = vpop.f32.mrb[16].mxu0 }
 0x8fd   :  { %v1310_v36 = vadd.f32 %v1309_v32, %v1241_v35  ;;  %v5033_v37 = vpop.f32.mrb[17].mxu0  ;;  %v4195_v32 = vld [vmem:[%s6917_s7] ss:$0 sm:$0xff] }
 0x8fe   :  { %v1244_v39 = vpop.f32.mrb[18].mxu0 }
 0x8ff   :  { %v6005_v41 = vadd.f32 %v5595_v40, %v1310_v36  ;;  %v1313_v42 = vadd.f32 %v1312_v44, %v1244_v39  ;;  %v5034_v25 = vpop.f32.mrb[19].mxu0  ;;  %v4196_v36 = vld [vmem:[%s6918_s8] ss:$0 sm:$0xff] }
 0x900   :  { %v5347_v25 = vld [vmem:[%s6919_s10 + $0x40] sm:$0xff]  }
 0x901   :  { %v6010_v45 = vadd.f32 %v5596_v43, %v1313_v42  ;;  %1320 = vadd.xlane.f32.xlu0 %v6005_v41  ;;  %v5348_v43 = vld [vmem:[%s6919_s10 + $0xc0] sm:$0xff]   ;;  %4687 = vmatprep.subr.bf16.mxu0 %v5347_v25 }
 0x902   :  { %4709 = vmatprep.subr.bf16.mxu1 %v5348_v43 }
 0x903   :  { %1322 = vadd.xlane.f32.xlu1 %v6010_v45 }
 0x98e   :  { %v1321_v52 = vpop.xlane.xlu0 %1320 }
 0x98f   :  { %v1324_v53 = vmul.f32 0.0078125, %v1321_v52  ;;  %v5357_v52 = vld [vmem:[%s6919_s10 + $0x10] sm:$0xff]  }
 0x990   :  { %v1323_v54 = vpop.xlane.xlu1 %1322 }
 0x991   :  { %v6039_v55 = vsub.f32 %v6005_v41, %v1324_v53  ;;  %v1325_v56 = vmul.f32 0.0078125, %v1323_v54  ;;  %v5358_v53 = vld [vmem:[%s6919_s10 + $0x90] sm:$0xff]   ;;  %v5359_v54 = vld [vmem:[%s6919_s10 + $0x58] sm:$0xff]  }
 0x993   :  { %v6042_v57 = vsub.f32 %v6010_v45, %v1325_v56  ;;  %v1328_v58 = vmul.f32 %v6039_v55, %v6039_v55  ;;  %v5361_v56 = vld [vmem:[%s6919_s10 + $0x18] sm:$0xff]  }
 0x995   :  { %1330 = vadd.xlane.f32.xlu0 %v1328_v58  ;;  %v1329_v59 = vmul.f32 %v6042_v57, %v6042_v57  ;;  %v5363_v58 = vld [vmem:[%s6919_s10 + $0x60] sm:$0xff]  }
 0x997   :  { %1332 = vadd.xlane.f32.xlu1 %v1329_v59  ;;  %v5364_v59 = vld [vmem:[%s6919_s10 + $0xe0] sm:$0xff]  }
 0xa22   :  { %v1331_v21 = vpop.xlane.xlu0 %1330 }
 0xa23   :  { %v1334_v22 = vmul.f32 0.0078125, %v1331_v21 }
 0xa24   :  { %v1333_v23 = vpop.xlane.xlu1 %1332 }
 0xa25   :  { %v1336_v24 = vadd.f32 1e-06, %v1334_v22  ;;  %v1335_v26 = vmul.f32 0.0078125, %v1333_v23 }
 0xa27   :  { %5535 = vrsqrt.f32 %v1336_v24  ;;  %v1337_v28 = vadd.f32 1e-06, %v1335_v26 }
 0xa29   :  { %5537 = vrsqrt.f32 %v1337_v28 }
 0xa31   :  { %v5536_v30 = vpop.eup %5535 }
 0xa32   :  { %v1340_v33 = vmul.f32 %v5536_v30, %v6039_v55  ;;  %v5360_v55 = vld [vmem:[%s6919_s10 + $0xd8] sm:$0xff]  }
 0xa33   :  { %v5538_v44 = vpop.eup %5537 }
 0xa34   :  { %v1341_v34 = vmul.f32 %v5538_v44, %v6042_v57  ;;  %v1348_v35 = vmul.f32 %v4195_v32, %v1340_v33  ;;  %v5362_v57 = vld [vmem:[%s6919_s10 + $0x98] sm:$0xff]  }
 0xa36   :  { %v1349_v37 = vmul.f32 %v4195_v32, %v1341_v34  ;;  %v1356_v39 = vadd.f32 %v4196_v36, %v1348_v35 }
 0xa38   :  { %v1357_v40 = vadd.f32 %v4196_v36, %v1349_v37 }
 0xa3a   :  { %v1358_v42 = vpack.c.bf16 %v1357_v40, %v1356_v39 }
 0xa3c   :  { %1584 = vmatmul.mubr.bf16.vlgmr.msra.gmra.mrb[20].mxu0 %v1358_v42  ;;  %1627 = vmatmul.mubr.bf16.vlgmr.msra.gmra.mrb[44].mxu1 %v1358_v42 }
 0xa3d   :  { %4688 = vmatpush3.bf16.msra.mxu0 %v5349_v46  ;;  %4710 = vmatpush3.bf16.msra.mxu1 %v5350_v47 }
 0xa3e   :  { %4689 = vmatprep.subr.bf16.mxu0 %v5351_v29  ;;  %4711 = vmatprep.subr.bf16.mxu1 %v5352_v48 }
 0xa41   :  { %4690 = vmatpush3.bf16.msra.mxu0 %v5353_v27  ;;  %4712 = vmatpush3.bf16.msra.mxu1 %v5354_v49 }
 0xa42   :  { %4691 = vmatprep.subr.bf16.mxu0 %v5355_v50  ;;  %4713 = vmatprep.subr.bf16.mxu1 %v5356_v51 }
 0xa45   :  { %4692 = vmatpush3.bf16.msra.mxu0 %v5357_v52  ;;  %4714 = vmatpush3.bf16.msra.mxu1 %v5358_v53 }
 0xa46   :  { %4693 = vmatprep.subr.bf16.mxu0 %v5359_v54  ;;  %4715 = vmatprep.subr.bf16.mxu1 %v5360_v55 }
 0xa49   :  { %4694 = vmatpush3.bf16.msra.mxu0 %v5361_v56  ;;  %4716 = vmatpush3.bf16.msra.mxu1 %v5362_v57 }
 0xa4a   :  { %4695 = vmatprep.subr.bf16.mxu0 %v5363_v58  ;;  %4717 = vmatprep.subr.bf16.mxu1 %v5364_v59 }
 0xa4d   :  { %4696 = vmatpush3.bf16.msra.mxu0 %v5365_v60  ;;  %4718 = vmatpush3.bf16.msra.mxu1 %v5366_v61 }
 0xa4e   :  { %4697 = vmatprep.subr.bf16.mxu0 %v5367_v62  ;;  %4719 = vmatprep.subr.bf16.mxu1 %v5368_v63 }
 0xa51   :  { %4698 = vmatpush3.bf16.msra.mxu0 %v5369_v0  ;;  %4720 = vmatpush3.bf16.msra.mxu1 %v5370_v1 }
 0xa52   :  { %4699 = vmatprep.subr.bf16.mxu0 %v5371_v3  ;;  %4721 = vmatprep.subr.bf16.mxu1 %v5372_v4 }
 0xa55   :  { %4700 = vmatpush3.bf16.msra.mxu0 %v5373_v5  ;;  %4722 = vmatpush3.bf16.msra.mxu1 %v5374_v6 }
 0xa56   :  { %4701 = vmatprep.subr.bf16.mxu0 %v5375_v7  ;;  %4723 = vmatprep.subr.bf16.mxu1 %v5376_v8 }
 0xa59   :  { %4702 = vmatpush3.bf16.msra.mxu0 %v5377_v9  ;;  %4724 = vmatpush3.bf16.msra.mxu1 %v5378_v10 }
 0xa5a   :  { %5047 = vmatprep.subr.bf16.mxu0 %v5597_v2  ;;  %5067 = vmatprep.subr.bf16.mxu1 %v5597_v2 }
 0xb0f   :  { %v6228_v11 = vpop.f32.mrb[20].mxu0  ;;  %v6230_v12 = vpop.f32.mrb[44].mxu1 }
 0xb10   :  { %v1637_v13 = vmul.f32 %v6228_v11, %v6228_v11  ;;  %v1639_v31 = vmul.f32 %v6230_v12, %v6230_v12  ;;  %v6236_v14 = vpop.f32.mrb[21].mxu0  ;;  %v6238_v15 = vpop.f32.mrb[45].mxu1 }
 0xb11   :  { %v1638_v16 = vmul.f32 %v6236_v14, %v6236_v14  ;;  %v1640_v17 = vmul.f32 %v6238_v15, %v6238_v15  ;;  %v6244_v18 = vpop.f32.mrb[22].mxu0  ;;  %v6246_v19 = vpop.f32.mrb[46].mxu1 }
 0xb12   :  { %v1645_v21 = vmul.f32 %v1637_v13, %v6228_v11  ;;  %v1647_v22 = vmul.f32 %v1639_v31, %v6230_v12  ;;  %v1641_v23 = vmul.f32 %v6244_v18, %v6244_v18  ;;  %v1643_v24 = vmul.f32 %v6246_v19, %v6246_v19  ;;  %v6254_v26 = vpop.f32.mrb[23].mxu0  ;;  %v6256_v28 = vpop.f32.mrb[47].mxu1 }
 0xb13   :  { %v1646_v30 = vmul.f32 %v1638_v16, %v6236_v14  ;;  %v1648_v32 = vmul.f32 %v1640_v17, %v6238_v15  ;;  %v1642_v33 = vmul.f32 %v6254_v26, %v6254_v26  ;;  %v1644_v44 = vmul.f32 %v6256_v28, %v6256_v28 }
 0xb14   :  { %v1653_v34 = vmul.f32 0.044715, %v1645_v21  ;;  %v1655_v35 = vmul.f32 0.044715, %v1647_v22  ;;  %v1649_v36 = vmul.f32 %v1641_v23, %v6244_v18  ;;  %v1651_v37 = vmul.f32 %v1643_v24, %v6246_v19 }
 0xb15   :  { %v1654_v39 = vmul.f32 0.044715, %v1646_v30  ;;  %v1656_v40 = vmul.f32 0.044715, %v1648_v32  ;;  %v1650_v42 = vmul.f32 %v1642_v33, %v6254_v26  ;;  %v1652_v25 = vmul.f32 %v1644_v44, %v6256_v28 }
 0xb16   :  { %v1661_v43 = vadd.f32 %v1653_v34, %v6228_v11  ;;  %v1663_v46 = vadd.f32 %v1655_v35, %v6230_v12  ;;  %v1657_v47 = vmul.f32 0.044715, %v1649_v36  ;;  %v1659_v29 = vmul.f32 0.044715, %v1651_v37 }
 0xb17   :  { %v1662_v48 = vadd.f32 %v1654_v39, %v6236_v14  ;;  %v1664_v27 = vadd.f32 %v1656_v40, %v6238_v15  ;;  %v1658_v49 = vmul.f32 0.044715, %v1650_v42  ;;  %v1660_v50 = vmul.f32 0.044715, %v1652_v25 }
 0xb18   :  { %v1669_v51 = vmul.f32 0.7978846, %v1661_v43  ;;  %v1671_v52 = vmul.f32 0.7978846, %v1663_v46  ;;  %v1665_v53 = vadd.f32 %v1657_v47, %v6244_v18  ;;  %v1667_v54 = vadd.f32 %v1659_v29, %v6246_v19 }
 0xb19   :  { %v1670_v55 = vmul.f32 0.7978846, %v1662_v48  ;;  %v1672_v56 = vmul.f32 0.7978846, %v1664_v27  ;;  %v1666_v57 = vadd.f32 %v1658_v49, %v6254_v26  ;;  %v1668_v58 = vadd.f32 %v1660_v50, %v6256_v28 }
 0xb1a   :  { %5539 = vtanh.f32 %v1669_v51  ;;  %v1673_v59 = vmul.f32 0.7978846, %v1665_v53  ;;  %v1675_v60 = vmul.f32 0.7978846, %v1667_v54 }
 0xb1b   :  { %5541 = vtanh.f32 %v1671_v52  ;;  %v1674_v61 = vmul.f32 0.7978846, %v1666_v57  ;;  %v1676_v62 = vmul.f32 0.7978846, %v1668_v58  ;;  %v5380_v57 = vld [vmem:[%s6911_s4 + $0x80] sm:$0xff]  }
 0xb1c   :  { %5543 = vtanh.f32 %v1670_v55 }
 0xb1d   :  { %5545 = vtanh.f32 %v1672_v56  ;;  %v5379_v56 = vld [vmem:[%s6910_s3 + $0x80] sm:$0xff]  }
 0xb1e   :  { %5547 = vtanh.f32 %v1673_v59 }
 0xb1f   :  { %5549 = vtanh.f32 %v1675_v60 }
 0xb20   :  { %5551 = vtanh.f32 %v1674_v61 }
 0xb21   :  { %5553 = vtanh.f32 %v1676_v62 }
 0xb24   :  { %v5540_v63 = vpop.eup %5539 }
 0xb25   :  { %v5542_v0 = vpop.eup %5541  ;;  %v1685_v1 = vadd.f32 1.0, %v5540_v63 }
 0xb26   :  { %v5544_v3 = vpop.eup %5543  ;;  %v1687_v4 = vadd.f32 1.0, %v5542_v0 }
 0xb27   :  { %v5546_v5 = vpop.eup %5545  ;;  %v1686_v6 = vadd.f32 1.0, %v5544_v3  ;;  %v1693_v10 = vmul.f32 0.5, %v1685_v1  ;;  %v5383_v3 = vld [vmem:[%s6910_s3 + $0x90] sm:$0xff]  }
 0xb28   :  { %v5548_v7 = vpop.eup %5547  ;;  %v1688_v8 = vadd.f32 1.0, %v5546_v5  ;;  %v1695_v16 = vmul.f32 0.5, %v1687_v4  ;;  %v5384_v4 = vld [vmem:[%s6911_s4 + $0x90] sm:$0xff]   ;;  %v5385_v5 = vld [vmem:[%s6910_s3 + $0x98] sm:$0xff]  }
 0xb29   :  { %v5550_v9 = vpop.eup %5549  ;;  %v1689_v13 = vadd.f32 1.0, %v5548_v7  ;;  %v1694_v22 = vmul.f32 0.5, %v1686_v6  ;;  %v1701_v44 = vmul.f32 %v1693_v10, %v6228_v11  ;;  %v5386_v6 = vld [vmem:[%s6911_s4 + $0x98] sm:$0xff]   ;;  %v5387_v7 = vld [vmem:[%s6910_s3 + $0xa0] sm:$0xff]   ;;  %v5390_v10 = vld [vmem:[%s6911_s4 + $0xa8] sm:$0xff]  }
 0xb2a   :  { %v5552_v31 = vpop.eup %5551  ;;  %v1691_v17 = vadd.f32 1.0, %v5550_v9  ;;  %v1696_v30 = vmul.f32 0.5, %v1688_v8  ;;  %v1703_v36 = vmul.f32 %v1695_v16, %v6230_v12  ;;  %v5388_v8 = vld [vmem:[%s6911_s4 + $0xa0] sm:$0xff]   ;;  %v5389_v9 = vld [vmem:[%s6910_s3 + $0xa8] sm:$0xff]   ;;  %v5393_v16 = vld [vmem:[%s6910_s3 + $0xb8] sm:$0xff]  }
 0xb2b   :  { %v5554_v21 = vpop.eup %5553  ;;  %v1697_v23 = vmul.f32 0.5, %v1689_v13  ;;  %v1690_v24 = vadd.f32 1.0, %v5552_v31  ;;  %v1702_v40 = vmul.f32 %v1694_v22, %v6236_v14  ;;  %v5391_v13 = vld [vmem:[%s6910_s3 + $0xb0] sm:$0xff]  }
 0xb2c   :  { %v1699_v32 = vmul.f32 0.5, %v1691_v17  ;;  %v1692_v33 = vadd.f32 1.0, %v5554_v21  ;;  %v1704_v43 = vmul.f32 %v1696_v30, %v6238_v15  ;;  %v5392_v31 = vld [vmem:[%s6911_s4 + $0xb0] sm:$0xff]   ;;  %v5394_v17 = vld [vmem:[%s6911_s4 + $0xb8] sm:$0xff]  }
 0xb2d   :  { %v1705_v34 = vmul.f32 %v1697_v23, %v6244_v18  ;;  %v1698_v35 = vmul.f32 0.5, %v1690_v24 }
 0xb2e   :  { %v1707_v37 = vmul.f32 %v1699_v32, %v6246_v19  ;;  %v1700_v39 = vmul.f32 0.5, %v1692_v33 }
 0xb2f   :  { %v1706_v42 = vmul.f32 %v1698_v35, %v6254_v26  ;;  %v1709_v25 = vpack.c.bf16 %v1705_v34, %v1701_v44  ;;  %v4263_v44 = vld [vmem:[%s6913_s1 + $0x1] ss:$0 sm:$0xff] }
 0xb30   :  { %v1708_v46 = vmul.f32 %v1700_v39, %v6256_v28  ;;  %v1711_v47 = vpack.c.bf16 %v1707_v37, %v1703_v36  ;;  %v4264_v39 = vld [vmem:[%s6914_s2 + $0x1] ss:$0 sm:$0xff] }
 0xb31   :  { %v1710_v29 = vpack.c.bf16 %v1706_v42, %v1702_v40 }
 0xb32   :  { %v1712_v11 = vpack.c.bf16 %v1708_v46, %v1704_v43  ;;  %v5395_v43 = vld [vmem:[%s6912_s5 + $0x80] sm:$0xff]  }
 0xb33   :  { %2001 = vmatprep.mubr.bf16.mxu0 %v1710_v29  ;;  %v5397_v29 = vld [vmem:[%s6912_s5 + $0x90] sm:$0xff]  }
 0xb34   :  { %2042 = vmatprep.mubr.bf16.mxu1 %v1712_v11  ;;  %2002 = vmatmul.mubr.bf16.vlgmr.msra.gmra.mrb[24].mxu0 %v1709_v25  ;;  %v5398_v11 = vld [vmem:[%s6912_s5 + $0x98] sm:$0xff]  }
 0xb35   :  { %2043 = vmatmul.mubr.bf16.vlgmr.msra.gmra.mrb[48].mxu1 %v1711_v47  ;;  %5063 = vmatprep.mubr.msk.bf16.mxu0 %vm5598_vm0, %v5597_v2  ;;  %v5396_v47 = vld [vmem:[%s6912_s5 + $0x88] sm:$0xff]  }
 0xb36   :  { %5083 = vmatprep.mubr.msk.bf16.mxu1 %vm5598_vm0, %v5597_v2  ;;  %5048 = vmatpush3.bf16.msra.mxu0 %v5379_v56  ;;  %v5413_v56 = vld [vmem:[%s6912_s5 + $0xd0] sm:$0xff]  }
 0xb37   :  { %5068 = vmatpush3.bf16.msra.mxu1 %v5380_v57  ;;  %5049 = vmatprep.subr.bf16.mxu0 %v5597_v2  ;;  %v5414_v57 = vld [vmem:[%s6912_s5 + $0xd8] sm:$0xff]  }
 0xb38   :  { %5069 = vmatprep.subr.bf16.mxu1 %v5597_v2 }
 0xc07   :  { %v4703_v12 = vpop.f32.mrb[24].mxu0 }
 0xc08   :  { %v4725_v14 = vpop.f32.mrb[48].mxu1  ;;  %v4704_v18 = vpop.f32.mrb[25].mxu0 }
 0xc09   :  { %v4705_v19 = vadd.f32 %v4704_v18, %v4703_v12  ;;  %v4726_v15 = vpop.f32.mrb[49].mxu1  ;;  %v4706_v26 = vpop.f32.mrb[26].mxu0  ;;  %v5399_v12 = vld [vmem:[%s6912_s5 + $0xa0] sm:$0xff]   ;;  %v5401_v18 = vld [vmem:[%s6912_s5 + $0xb0] sm:$0xff]  }
 0xc0a   :  { %v4727_v28 = vadd.f32 %v4726_v15, %v4725_v14  ;;  %v4728_v48 = vpop.f32.mrb[50].mxu1  ;;  %v4707_v27 = vpop.f32.mrb[27].mxu0  ;;  %v5400_v14 = vld [vmem:[%s6912_s5 + $0xa8] sm:$0xff]   ;;  %v5403_v15 = vld [vmem:[%s6910_s3 + $0xc0] sm:$0xff]  }
 0xc0b   :  { %v4708_v49 = vadd.f32 %v4707_v27, %v4706_v26  ;;  %v4729_v50 = vpop.f32.mrb[51].mxu1  ;;  %v5404_v26 = vld [vmem:[%s6910_s3 + $0xc8] sm:$0xff]   ;;  %v5407_v27 = vld [vmem:[%s6910_s3 + $0xe0] sm:$0xff]  }
 0xc0c   :  { %v2045_v51 = vadd.f32 %v4727_v28, %v4705_v19  ;;  %v4730_v52 = vadd.f32 %v4729_v50, %v4728_v48  ;;  %v5402_v19 = vld [vmem:[%s6912_s5 + $0xb8] sm:$0xff]   ;;  %v5405_v28 = vld [vmem:[%s6910_s3 + $0xd0] sm:$0xff]  }
 0xc0d   :  { %v5406_v48 = vld [vmem:[%s6910_s3 + $0xd8] sm:$0xff]   ;;  %v5409_v50 = vld [vmem:[%s6910_s3 + $0xf0] sm:$0xff]  }
 0xc0e   :  { %v2048_v53 = vadd.f32 %v4730_v52, %v4708_v49  ;;  %v6289_v54 = vadd.f32 %v2045_v51, %v6005_v41  ;;  %v5381_v41 = vld [vmem:[%s6910_s3 + $0x88] sm:$0xff]   ;;  %v5410_v51 = vld [vmem:[%s6910_s3 + $0xf8] sm:$0xff]   ;;  %v5411_v52 = vld [vmem:[%s6912_s5 + $0xc0] sm:$0xff]  }
 0xc0f   :  { %5050 = vmatpush3.bf16.msra.mxu0 %v5381_v41  ;;  %v5408_v49 = vld [vmem:[%s6910_s3 + $0xe8] sm:$0xff]   ;;  %v5415_v41 = vld [vmem:[%s6912_s5 + $0xe0] sm:$0xff]  }
 0xc10   :  { %2057 = vadd.xlane.f32.xlu0 %v6289_v54  ;;  %v6293_v55 = vadd.f32 %v2048_v53, %v6010_v45  ;;  %v5382_v45 = vld [vmem:[%s6911_s4 + $0x88] sm:$0xff]   ;;  %5051 = vmatprep.subr.bf16.mxu0 %v5597_v2 }
 0xc11   :  { %5070 = vmatpush3.bf16.msra.mxu1 %v5382_v45  ;;  %v5412_v53 = vld [vmem:[%s6912_s5 + $0xc8] sm:$0xff]  }
 0xc12   :  { %2059 = vadd.xlane.f32.xlu1 %v6293_v55  ;;  %5071 = vmatprep.subr.bf16.mxu1 %v5597_v2  ;;  %v5416_v45 = vld [vmem:[%s6912_s5 + $0xe8] sm:$0xff]  }
 0xc13   :  { %5052 = vmatpush3.bf16.msra.mxu0 %v5383_v3 }
 0xc14   :  { %5053 = vmatprep.subr.bf16.mxu0 %v5597_v2 }
 0xc15   :  { %5072 = vmatpush3.bf16.msra.mxu1 %v5384_v4 }
 0xc16   :  { %5073 = vmatprep.subr.bf16.mxu1 %v5597_v2 }
 0xc17   :  { %5054 = vmatpush3.bf16.msra.mxu0 %v5385_v5 }
 0xc18   :  { %5055 = vmatprep.subr.bf16.mxu0 %v5597_v2 }
 0xc19   :  { %5074 = vmatpush3.bf16.msra.mxu1 %v5386_v6 }
 0xc1a   :  { %5075 = vmatprep.subr.bf16.mxu1 %v5597_v2 }
 0xc1b   :  { %5056 = vmatpush3.bf16.msra.mxu0 %v5387_v7 }
 0xc1c   :  { %5057 = vmatprep.subr.bf16.mxu0 %v5597_v2 }
 0xc1d   :  { %5076 = vmatpush3.bf16.msra.mxu1 %v5388_v8 }
 0xc1e   :  { %5077 = vmatprep.subr.bf16.mxu1 %v5597_v2 }
 0xc1f   :  { %5058 = vmatpush3.bf16.msra.mxu0 %v5389_v9 }
 0xc20   :  { %5059 = vmatprep.subr.bf16.mxu0 %v5597_v2 }
 0xc21   :  { %5078 = vmatpush3.bf16.msra.mxu1 %v5390_v10 }
 0xc22   :  { %5079 = vmatprep.subr.bf16.mxu1 %v5597_v2 }
 0xc23   :  { %5060 = vmatpush3.bf16.msra.mxu0 %v5391_v13 }
 0xc24   :  { %5061 = vmatprep.subr.bf16.mxu0 %v5597_v2 }
 0xc25   :  { %5080 = vmatpush3.bf16.msra.mxu1 %v5392_v31 }
 0xc26   :  { %5081 = vmatprep.subr.bf16.mxu1 %v5597_v2 }
 0xc27   :  { %5062 = vmatpush3.bf16.msra.mxu0 %v5393_v16 }
 0xc28   :  { %5087 = vmatprep.subr.bf16.mxu0 %v5597_v2 }
 0xc29   :  { %5082 = vmatpush3.bf16.msra.mxu1 %v5394_v17 }
 0xc2a   :  { %5107 = vmatprep.subr.bf16.mxu1 %v5597_v2 }
 0xc9d   :  { %v2058_v58 = vpop.xlane.xlu0 %2057 }
 0xc9e   :  { %v2061_v59 = vmul.f32 0.0078125, %v2058_v58  ;;  %v5417_v58 = vld [vmem:[%s6912_s5 + $0xf0] sm:$0xff]  }
 0xc9f   :  { %v2060_v60 = vpop.xlane.xlu1 %2059 }
 0xca0   :  { %v2063_v61 = vsub.f32 %v6289_v54, %v2061_v59  ;;  %v2062_v62 = vmul.f32 0.0078125, %v2060_v60  ;;  %v5418_v59 = vld [vmem:[%s6912_s5 + $0xf8] sm:$0xff]  }
 0xca2   :  { %v2064_v63 = vsub.f32 %v6293_v55, %v2062_v62  ;;  %v2065_v0 = vmul.f32 %v2063_v61, %v2063_v61 }
 0xca4   :  { %2067 = vadd.xlane.f32.xlu0 %v2065_v0  ;;  %v2066_v1 = vmul.f32 %v2064_v63, %v2064_v63 }
 0xca6   :  { %2069 = vadd.xlane.f32.xlu1 %v2066_v1 }
 0xd31   :  { %v2068_v21 = vpop.xlane.xlu0 %2067 }
 0xd32   :  { %v2071_v22 = vmul.f32 0.0078125, %v2068_v21 }
 0xd33   :  { %v2070_v23 = vpop.xlane.xlu1 %2069 }
 0xd34   :  { %v2073_v24 = vadd.f32 1e-06, %v2071_v22  ;;  %v2072_v30 = vmul.f32 0.0078125, %v2070_v23 }
 0xd36   :  { %5555 = vrsqrt.f32 %v2073_v24  ;;  %v2074_v32 = vadd.f32 1e-06, %v2072_v30 }
 0xd38   :  { %5557 = vrsqrt.f32 %v2074_v32 }
 0xd40   :  { %v5556_v33 = vpop.eup %5555 }
 0xd41   :  { %v2077_v34 = vmul.f32 %v5556_v33, %v2063_v61 }
 0xd42   :  { %v5558_v35 = vpop.eup %5557 }
 0xd43   :  { %v2085_v36 = vmul.f32 %v4263_v44, %v2077_v34  ;;  %v2078_v37 = vmul.f32 %v5558_v35, %v2064_v63 }
 0xd45   :  { %v2086_v40 = vmul.f32 %v4263_v44, %v2078_v37  ;;  %v2093_v42 = vadd.f32 %v4264_v39, %v2085_v36 }
 0xd47   :  { %v2094_v25 = vadd.f32 %v4264_v39, %v2086_v40 }
 0xd49   :  { %v6371_v46 = vpack.c.bf16 %v2094_v25, %v2093_v42 }
 0xd4b   :  { %5064 = vmatmul.mubr.bf16.vlgmr.msra.gmra.mrb[28].mxu0 %v6371_v46  ;;  %5084 = vmatmul.mubr.bf16.vlgmr.msra.gmra.mrb[52].mxu1 %v6371_v46 }
 0xd4c   :  { %5088 = vmatpush3.bf16.msra.mxu0 %v5395_v43  ;;  %5103 = vmatprep.mubr.msk.bf16.mxu0 %vm5598_vm0, %v5597_v2 }
 0xd4d   :  { %5089 = vmatprep.subr.bf16.mxu0 %v5597_v2  ;;  %5109 = vmatprep.mubr.msk.bf16.mxu1 %vm5598_vm0, %v5597_v2 }
 0xd50   :  { %5090 = vmatpush3.bf16.msra.mxu0 %v5396_v47 }
 0xd51   :  { %5091 = vmatprep.subr.bf16.mxu0 %v5597_v2 }
 0xd54   :  { %5092 = vmatpush3.bf16.msra.mxu0 %v5397_v29 }
 0xd55   :  { %5093 = vmatprep.subr.bf16.mxu0 %v5597_v2 }
 0xd58   :  { %5094 = vmatpush3.bf16.msra.mxu0 %v5398_v11 }
 0xd59   :  { %5095 = vmatprep.subr.bf16.mxu0 %v5597_v2 }
 0xd5c   :  { %5096 = vmatpush3.bf16.msra.mxu0 %v5399_v12 }
 0xd5d   :  { %5097 = vmatprep.subr.bf16.mxu0 %v5597_v2 }
 0xd60   :  { %5098 = vmatpush3.bf16.msra.mxu0 %v5400_v14 }
 0xd61   :  { %5099 = vmatprep.subr.bf16.mxu0 %v5597_v2 }
 0xd64   :  { %5100 = vmatpush3.bf16.msra.mxu0 %v5401_v18 }
 0xd65   :  { %5101 = vmatprep.subr.bf16.mxu0 %v5597_v2 }
 0xd68   :  { %5102 = vmatpush3.bf16.msra.mxu0 %v5402_v19 }
 0xd69   :  { %5131 = vmatprep.subr.bf16.mxu0 %v5597_v2 }
 0xd6b   :  { %5104 = vmatmul.mubr.bf16.vlgmr.msra.gmra.mrb[32].mxu0 %v6371_v46 }
 0xd6c   :  { %5132 = vmatpush3.bf16.msra.mxu0 %v5403_v15  ;;  %5147 = vmatprep.mubr.msk.bf16.mxu0 %vm5598_vm0, %v5597_v2 }
 0xd6d   :  { %5133 = vmatprep.subr.bf16.mxu0 %v5597_v2 }
 0xd70   :  { %5134 = vmatpush3.bf16.msra.mxu0 %v5404_v26 }
 0xd71   :  { %5135 = vmatprep.subr.bf16.mxu0 %v5597_v2 }
 0xd74   :  { %5136 = vmatpush3.bf16.msra.mxu0 %v5405_v28 }
 0xd75   :  { %5137 = vmatprep.subr.bf16.mxu0 %v5597_v2 }
 0xd78   :  { %5138 = vmatpush3.bf16.msra.mxu0 %v5406_v48 }
 0xd79   :  { %5139 = vmatprep.subr.bf16.mxu0 %v5597_v2 }
 0xd7c   :  { %5140 = vmatpush3.bf16.msra.mxu0 %v5407_v27 }
 0xd7d   :  { %5141 = vmatprep.subr.bf16.mxu0 %v5597_v2 }
 0xd80   :  { %5142 = vmatpush3.bf16.msra.mxu0 %v5408_v49 }
 0xd81   :  { %5143 = vmatprep.subr.bf16.mxu0 %v5597_v2 }
 0xd84   :  { %5144 = vmatpush3.bf16.msra.mxu0 %v5409_v50 }
 0xd85   :  { %5145 = vmatprep.subr.bf16.mxu0 %v5597_v2 }
 0xd88   :  { %5146 = vmatpush3.bf16.msra.mxu0 %v5410_v51 }
 0xd89   :  { %5171 = vmatprep.subr.bf16.mxu0 %v5597_v2 }
 0xd8b   :  { %5148 = vmatmul.mubr.bf16.vlgmr.msra.gmra.mrb[36].mxu0 %v6371_v46 }
 0xd8c   :  { %5172 = vmatpush3.bf16.msra.mxu0 %v5411_v52  ;;  %5187 = vmatprep.mubr.msk.bf16.mxu0 %vm5598_vm0, %v5597_v2 }
 0xd8d   :  { %5173 = vmatprep.subr.bf16.mxu0 %v5597_v2 }
 0xd90   :  { %5174 = vmatpush3.bf16.msra.mxu0 %v5412_v53 }
 0xd91   :  { %5175 = vmatprep.subr.bf16.mxu0 %v5597_v2 }
 0xd94   :  { %5176 = vmatpush3.bf16.msra.mxu0 %v5413_v56 }
 0xd95   :  { %5177 = vmatprep.subr.bf16.mxu0 %v5597_v2 }
 0xd98   :  { %5178 = vmatpush3.bf16.msra.mxu0 %v5414_v57 }
 0xd99   :  { %5179 = vmatprep.subr.bf16.mxu0 %v5597_v2 }
 0xd9c   :  { %5180 = vmatpush3.bf16.msra.mxu0 %v5415_v41 }
 0xd9d   :  { %5181 = vmatprep.subr.bf16.mxu0 %v5597_v2 }
 0xda0   :  { %5182 = vmatpush3.bf16.msra.mxu0 %v5416_v45 }
 0xda1   :  { %5183 = vmatprep.subr.bf16.mxu0 %v5597_v2 }
 0xda4   :  { %5184 = vmatpush3.bf16.msra.mxu0 %v5417_v58 }
 0xda5   :  { %5185 = vmatprep.subr.bf16.mxu0 %v5597_v2 }
 0xda8   :  { %5186 = vmatpush3.bf16.msra.mxu0 %v5418_v59 }
 0xda9   :  { %5215 = vmatprep.subr.bf16.mxu0 %v5597_v2 }
 0xdab   :  { %5188 = vmatmul.mubr.bf16.vlgmr.msra.gmra.mrb[40].mxu0 %v6371_v46 }
 0xdac   :  { %5223 = vmatprep.mubr.msk.bf16.mxu0 %vm5598_vm0, %v5597_v2 }
 0xe1e   :  { %v2229_v60 = vpop.f32.mrb[28].mxu0  ;;  %v2318_v61 = vpop.f32.mrb[52].mxu1 }
 0xe1f   :  { %v2416_v62 = vpack.c.bf16 %v2318_v61, %v2318_v61  ;;  %v5065_v63 = vpop.f32.mrb[29].mxu0  ;;  %v5085_v0 = vpop.f32.mrb[53].mxu1  ;;  %v2414_v8 = vpack.c.bf16 %v2229_v60, %v2229_v60 }
 0xe20   :  { %v2232_v1 = vpop.f32.mrb[30].mxu0  ;;  %v2321_v3 = vpop.f32.mrb[54].mxu1  ;;  %v5419_v63 = vld [vmem:[%s6911_s4 + $0xc0] sm:$0xff]  }
 0xe21   :  { %v2424_v4 = vsel %vm410_vm1, %v2416_v62, 0  ;;  %v5066_v5 = vpop.f32.mrb[31].mxu0  ;;  %v5086_v6 = vpop.f32.mrb[55].mxu1  ;;  %v2417_v7 = vpack.c.bf16 %v2321_v3, %v2321_v3  ;;  %v2415_v10 = vpack.c.bf16 %v2232_v1, %v2232_v1  ;;  %v5420_v1 = vld [vmem:[%s6911_s4 + $0xc8] sm:$0xff]   ;;  %v5421_v3 = vld [vmem:[%s6911_s4 + $0xd0] sm:$0xff]  }
 0xe22   :  { %5108 = vmatpush3.bf16.xpose.msra.mxu1 %v2424_v4  ;;  %v5422_v4 = vld [vmem:[%s6911_s4 + $0xd8] sm:$0xff]   ;;  %v5423_v5 = vld [vmem:[%s6911_s4 + $0xe0] sm:$0xff]   ;;  %v5424_v6 = vld [vmem:[%s6911_s4 + $0xe8] sm:$0xff]  }
 0xe23   :  { %5113 = vmatprep.subr.bf16.mxu1 %v5597_v2  ;;  %v2470_v9 = vsel %vm410_vm1, %v2417_v7, 0  ;;  %v5425_v7 = vld [vmem:[%s6911_s4 + $0xf0] sm:$0xff]  }
 0xe29   :  { %5110 = vmatmul.mubr.msk.bf16.vlgmr.msra.gmra.mrb[56].mxu1 %vm410_vm1, %v2414_v8  ;;  %v5426_v8 = vld [vmem:[%s6911_s4 + $0xf8] sm:$0xff]  }
 0xe2a   :  { %5114 = vmatpush3.bf16.xpose.msra.mxu1 %v2470_v9  ;;  %5115 = vmatprep.mubr.msk.bf16.mxu1 %vm5598_vm0, %v5597_v2 }
 0xe2b   :  { %5119 = vmatprep.subr.bf16.mxu1 %v5597_v2 }
 0xe31   :  { %5116 = vmatmul.mubr.msk.bf16.vlgmr.msra.gmra.mrb[60].mxu1 %vm410_vm1, %v2415_v10 }
 0xe32   :  { %5121 = vmatprep.mubr.msk.bf16.mxu1 %vm5598_vm0, %v5597_v2 }
 0xe3e   :  { %v2407_v13 = vpop.f32.mrb[32].mxu0 }
 0xe3f   :  { %v2418_v31 = vpack.c.bf16 %v2407_v13, %v2407_v13  ;;  %v5105_v16 = vpop.f32.mrb[33].mxu0 }
 0xe40   :  { %v2410_v17 = vpop.f32.mrb[34].mxu0 }
 0xe41   :  { %v2544_v21 = vsel %vm535_vm2, %v2418_v31, 0  ;;  %v5106_v22 = vpop.f32.mrb[35].mxu0  ;;  %v2419_v45 = vpack.c.bf16 %v2410_v17, %v2410_v17 }
 0xe42   :  { %5120 = vmatpush3.bf16.msra.mxu1 %v2544_v21 }
 0xe43   :  { %5125 = vmatprep.subr.bf16.mxu1 %v5597_v2  ;;  %v2590_v60 = vsel %vm535_vm2, %v2419_v45, 0 }
 0xe5e   :  { %v6493_v23 = vpop.f32.mrb[36].mxu0 }
 0xe5f   :  { %v5149_v24 = vpop.f32.mrb[37].mxu0 }
 0xe60   :  { %v6495_v30 = vpop.f32.mrb[38].mxu0 }
 0xe61   :  { %v5150_v32 = vpop.f32.mrb[39].mxu0 }
 0xe7e   :  { %v6497_v33 = vpop.f32.mrb[40].mxu0 }
 0xe7f   :  { %v5189_v44 = vpop.f32.mrb[41].mxu0 }
 0xe80   :  { %v6499_v34 = vpop.f32.mrb[42].mxu0 }
 0xe81   :  { %v5190_v35 = vpop.f32.mrb[43].mxu0 }
 0xefc   :  { %v2460_v36 = vpop.f32.mrb[56].mxu1 }
 0xefd   :  { %v2512_v37 = vmul.f32 0.125, %v2460_v36  ;;  %v5111_v39 = vpop.f32.mrb[57].mxu1 }
 0xefe   :  { %v2463_v40 = vpop.f32.mrb[58].mxu1 }
 0xeff   :  { %v5112_v42 = vpop.f32.mrb[59].mxu1  ;;  %v2514_v25 = vadd.f32 %v2512_v37, %v5876_v38  ;;  %v2960_v40 = vpack.c.bf16 %v6493_v23, %v6493_v23 }
 0xf01   :  { %v2516_v43 = vsel %vm507_vm4, %v2514_v25, -inf }
 0xf02   :  { %2517 = vmax.xlane.f32.xlu0 %v2516_v43  ;;  %v2961_v43 = vpack.c.bf16 %v6495_v30, %v6495_v30 }
 0xf04   :  { %v2506_v47 = vpop.f32.mrb[60].mxu1 }
 0xf05   :  { %v2513_v29 = vmul.f32 0.125, %v2506_v47  ;;  %v5117_v11 = vpop.f32.mrb[61].mxu1 }
 0xf06   :  { %v2509_v12 = vpop.f32.mrb[62].mxu1 }
 0xf07   :  { %v5118_v14 = vpop.f32.mrb[63].mxu1  ;;  %v2515_v18 = vadd.f32 %v2513_v29, %v5876_v38 }
 0xf09   :  { %v2519_v19 = vsel %vm507_vm4, %v2515_v18, -inf }
 0xf0a   :  { %2520 = vmax.xlane.f32.xlu1 %v2519_v19 }
 0xf8f   :  { %v2518_v15 = vpop.xlane.xlu0 %2517 }
 0xf90   :  { %v2522_v26 = vsub.f32 %v2514_v25, %v2518_v15  ;;  %v2964_v25 = vpack.c.bf16 %v6497_v33, %v6497_v33 }
 0xf92   :  { %v2524_v28 = vmul.f32 1.442695, %v2522_v26  ;;  %v3090_v47 = vsel %vm535_vm2, %v2964_v25, 0 }
 0xf94   :  { %5559 = vpow2.f32 %v2524_v28 }
 0xf97   :  { %v2521_v48 = vpop.xlane.xlu1 %2520 }
 0xf98   :  { %v2523_v27 = vsub.f32 %v2515_v18, %v2521_v48 }
 0xf9a   :  { %v2526_v49 = vmul.f32 1.442695, %v2523_v27 }
 0xf9c   :  { %5561 = vpow2.f32 %v2526_v49 }
 0xf9e   :  { %v5560_v50 = vpop.eup %5559 }
 0xf9f   :  { %v2528_v51 = vsel %vm507_vm4, %v5560_v50, 0.0 }
 0xfa0   :  { %2529 = vadd.xlane.f32.xlu0 %v2528_v51 }
 0xfa6   :  { %v5562_v52 = vpop.eup %5561 }
 0xfa7   :  { %v2531_v53 = vsel %vm507_vm4, %v5562_v52, 0.0 }
 0xfa8   :  { %2532 = vadd.xlane.f32.xlu1 %v2531_v53 }
0x102d   :  { %v2530_v56 = vpop.xlane.xlu0 %2529 }
0x102e   :  { %5563 = vrcp.f32 %v2530_v56 }
0x1035   :  { %v2533_v57 = vpop.xlane.xlu1 %2532 }
0x1036   :  { %5565 = vrcp.f32 %v2533_v57 }
0x1038   :  { %v5564_v41 = vpop.eup %5563 }
0x1039   :  { %v2536_v58 = vmul.f32 %v5564_v41, %v5560_v50 }
0x103b   :  { %v2538_v59 = vpack.c.bf16 %v2536_v58, %v2536_v58 }
0x103d   :  { %5122 = vmatmul.mubr.msk.bf16.vlgmr.msra.gmra.mrb[64].mxu1 %vm507_vm4, %v2538_v59 }
0x103e   :  { %5126 = vmatpush3.bf16.msra.mxu1 %v2590_v60  ;;  %5127 = vmatprep.mubr.msk.bf16.mxu1 %vm5598_vm0, %v5597_v2 }
0x103f   :  { %5151 = vmatprep.subr.bf16.mxu1 %v5597_v2 }
0x1040   :  { %v5566_v61 = vpop.eup %5565 }
0x1041   :  { %v2537_v62 = vmul.f32 %v5566_v61, %v5562_v52 }
0x1043   :  { %v2539_v0 = vpack.c.bf16 %v2537_v62, %v2537_v62  ;;  %v2965_v62 = vpack.c.bf16 %v6499_v34, %v6499_v34  ;;  %v5428_v34 = vld [vmem:[%s6915_s6 + $0x48] sm:$0xff]  }
0x1045   :  { %5128 = vmatmul.mubr.msk.bf16.vlgmr.msra.gmra.mrb[68].mxu1 %vm507_vm4, %v2539_v0 }
0x1046   :  { %5152 = vmatpush3.bf16.msra.mxu1 %v5419_v63  ;;  %5167 = vmatprep.mubr.msk.bf16.mxu1 %vm5598_vm0, %v5597_v2 }
0x1047   :  { %5153 = vmatprep.subr.bf16.mxu1 %v5597_v2 }
0x104a   :  { %5154 = vmatpush3.bf16.msra.mxu1 %v5420_v1  ;;  %v3136_v1 = vsel %vm535_vm2, %v2965_v62, 0  ;;  %v5470_v62 = vld [vmem:[%s6916_s9 + $0x1ac] ss:$16 sps:$4 sm:$0xff]  }
0x104b   :  { %5155 = vmatprep.subr.bf16.mxu1 %v5597_v2 }
0x104e   :  { %5156 = vmatpush3.bf16.msra.mxu1 %v5421_v3 }
0x104f   :  { %5157 = vmatprep.subr.bf16.mxu1 %v5597_v2 }
0x1052   :  { %5158 = vmatpush3.bf16.msra.mxu1 %v5422_v4 }
0x1053   :  { %5159 = vmatprep.subr.bf16.mxu1 %v5597_v2 }
0x1056   :  { %5160 = vmatpush3.bf16.msra.mxu1 %v5423_v5  ;;  %v5427_v5 = vld [vmem:[%s6915_s6 + $0x40] sm:$0xff]  }
0x1057   :  { %5161 = vmatprep.subr.bf16.mxu1 %v5597_v2 }
0x105a   :  { %5162 = vmatpush3.bf16.msra.mxu1 %v5424_v6 }
0x105b   :  { %5163 = vmatprep.subr.bf16.mxu1 %v5597_v2 }
0x105e   :  { %5164 = vmatpush3.bf16.msra.mxu1 %v5425_v7  ;;  %v5429_v7 = vld [vmem:[%s6915_s6 + $0x50] sm:$0xff]  }
0x105f   :  { %5165 = vmatprep.subr.bf16.mxu1 %v5597_v2 }
0x1062   :  { %5166 = vmatpush3.bf16.msra.mxu1 %v5426_v8  ;;  %v5430_v8 = vld [vmem:[%s6915_s6 + $0x58] sm:$0xff]  }
0x1063   :  { %5191 = vmatprep.subr.bf16.mxu1 %v5597_v2 }
0x1065   :  { %5168 = vmatmul.mubr.bf16.vlgmr.msra.gmra.mrb[72].mxu1 %v6371_v46 }
0x1066   :  { %5193 = vmatprep.mubr.msk.bf16.mxu1 %vm5598_vm0, %v5597_v2 }
0x1110   :  { %v6550_v9 = vpop.f32.mrb[64].mxu1 }
0x1111   :  { %v5123_v10 = vpop.f32.mrb[65].mxu1 }
0x1112   :  { %v2583_v13 = vpop.f32.mrb[66].mxu1  ;;  %v5432_v10 = vld [vmem:[%s6915_s6 + $0x68] sm:$0xff]  }
0x1113   :  { %v5124_v31 = vpop.f32.mrb[67].mxu1  ;;  %v5433_v13 = vld [vmem:[%s6915_s6 + $0x70] sm:$0xff]  }
0x1118   :  { %v6552_v16 = vpop.f32.mrb[68].mxu1 }
0x1119   :  { %v2632_v17 = vpack.c.bf16 %v6552_v16, %v6550_v9  ;;  %v5129_v21 = vpop.f32.mrb[69].mxu1  ;;  %v5434_v9 = vld [vmem:[%s6915_s6 + $0x78] sm:$0xff]  }
0x111a   :  { %v2629_v22 = vpop.f32.mrb[70].mxu1 }
0x111b   :  { %v5130_v24 = vpop.f32.mrb[71].mxu1 }
0x1138   :  { %v2864_v32 = vpop.f32.mrb[72].mxu1 }
0x1139   :  { %v2962_v44 = vpack.c.bf16 %v2864_v32, %v2864_v32  ;;  %v5169_v35 = vpop.f32.mrb[73].mxu1 }
0x113a   :  { %v2867_v46 = vpop.f32.mrb[74].mxu1 }
0x113b   :  { %v2970_v36 = vsel %vm410_vm1, %v2962_v44, 0  ;;  %v5170_v37 = vpop.f32.mrb[75].mxu1  ;;  %v2963_v39 = vpack.c.bf16 %v2867_v46, %v2867_v46 }
0x113c   :  { %5192 = vmatpush3.bf16.xpose.msra.mxu1 %v2970_v36 }
0x113d   :  { %5197 = vmatprep.subr.bf16.mxu1 %v5597_v2  ;;  %v3016_v42 = vsel %vm410_vm1, %v2963_v39, 0 }
0x1143   :  { %5194 = vmatmul.mubr.msk.bf16.vlgmr.msra.gmra.mrb[76].mxu1 %vm410_vm1, %v2960_v40 }
0x1144   :  { %5198 = vmatpush3.bf16.xpose.msra.mxu1 %v3016_v42  ;;  %5199 = vmatprep.mubr.msk.bf16.mxu1 %vm5598_vm0, %v5597_v2 }
0x1145   :  { %5203 = vmatprep.subr.bf16.mxu1 %v5597_v2 }
0x114b   :  { %5200 = vmatmul.mubr.msk.bf16.vlgmr.msra.gmra.mrb[80].mxu1 %vm410_vm1, %v2961_v43 }
0x114c   :  { %5204 = vmatpush3.bf16.msra.mxu1 %v3090_v47  ;;  %5205 = vmatprep.mubr.msk.bf16.mxu1 %vm5598_vm0, %v5597_v2 }
0x114d   :  { %5209 = vmatprep.subr.bf16.mxu1 %v5597_v2 }
0x1216   :  { %v3006_v23 = vpop.f32.mrb[76].mxu1 }
0x1217   :  { %v3058_v29 = vmul.f32 0.125, %v3006_v23  ;;  %v5195_v11 = vpop.f32.mrb[77].mxu1 }
0x1218   :  { %v3009_v12 = vpop.f32.mrb[78].mxu1  ;;  %v5437_v11 = vld [vmem:[%s6916_s9 + $0x104] ss:$16 sps:$4 sm:$0xff]  }
0x1219   :  { %v5196_v14 = vpop.f32.mrb[79].mxu1  ;;  %v3060_v33 = vadd.f32 %v3058_v29, %v5876_v38  ;;  %v5443_v12 = vld [vmem:[%s6916_s9 + $0x124] ss:$16 sps:$4 sm:$0xff]  }
0x121a   :  { %v5446_v14 = vld [vmem:[%s6916_s9 + $0x12c] ss:$16 sps:$4 sm:$0xff]  }
0x121b   :  { %v3062_v18 = vsel %vm507_vm4, %v3060_v33, -inf }
0x121c   :  { %3063 = vmax.xlane.f32.xlu0 %v3062_v18  ;;  %v5444_v18 = vld [vmem:[%s6916_s9 + $0x128] ss:$16 sps:$4 sm:$0xff]  }
0x121e   :  { %v3052_v30 = vpop.f32.mrb[80].mxu1 }
0x121f   :  { %v3059_v19 = vmul.f32 0.125, %v3052_v30  ;;  %v5201_v15 = vpop.f32.mrb[81].mxu1 }
0x1220   :  { %v3055_v26 = vpop.f32.mrb[82].mxu1 }
0x1221   :  { %v5202_v28 = vpop.f32.mrb[83].mxu1  ;;  %v3061_v48 = vadd.f32 %v3059_v19, %v5876_v38  ;;  %v5431_v38 = vld [vmem:[%s6915_s6 + $0x60] sm:$0xff]  }
0x1222   :  { %5216 = vmatpush3.bf16.msra.mxu0 %v5431_v38  ;;  %v5464_v38 = vld [vmem:[%s6916_s9 + $0x18c] ss:$16 sps:$4 sm:$0xff]  }
0x1223   :  { %v3065_v27 = vsel %vm507_vm4, %v3061_v48, -inf  ;;  %5217 = vmatprep.subr.bf16.mxu0 %v5597_v2 }
0x1224   :  { %3066 = vmax.xlane.f32.xlu1 %v3065_v27 }
0x1226   :  { %5218 = vmatpush3.bf16.msra.mxu0 %v5432_v10 }
0x1227   :  { %5219 = vmatprep.subr.bf16.mxu0 %v5597_v2 }
0x122a   :  { %5220 = vmatpush3.bf16.msra.mxu0 %v5433_v13 }
0x122b   :  { %5221 = vmatprep.subr.bf16.mxu0 %v5597_v2 }
0x122e   :  { %5222 = vmatpush3.bf16.msra.mxu0 %v5434_v9 }
0x122f   :  { %3562 = vmatprep.subr.bf16.mxu0 %v5437_v11  ;;  %v5489_v11 = vld [vmem:[%s6919_s10 + $0x108] sm:$0xff]  }
0x12a9   :  { %v3064_v49 = vpop.xlane.xlu0 %3063 }
0x12aa   :  { %v3068_v50 = vsub.f32 %v3060_v33, %v3064_v49  ;;  %v5441_v33 = vld [vmem:[%s6916_s9 + $0x120] ss:$16 sps:$4 sm:$0xff]  }
0x12ac   :  { %v3070_v51 = vmul.f32 1.442695, %v3068_v50  ;;  %v5449_v50 = vld [vmem:[%s6916_s9 + $0x144] ss:$16 sps:$4 sm:$0xff]  }
0x12ae   :  { %5567 = vpow2.f32 %v3070_v51  ;;  %v5452_v51 = vld [vmem:[%s6916_s9 + $0x14c] ss:$16 sps:$4 sm:$0xff]  }
0x12b1   :  { %v3067_v52 = vpop.xlane.xlu1 %3066 }
0x12b2   :  { %v3069_v53 = vsub.f32 %v3061_v48, %v3067_v52  ;;  %v5447_v52 = vld [vmem:[%s6916_s9 + $0x140] ss:$16 sps:$4 sm:$0xff]  }
0x12b4   :  { %v3072_v56 = vmul.f32 1.442695, %v3069_v53  ;;  %v5450_v53 = vld [vmem:[%s6916_s9 + $0x148] ss:$16 sps:$4 sm:$0xff]  }
0x12b6   :  { %5569 = vpow2.f32 %v3072_v56  ;;  %v5455_v56 = vld [vmem:[%s6916_s9 + $0x164] ss:$16 sps:$4 sm:$0xff]  }
0x12b8   :  { %v5568_v57 = vpop.eup %5567 }
0x12b9   :  { %v3074_v41 = vsel %vm507_vm4, %v5568_v57, 0.0 }
0x12ba   :  { %3075 = vadd.xlane.f32.xlu0 %v3074_v41  ;;  %v5453_v41 = vld [vmem:[%s6916_s9 + $0x160] ss:$16 sps:$4 sm:$0xff]  }
0x12c0   :  { %v5570_v45 = vpop.eup %5569 }
0x12c1   :  { %v3077_v58 = vsel %vm507_vm4, %v5570_v45, 0.0 }
0x12c2   :  { %3078 = vadd.xlane.f32.xlu1 %v3077_v58  ;;  %v5461_v58 = vld [vmem:[%s6916_s9 + $0x184] ss:$16 sps:$4 sm:$0xff]  }
0x1347   :  { %v3076_v59 = vpop.xlane.xlu0 %3075 }
0x1348   :  { %5571 = vrcp.f32 %v3076_v59  ;;  %v5459_v59 = vld [vmem:[%s6916_s9 + $0x180] ss:$16 sps:$4 sm:$0xff]  }
0x134f   :  { %v3079_v60 = vpop.xlane.xlu1 %3078 }
0x1350   :  { %5573 = vrcp.f32 %v3079_v60  ;;  %v5462_v60 = vld [vmem:[%s6916_s9 + $0x188] ss:$16 sps:$4 sm:$0xff]  }
0x1352   :  { %v5572_v61 = vpop.eup %5571 }
0x1353   :  { %v3082_v63 = vmul.f32 %v5572_v61, %v5568_v57  ;;  %v5458_v57 = vld [vmem:[%s6916_s9 + $0x16c] ss:$16 sps:$4 sm:$0xff]   ;;  %v5467_v61 = vld [vmem:[%s6916_s9 + $0x1a4] ss:$16 sps:$4 sm:$0xff]  }
0x1355   :  { %v3084_v0 = vpack.c.bf16 %v3082_v63, %v3082_v63  ;;  %v5465_v63 = vld [vmem:[%s6916_s9 + $0x1a0] ss:$16 sps:$4 sm:$0xff]  }
0x1357   :  { %5206 = vmatmul.mubr.msk.bf16.vlgmr.msra.gmra.mrb[84].mxu1 %vm507_vm4, %v3084_v0  ;;  %v5468_v0 = vld [vmem:[%s6916_s9 + $0x1a8] ss:$16 sps:$4 sm:$0xff]  }
0x1358   :  { %5210 = vmatpush3.bf16.msra.mxu1 %v3136_v1  ;;  %5211 = vmatprep.mubr.msk.bf16.mxu1 %vm5598_vm0, %v5597_v2  ;;  %v5473_v1 = vld [vmem:[%s6916_s9 + $0x1c4] ss:$16 sps:$4 sm:$0xff]  }
0x1359   :  { %5227 = vmatprep.subr.bf16.mxu1 %v5597_v2 }
0x135a   :  { %v5574_v3 = vpop.eup %5573 }
0x135b   :  { %v3083_v4 = vmul.f32 %v5574_v3, %v5570_v45  ;;  %v5456_v45 = vld [vmem:[%s6916_s9 + $0x168] ss:$16 sps:$4 sm:$0xff]   ;;  %v5476_v3 = vld [vmem:[%s6916_s9 + $0x1cc] ss:$16 sps:$4 sm:$0xff]  }
0x135d   :  { %v3085_v6 = vpack.c.bf16 %v3083_v4, %v3083_v4  ;;  %v5471_v4 = vld [vmem:[%s6916_s9 + $0x1c0] ss:$16 sps:$4 sm:$0xff]  }
0x135f   :  { %5212 = vmatmul.mubr.msk.bf16.vlgmr.msra.gmra.mrb[88].mxu1 %vm507_vm4, %v3085_v6  ;;  %v5479_v6 = vld [vmem:[%s6916_s9 + $0x1e4] ss:$16 sps:$4 sm:$0xff]  }
0x1360   :  { %5228 = vmatpush3.bf16.msra.mxu1 %v5427_v5  ;;  %5235 = vmatprep.mubr.msk.bf16.mxu1 %vm5598_vm0, %v5597_v2  ;;  %v5474_v5 = vld [vmem:[%s6916_s9 + $0x1c8] ss:$16 sps:$4 sm:$0xff]  }
0x1361   :  { %5229 = vmatprep.subr.bf16.mxu1 %v5597_v2 }
0x1364   :  { %5230 = vmatpush3.bf16.msra.mxu1 %v5428_v34  ;;  %v5482_v34 = vld [vmem:[%s6916_s9 + $0x1ec] ss:$16 sps:$4 sm:$0xff]  }
0x1365   :  { %5231 = vmatprep.subr.bf16.mxu1 %v5597_v2 }
0x1368   :  { %5232 = vmatpush3.bf16.msra.mxu1 %v5429_v7  ;;  %v5477_v7 = vld [vmem:[%s6916_s9 + $0x1e0] ss:$16 sps:$4 sm:$0xff]  }
0x1369   :  { %5233 = vmatprep.subr.bf16.mxu1 %v5597_v2 }
0x136c   :  { %5234 = vmatpush3.bf16.msra.mxu1 %v5430_v8  ;;  %v5480_v8 = vld [vmem:[%s6916_s9 + $0x1e8] ss:$16 sps:$4 sm:$0xff]  }
0x136f   :  { %5236 = vmatmul.mubr.msk.bf16.vlgmr.msra.gmra.mrb[92].mxu1 %vm410_vm1, %v2632_v17 }
0x1370   :  { %3637 = vmatprep.mubr.bf16.mxu1 %v5600_v20 }
0x142a   :  { %v3126_v31 = vpop.f32.mrb[84].mxu1 }
0x142b   :  { %v5207_v16 = vpop.f32.mrb[85].mxu1 }
0x142c   :  { %v3129_v17 = vpop.f32.mrb[86].mxu1 }
0x142d   :  { %v5208_v21 = vpop.f32.mrb[87].mxu1 }
0x1432   :  { %v3172_v22 = vpop.f32.mrb[88].mxu1 }
0x1433   :  { %v3178_v24 = vpack.c.bf16 %v3172_v22, %v3126_v31  ;;  %v5213_v32 = vpop.f32.mrb[89].mxu1  ;;  %v4445_v22 = vld [vmem:[%s6917_s7 + $0x1] ss:$0 sm:$0xff] }
0x1434   :  { %v3175_v44 = vpop.f32.mrb[90].mxu1 }
0x1435   :  { %v5214_v35 = vpop.f32.mrb[91].mxu1  ;;  %5224 = vmatmul.mubr.msk.bf16.vlgmr.msra.gmra.mrb[44].mxu0 %vm410_vm1, %v3178_v24 }
0x1436   :  { %3594 = vmatprep.mubr.bf16.mxu0 %v5600_v20  ;;  %v5435_v20 = vld [vmem:[%s6916_s9 + $0x100] ss:$16 sps:$4 sm:$0xff]  }
0x1437   :  { %3563 = vmatpush1.bf16.msra.mxu0 %v5435_v20  ;;  %v5488_v20 = vld [vmem:[%s6919_s10 + $0x1c8] sm:$0xff]  }
0x1438   :  { %3564 = vmatprep.subr.bf16.mxu0 %v5443_v12  ;;  %v5492_v12 = vld [vmem:[%s6919_s10 + $0x1d0] sm:$0xff]  }
0x143b   :  { %3565 = vmatpush1.bf16.msra.mxu0 %v5441_v33  ;;  %v5494_v33 = vld [vmem:[%s6919_s10 + $0x190] sm:$0xff]  }
0x143c   :  { %3566 = vmatprep.subr.bf16.mxu0 %v5449_v50  ;;  %v5504_v50 = vld [vmem:[%s6919_s10 + $0x1e8] sm:$0xff]  }
0x143f   :  { %3567 = vmatpush1.bf16.msra.mxu0 %v5447_v52  ;;  %v5506_v52 = vld [vmem:[%s6919_s10 + $0x1a8] sm:$0xff]  }
0x1440   :  { %3568 = vmatprep.subr.bf16.mxu0 %v5455_v56  ;;  %v5508_v56 = vld [vmem:[%s6919_s10 + $0x1f0] sm:$0xff]  }
0x1442   :  { %v3317_v46 = vpop.f32.mrb[92].mxu1 }
0x1443   :  { %v5237_v2 = vpop.f32.mrb[93].mxu1  ;;  %3569 = vmatpush1.bf16.msra.mxu0 %v5453_v41  ;;  %v5510_v41 = vld [vmem:[%s6919_s10 + $0x1b0] sm:$0xff]  }
0x1444   :  { %v3320_v36 = vpop.f32.mrb[94].mxu1  ;;  %3570 = vmatprep.subr.bf16.mxu0 %v5461_v58  ;;  %v5512_v58 = vld [vmem:[%s6919_s10 + $0x1f8] sm:$0xff]  }
0x1445   :  { %v5238_v37 = vpop.f32.mrb[95].mxu1 }
0x1447   :  { %3571 = vmatpush1.bf16.msra.mxu0 %v5459_v59  ;;  %v5514_v59 = vld [vmem:[%s6919_s10 + $0x1b8] sm:$0xff]  }
0x1448   :  { %3572 = vmatprep.subr.bf16.mxu0 %v5467_v61 }
0x144b   :  { %3573 = vmatpush1.bf16.msra.mxu0 %v5465_v63 }
0x144c   :  { %3574 = vmatprep.subr.bf16.mxu0 %v5473_v1 }
0x144f   :  { %3575 = vmatpush1.bf16.msra.mxu0 %v5471_v4 }
0x1450   :  { %3576 = vmatprep.subr.bf16.mxu0 %v5479_v6 }
0x1453   :  { %3577 = vmatpush1.bf16.msra.mxu0 %v5477_v7 }
0x1508   :  { %v3249_v39 = vpop.f32.mrb[44].mxu0 }
0x1509   :  { %v3318_v40 = vadd.f32 %v3317_v46, %v3249_v39  ;;  %v5225_v42 = vpop.f32.mrb[45].mxu0  ;;  %v4446_v46 = vld [vmem:[%s6918_s8 + $0x1] ss:$0 sm:$0xff] }
0x150a   :  { %v3252_v25 = vpop.f32.mrb[46].mxu0  ;;  %v5484_v42 = vld [vmem:[%s6919_s10 + $0x1c0] sm:$0xff]  }
0x150b   :  { %v6628_v43 = vadd.f32 %v3318_v40, %v6289_v54  ;;  %v3321_v47 = vadd.f32 %v3320_v36, %v3252_v25  ;;  %v5226_v23 = vpop.f32.mrb[47].mxu0  ;;  %v5438_v54 = vld [vmem:[%s6916_s9 + $0x108] ss:$16 sps:$4 sm:$0xff]   ;;  %v5483_v40 = vld [vmem:[%s6919_s10 + $0x140] sm:$0xff]  }
0x150c   :  { %4811 = vmatprep.subr.bf16.mxu0 %v5483_v40  ;;  %v5485_v25 = vld [vmem:[%s6919_s10 + $0x100] sm:$0xff]   ;;  %v5487_v23 = vld [vmem:[%s6919_s10 + $0x148] sm:$0xff]  }
0x150d   :  { %v6631_v29 = vadd.f32 %v3321_v47, %v6293_v55  ;;  %3330 = vadd.xlane.f32.xlu0 %v6628_v43  ;;  %v5440_v55 = vld [vmem:[%s6916_s9 + $0x10c] ss:$16 sps:$4 sm:$0xff]   ;;  %v5486_v47 = vld [vmem:[%s6919_s10 + $0x180] sm:$0xff]  }
0x150e   :  { %3605 = vmatprep.subr.bf16.mxu1 %v5440_v55  ;;  %v5491_v55 = vld [vmem:[%s6919_s10 + $0x150] sm:$0xff]  }
0x150f   :  { %3332 = vadd.xlane.f32.xlu1 %v6631_v29  ;;  %3606 = vmatpush1.bf16.msra.mxu1 %v5438_v54  ;;  %v5490_v54 = vld [vmem:[%s6919_s10 + $0x188] sm:$0xff]  }
0x1510   :  { %3607 = vmatprep.subr.bf16.mxu1 %v5446_v14  ;;  %v5493_v14 = vld [vmem:[%s6919_s10 + $0x110] sm:$0xff]  }
0x1513   :  { %3608 = vmatpush1.bf16.msra.mxu1 %v5444_v18  ;;  %v5495_v18 = vld [vmem:[%s6919_s10 + $0x158] sm:$0xff]  }
0x1514   :  { %3609 = vmatprep.subr.bf16.mxu1 %v5452_v51  ;;  %v5505_v51 = vld [vmem:[%s6919_s10 + $0x128] sm:$0xff]  }
0x1517   :  { %3610 = vmatpush1.bf16.msra.mxu1 %v5450_v53  ;;  %v5507_v53 = vld [vmem:[%s6919_s10 + $0x170] sm:$0xff]  }
0x1518   :  { %3611 = vmatprep.subr.bf16.mxu1 %v5458_v57  ;;  %v5509_v57 = vld [vmem:[%s6919_s10 + $0x130] sm:$0xff]  }
0x151b   :  { %3612 = vmatpush1.bf16.msra.mxu1 %v5456_v45  ;;  %v5511_v45 = vld [vmem:[%s6919_s10 + $0x178] sm:$0xff]  }
0x151c   :  { %3613 = vmatprep.subr.bf16.mxu1 %v5464_v38  ;;  %v5513_v38 = vld [vmem:[%s6919_s10 + $0x138] sm:$0xff]  }
0x151f   :  { %3614 = vmatpush1.bf16.msra.mxu1 %v5462_v60 }
0x1520   :  { %3615 = vmatprep.subr.bf16.mxu1 %v5470_v62 }
0x1523   :  { %3616 = vmatpush1.bf16.msra.mxu1 %v5468_v0 }
0x1524   :  { %3617 = vmatprep.subr.bf16.mxu1 %v5476_v3 }
0x1527   :  { %3618 = vmatpush1.bf16.msra.mxu1 %v5474_v5 }
0x1528   :  { %3619 = vmatprep.subr.bf16.mxu1 %v5482_v34 }
0x152b   :  { %3620 = vmatpush1.bf16.msra.mxu1 %v5480_v8 }
0x152c   :  { %4833 = vmatprep.subr.bf16.mxu1 %v5484_v42 }
0x159a   :  { %v3331_v30 = vpop.xlane.xlu0 %3330 }
0x159b   :  { %v3334_v19 = vmul.f32 0.0078125, %v3331_v30  ;;  %v5496_v30 = vld [vmem:[%s6919_s10 + $0x1d8] sm:$0xff]  }
0x159c   :  { %v3333_v15 = vpop.xlane.xlu1 %3332 }
0x159d   :  { %v6660_v26 = vsub.f32 %v6628_v43, %v3334_v19  ;;  %v3335_v28 = vmul.f32 0.0078125, %v3333_v15  ;;  %v5497_v19 = vld [vmem:[%s6919_s10 + $0x118] sm:$0xff]  }
0x159e   :  { %v5498_v15 = vld [vmem:[%s6919_s10 + $0x198] sm:$0xff]  }
0x159f   :  { %v6663_v48 = vsub.f32 %v6631_v29, %v3335_v28  ;;  %v3338_v27 = vmul.f32 %v6660_v26, %v6660_v26  ;;  %v5500_v28 = vld [vmem:[%s6919_s10 + $0x1e0] sm:$0xff]  }
0x15a1   :  { %3340 = vadd.xlane.f32.xlu0 %v3338_v27  ;;  %v3339_v49 = vmul.f32 %v6663_v48, %v6663_v48  ;;  %v5502_v27 = vld [vmem:[%s6919_s10 + $0x1a0] sm:$0xff]  }
0x15a3   :  { %3342 = vadd.xlane.f32.xlu1 %v3339_v49  ;;  %v5503_v49 = vld [vmem:[%s6919_s10 + $0x168] sm:$0xff]  }
0x162e   :  { %v3341_v10 = vpop.xlane.xlu0 %3340 }
0x162f   :  { %v3344_v13 = vmul.f32 0.0078125, %v3341_v10 }
0x1630   :  { %v3343_v9 = vpop.xlane.xlu1 %3342 }
0x1631   :  { %v3346_v31 = vadd.f32 1e-06, %v3344_v13  ;;  %v3345_v16 = vmul.f32 0.0078125, %v3343_v9 }
0x1633   :  { %5575 = vrsqrt.f32 %v3346_v31  ;;  %v3347_v17 = vadd.f32 1e-06, %v3345_v16 }
0x1635   :  { %5577 = vrsqrt.f32 %v3347_v17 }
0x163d   :  { %v5576_v21 = vpop.eup %5575 }
0x163e   :  { %v3350_v24 = vmul.f32 %v5576_v21, %v6660_v26  ;;  %v5499_v26 = vld [vmem:[%s6919_s10 + $0x160] sm:$0xff]  }
0x163f   :  { %v5578_v32 = vpop.eup %5577 }
0x1640   :  { %v3351_v44 = vmul.f32 %v5578_v32, %v6663_v48  ;;  %v3358_v35 = vmul.f32 %v4445_v22, %v3350_v24  ;;  %v5501_v48 = vld [vmem:[%s6919_s10 + $0x120] sm:$0xff]  }
0x1642   :  { %v3359_v2 = vmul.f32 %v4445_v22, %v3351_v44  ;;  %v3366_v36 = vadd.f32 %v4446_v46, %v3358_v35 }
0x1644   :  { %v3367_v37 = vadd.f32 %v4446_v46, %v3359_v2 }
0x1646   :  { %v3368_v39 = vpack.c.bf16 %v3367_v37, %v3366_v36 }
0x1648   :  { %3595 = vmatmul.mubr.bf16.vlgmr.msra.gmra.mrb[48].mxu0 %v3368_v39  ;;  %3638 = vmatmul.mubr.bf16.vlgmr.msra.gmra.mrb[96].mxu1 %v3368_v39 }
0x1649   :  { %4812 = vmatpush3.bf16.msra.mxu0 %v5485_v25  ;;  %4834 = vmatpush3.bf16.msra.mxu1 %v5486_v47 }
0x164a   :  { %4813 = vmatprep.subr.bf16.mxu0 %v5487_v23  ;;  %4835 = vmatprep.subr.bf16.mxu1 %v5488_v20 }
0x164d   :  { %4814 = vmatpush3.bf16.msra.mxu0 %v5489_v11  ;;  %4836 = vmatpush3.bf16.msra.mxu1 %v5490_v54 }
0x164e   :  { %4815 = vmatprep.subr.bf16.mxu0 %v5491_v55  ;;  %4837 = vmatprep.subr.bf16.mxu1 %v5492_v12 }
0x1651   :  { %4816 = vmatpush3.bf16.msra.mxu0 %v5493_v14  ;;  %4838 = vmatpush3.bf16.msra.mxu1 %v5494_v33 }
0x1652   :  { %4817 = vmatprep.subr.bf16.mxu0 %v5495_v18  ;;  %4839 = vmatprep.subr.bf16.mxu1 %v5496_v30 }
0x1655   :  { %4818 = vmatpush3.bf16.msra.mxu0 %v5497_v19  ;;  %4840 = vmatpush3.bf16.msra.mxu1 %v5498_v15 }
0x1656   :  { %4819 = vmatprep.subr.bf16.mxu0 %v5499_v26  ;;  %4841 = vmatprep.subr.bf16.mxu1 %v5500_v28 }
0x1659   :  { %4820 = vmatpush3.bf16.msra.mxu0 %v5501_v48  ;;  %4842 = vmatpush3.bf16.msra.mxu1 %v5502_v27 }
0x165a   :  { %4821 = vmatprep.subr.bf16.mxu0 %v5503_v49  ;;  %4843 = vmatprep.subr.bf16.mxu1 %v5504_v50 }
0x165d   :  { %4822 = vmatpush3.bf16.msra.mxu0 %v5505_v51  ;;  %4844 = vmatpush3.bf16.msra.mxu1 %v5506_v52 }
0x165e   :  { %4823 = vmatprep.subr.bf16.mxu0 %v5507_v53  ;;  %4845 = vmatprep.subr.bf16.mxu1 %v5508_v56 }
0x1661   :  { %4824 = vmatpush3.bf16.msra.mxu0 %v5509_v57  ;;  %4846 = vmatpush3.bf16.msra.mxu1 %v5510_v41 }
0x1662   :  { %4825 = vmatprep.subr.bf16.mxu0 %v5511_v45  ;;  %4847 = vmatprep.subr.bf16.mxu1 %v5512_v58 }
0x1665   :  { %4826 = vmatpush3.bf16.msra.mxu0 %v5513_v38  ;;  %4848 = vmatpush3.bf16.msra.mxu1 %v5514_v59 }
0x171b   :  { %v6845_v60 = vpop.f32.mrb[48].mxu0  ;;  %v6847_v61 = vpop.f32.mrb[96].mxu1 }
0x171c   :  { %v3648_v62 = vmul.f32 %v6845_v60, %v6845_v60  ;;  %v3650_v63 = vmul.f32 %v6847_v61, %v6847_v61  ;;  %v6853_v0 = vpop.f32.mrb[49].mxu0  ;;  %v6855_v1 = vpop.f32.mrb[97].mxu1 }
0x171d   :  { %v3649_v3 = vmul.f32 %v6853_v0, %v6853_v0  ;;  %v3651_v4 = vmul.f32 %v6855_v1, %v6855_v1  ;;  %v6861_v5 = vpop.f32.mrb[50].mxu0  ;;  %v6863_v6 = vpop.f32.mrb[98].mxu1 }
0x171e   :  { %v3656_v34 = vmul.f32 %v3648_v62, %v6845_v60  ;;  %v3658_v7 = vmul.f32 %v3650_v63, %v6847_v61  ;;  %v3652_v8 = vmul.f32 %v6861_v5, %v6861_v5  ;;  %v3654_v10 = vmul.f32 %v6863_v6, %v6863_v6  ;;  %v6871_v13 = vpop.f32.mrb[51].mxu0  ;;  %v6873_v9 = vpop.f32.mrb[99].mxu1 }
0x171f   :  { %v3657_v31 = vmul.f32 %v3649_v3, %v6853_v0  ;;  %v3659_v16 = vmul.f32 %v3651_v4, %v6855_v1  ;;  %v3653_v17 = vmul.f32 %v6871_v13, %v6871_v13  ;;  %v3655_v21 = vmul.f32 %v6873_v9, %v6873_v9 }
0x1720   :  { %v3664_v22 = vmul.f32 0.044715, %v3656_v34  ;;  %v3666_v24 = vmul.f32 0.044715, %v3658_v7  ;;  %v3660_v32 = vmul.f32 %v3652_v8, %v6861_v5  ;;  %v3662_v44 = vmul.f32 %v3654_v10, %v6863_v6 }
0x1721   :  { %v3665_v35 = vmul.f32 0.044715, %v3657_v31  ;;  %v3667_v46 = vmul.f32 0.044715, %v3659_v16  ;;  %v3661_v2 = vmul.f32 %v3653_v17, %v6871_v13  ;;  %v3663_v36 = vmul.f32 %v3655_v21, %v6873_v9 }
0x1722   :  { %v3672_v37 = vadd.f32 %v3664_v22, %v6845_v60  ;;  %v3674_v39 = vadd.f32 %v3666_v24, %v6847_v61  ;;  %v3668_v40 = vmul.f32 0.044715, %v3660_v32  ;;  %v3670_v42 = vmul.f32 0.044715, %v3662_v44 }
0x1723   :  { %v3673_v25 = vadd.f32 %v3665_v35, %v6853_v0  ;;  %v3675_v47 = vadd.f32 %v3667_v46, %v6855_v1  ;;  %v3669_v23 = vmul.f32 0.044715, %v3661_v2  ;;  %v3671_v20 = vmul.f32 0.044715, %v3663_v36 }
0x1724   :  { %v3680_v11 = vmul.f32 0.7978846, %v3672_v37  ;;  %v3682_v54 = vmul.f32 0.7978846, %v3674_v39  ;;  %v3676_v55 = vadd.f32 %v3668_v40, %v6861_v5  ;;  %v3678_v12 = vadd.f32 %v3670_v42, %v6863_v6 }
0x1725   :  { %v3681_v14 = vmul.f32 0.7978846, %v3673_v25  ;;  %v3683_v33 = vmul.f32 0.7978846, %v3675_v47  ;;  %v3677_v18 = vadd.f32 %v3669_v23, %v6871_v13  ;;  %v3679_v30 = vadd.f32 %v3671_v20, %v6873_v9 }
0x1726   :  { %5579 = vtanh.f32 %v3680_v11  ;;  %v3684_v19 = vmul.f32 0.7978846, %v3676_v55  ;;  %v3686_v15 = vmul.f32 0.7978846, %v3678_v12 }
0x1727   :  { %5581 = vtanh.f32 %v3682_v54  ;;  %v3685_v26 = vmul.f32 0.7978846, %v3677_v18  ;;  %v3687_v28 = vmul.f32 0.7978846, %v3679_v30 }
0x1728   :  { %5583 = vtanh.f32 %v3681_v14 }
0x1729   :  { %5585 = vtanh.f32 %v3683_v33 }
0x172a   :  { %5587 = vtanh.f32 %v3684_v19 }
0x172b   :  { %5589 = vtanh.f32 %v3686_v15 }
0x172c   :  { %5591 = vtanh.f32 %v3685_v26 }
0x172d   :  { %5593 = vtanh.f32 %v3687_v28 }
0x1730   :  { %v5580_v48 = vpop.eup %5579 }
0x1731   :  { %v5582_v27 = vpop.eup %5581  ;;  %v3696_v49 = vadd.f32 1.0, %v5580_v48 }
0x1732   :  { %v5584_v50 = vpop.eup %5583  ;;  %v3698_v51 = vadd.f32 1.0, %v5582_v27 }
0x1733   :  { %v5586_v52 = vpop.eup %5585  ;;  %v3697_v53 = vadd.f32 1.0, %v5584_v50  ;;  %v3704_v45 = vmul.f32 0.5, %v3696_v49 }
0x1734   :  { %v5588_v56 = vpop.eup %5587  ;;  %v3699_v57 = vadd.f32 1.0, %v5586_v52  ;;  %v3706_v59 = vmul.f32 0.5, %v3698_v51 }
0x1735   :  { %v5590_v41 = vpop.eup %5589  ;;  %v3700_v58 = vadd.f32 1.0, %v5588_v56  ;;  %v3705_v3 = vmul.f32 0.5, %v3697_v53  ;;  %v3712_v31 = vmul.f32 %v3704_v45, %v6845_v60 }
0x1736   :  { %v5592_v38 = vpop.eup %5591  ;;  %v3702_v62 = vadd.f32 1.0, %v5590_v41  ;;  %v3707_v7 = vmul.f32 0.5, %v3699_v57  ;;  %v3714_v21 = vmul.f32 %v3706_v59, %v6847_v61 }
0x1737   :  { %v5594_v63 = vpop.eup %5593  ;;  %v3708_v4 = vmul.f32 0.5, %v3700_v58  ;;  %v3701_v34 = vadd.f32 1.0, %v5592_v38  ;;  %v3713_v32 = vmul.f32 %v3705_v3, %v6853_v0 }
0x1738   :  { %v3710_v8 = vmul.f32 0.5, %v3702_v62  ;;  %v3703_v10 = vadd.f32 1.0, %v5594_v63  ;;  %v3715_v46 = vmul.f32 %v3707_v7, %v6855_v1 }
0x1739   :  { %v3716_v16 = vmul.f32 %v3708_v4, %v6861_v5  ;;  %v3709_v17 = vmul.f32 0.5, %v3701_v34 }
0x173a   :  { %v3718_v22 = vmul.f32 %v3710_v8, %v6863_v6  ;;  %v3711_v24 = vmul.f32 0.5, %v3703_v10 }
0x173b   :  { %v3717_v44 = vmul.f32 %v3709_v17, %v6871_v13  ;;  %v3720_v35 = vpack.c.bf16 %v3716_v16, %v3712_v31 }
0x173c   :  { %v3719_v2 = vmul.f32 %v3711_v24, %v6873_v9  ;;  %v3722_v36 = vpack.c.bf16 %v3718_v22, %v3714_v21 }
0x173d   :  { %v3721_v37 = vpack.c.bf16 %v3717_v44, %v3713_v32 }
0x173e   :  { %v3723_v60 = vpack.c.bf16 %v3719_v2, %v3715_v46 }
0x173f   :  { %4013 = vmatprep.mubr.bf16.mxu0 %v3721_v37 }
0x1740   :  { %4054 = vmatprep.mubr.bf16.mxu1 %v3723_v60  ;;  %4014 = vmatmul.mubr.bf16.vlgmr.msra.gmra.mrb[52].mxu0 %v3720_v35 }
0x1741   :  { %4055 = vmatmul.mubr.bf16.vlgmr.msra.gmra.mrb[100].mxu1 %v3722_v36 }
0x1813   :  { %v4827_v61 = vpop.f32.mrb[52].mxu0 }
0x1814   :  { %v4849_v5 = vpop.f32.mrb[100].mxu1  ;;  %v4828_v6 = vpop.f32.mrb[53].mxu0 }
0x1815   :  { %v4829_v39 = vadd.f32 %v4828_v6, %v4827_v61  ;;  %v4850_v40 = vpop.f32.mrb[101].mxu1  ;;  %v4830_v0 = vpop.f32.mrb[54].mxu0 }
0x1816   :  { %v4851_v42 = vadd.f32 %v4850_v40, %v4849_v5  ;;  %v4852_v13 = vpop.f32.mrb[102].mxu1  ;;  %v4831_v25 = vpop.f32.mrb[55].mxu0 }
0x1817   :  { %v4832_v47 = vadd.f32 %v4831_v25, %v4830_v0  ;;  %v4853_v1 = vpop.f32.mrb[103].mxu1 }
0x1818   :  { %v4057_v23 = vadd.f32 %v4851_v42, %v4829_v39  ;;  %v4854_v9 = vadd.f32 %v4853_v1, %v4852_v13 }
0x181a   :  { %v4063_v20 = vadd.f32 %v4057_v23, %v6628_v43  ;;  %v4060_v11 = vadd.f32 %v4854_v9, %v4832_v47 }
0x181c   :  { %4065 = vst [vmem:[%s6920_s11] sm:$0xff] %v4063_v20  ;;  %v4064_v54 = vadd.f32 %v4060_v11, %v6631_v29 }
0x181e   :  { %4066 = vst [vmem:[%s6920_s11 + $0x8] sm:$0xff] %v4064_v54 }

</bundles_post_ra>
